<compile_context>
chip_gen: v5e
topology: v5e:2x2
jax: 0.10.0
libtpu: 0.0.40
codegen_flags: <defaults>
</compile_context>

<pallas_src>
import jax
import jax.numpy as jnp
from jax.experimental import pallas as pl
from jax.experimental.pallas import tpu as pltpu

H = 32              # hidden_nf
N_NODES = 8         # nodes per graph
N_LAYERS = 2        # GCL layers
NORM_FACTOR = 100.0
NORM_CONSTANT = 1.0
LN_EPS = 1e-5

# vector-slab row layout (per GCL layer)
(_VG_W1C_R, _VG_W1C_E, _VG_B1, _VG_G1, _VG_BT1, _VG_B2,
 _VG_WA, _VG_BA, _VG_BN1, _VG_GN1, _VG_BTN1, _VG_BN2) = range(12)
_VG_ROWS = 12
# vector-slab row layout (coord MLP)
(_VE_WC1C_R, _VE_WC1C_E, _VE_BC1, _VE_GC1, _VE_BTC1,
 _VE_BC2, _VE_GC2, _VE_BTC2, _VE_WC3) = range(9)
_VE_ROWS = 9


# ---------------------------------------------------------------------------
# math helpers (used both inside the kernel and in the JAX reference)
# ---------------------------------------------------------------------------
def _layernorm(v, g, b):
    mu = jnp.mean(v, axis=-1, keepdims=True)
    var = jnp.mean((v - mu) ** 2, axis=-1, keepdims=True)
    return (v - mu) * jax.lax.rsqrt(var + LN_EPS) * g + b


def _silu(v):
    return v * jax.nn.sigmoid(v)


def _dot(a, b):
    return jnp.dot(a, b, preferred_element_type=jnp.float32)


def _dotT(a, b):
    # contract the leading (edge) axis of both operands: (E,N),(E,F) -> (N,F)
    return jax.lax.dot_general(a, b, (((0,), (0,)), ((), ())),
                               preferred_element_type=jnp.float32)


def _row(mat, i):
    return mat[i:i + 1]          # (1, H) broadcastable row


# ---------------------------------------------------------------------------
# Fused kernel: coord2diff + N_LAYERS x GCL + EquivariantUpdate, one graph/step
# ---------------------------------------------------------------------------
def equivariant_block_kernel(grow_ref, gcol_ref, h_ref, x_ref, ea_ref,
                             nmask_ref, emask_ref,
                             wg_ref, vg_ref, we_ref, ve_ref,
                             hout_ref, xout_ref):
    grow = grow_ref[...]                     # (E, N) one-hot rows
    gcol = gcol_ref[...]                     # (E, N) one-hot cols
    h = h_ref[...]                           # (N, H)
    x = x_ref[...]                           # (N, 3)
    ea = ea_ref[...]                         # (E, 1) external edge_attr
    nmask = nmask_ref[...]                   # (N, 1)
    emask = emask_ref[...]                   # (E, 1)

    # ---- coord2diff (all in VMEM, never written to HBM) ----
    diff = _dot(grow, x) - _dot(gcol, x)                        # (E, 3)
    radial = jnp.sum(diff * diff, axis=-1, keepdims=True)       # (E, 1)
    inv_norm = pl.reciprocal(jnp.sqrt(radial + 1e-8) + NORM_CONSTANT,
                             approx=True)
    cdiff = diff * inv_norm                                     # (E, 3)

    # ---- N_LAYERS x GCL ----
    for layer in range(N_LAYERS):
        wg = wg_ref[layer]                                      # (6H, H)
        vg = vg_ref[layer]                                      # (12, H)
        w1a, w1b = wg[0:H], wg[H:2 * H]
        w2 = wg[2 * H:3 * H]
        wn1a, wn1b = wg[3 * H:4 * H], wg[4 * H:5 * H]           # wn1b pre-scaled 1/NORM_FACTOR
        wn2 = wg[5 * H:6 * H]

        # edge_model: node-side projections hoisted before the one-hot gather
        pre = (_dot(grow, _dot(h, w1a)) + _dot(gcol, _dot(h, w1b))
               + radial * _row(vg, _VG_W1C_R) + ea * _row(vg, _VG_W1C_E)
               + _row(vg, _VG_B1))                              # (E, H)
        a1 = _silu(_layernorm(pre, _row(vg, _VG_G1), _row(vg, _VG_BT1)))
        mij = _silu(_dot(a1, w2) + _row(vg, _VG_B2))            # (E, H)
        # attention: (H,1) projection as VPU mul + lane reduce (lane-dense, no MXU)
        att_logit = jnp.sum(mij * _row(vg, _VG_WA) + _row(vg, _VG_BA),
                            axis=-1, keepdims=True)             # (E, 1)
        ef = mij * jax.nn.sigmoid(att_logit) * emask            # (E, H)
        # unsorted_segment_sum via transposed-contraction on the MXU;
        # the 1/NORM_FACTOR ('sum' aggregation) is folded into wn1b.
        agg = _dotT(grow, ef)                                   # (N, H)
        n1 = _silu(_layernorm(_dot(h, wn1a) + _dot(agg, wn1b) + _row(vg, _VG_BN1),
                              _row(vg, _VG_GN1), _row(vg, _VG_BTN1)))
        h = (h + _dot(n1, wn2) + _row(vg, _VG_BN2)) * nmask     # (N, H)

    # ---- EquivariantUpdate (coord model, tanh=False path) ----
    we = we_ref[...]                                            # (3H, H)
    ve = ve_ref[...]                                            # (9, H)
    wc1a, wc1b, wc2 = we[0:H], we[H:2 * H], we[2 * H:3 * H]

    c1 = _silu(_layernorm(
        _dot(grow, _dot(h, wc1a)) + _dot(gcol, _dot(h, wc1b))
        + radial * _row(ve, _VE_WC1C_R) + ea * _row(ve, _VE_WC1C_E)
        + _row(ve, _VE_BC1),
        _row(ve, _VE_GC1), _row(ve, _VE_BTC1)))
    c2 = _silu(_layernorm(_dot(c1, wc2) + _row(ve, _VE_BC2),
                          _row(ve, _VE_GC2), _row(ve, _VE_BTC2)))
    # (H,1) projection as lane reduce; wc3 row pre-scaled by 1/NORM_FACTOR
    phi = jnp.sum(c2 * _row(ve, _VE_WC3), axis=-1, keepdims=True)   # (E, 1)
    trans = cdiff * phi * emask                                     # (E, 3)
    xout_ref[...] = (x + _dotT(grow, trans)) * nmask                # (N, 3)
    hout_ref[...] = h * nmask                                       # (N, H)


def _cost_estimate(B, N, E, HH):
    mm = lambda m, k, n: 2 * m * k * n
    gcl = (2 * mm(N, HH, HH) + 2 * mm(E, N, HH) + mm(E, HH, HH)
           + mm(E, N, HH) + 2 * mm(N, HH, HH) + mm(N, HH, HH))
    equ = (2 * mm(N, HH, HH) + 2 * mm(E, N, HH) + mm(E, HH, HH) + mm(E, N, 3))
    coord = 2 * mm(E, N, 3)
    flops = B * (N_LAYERS * gcl + equ + coord)
    transcendentals = B * (N_LAYERS * (2 * E * HH + E + N * HH)
                           + 2 * E * HH + 2 * E)
    bytes_accessed = 4 * (B * (2 * N * HH + 2 * N * 3 + E + N + E)
                          + 2 * E * N
                          + N_LAYERS * (6 * HH * HH + _VG_ROWS * HH)
                          + 3 * HH * HH + _VE_ROWS * HH)
    return pl.CostEstimate(flops=flops, transcendentals=transcendentals,
                           bytes_accessed=bytes_accessed)


@jax.jit
def equivariant_block_forward(h, x, edge_attr_in, node_mask, edge_mask,
                              grow, gcol, wg, vg, we, ve):
    B, N, HH = h.shape
    E = grow.shape[0]
    perb = lambda b: (b, 0, 0)
    c2 = lambda b: (0, 0)
    c3 = lambda b: (0, 0, 0)
    in_specs = [
        pl.BlockSpec((E, N), c2),                    # grow   (shared topology)
        pl.BlockSpec((E, N), c2),                    # gcol
        pl.BlockSpec((None, N, HH), perb),           # h
        pl.BlockSpec((None, N, 3), perb),            # x
        pl.BlockSpec((None, E, 1), perb),            # edge_attr_in
        pl.BlockSpec((None, N, 1), perb),            # node_mask
        pl.BlockSpec((None, E, 1), perb),            # edge_mask
        pl.BlockSpec((N_LAYERS, 6 * HH, HH), c3),    # GCL weight slab (resident)
        pl.BlockSpec((N_LAYERS, _VG_ROWS, HH), c3),  # GCL vector slab
        pl.BlockSpec((3 * HH, HH), c2),              # coord-MLP weight slab
        pl.BlockSpec((_VE_ROWS, HH), c2),            # coord-MLP vector slab
    ]
    out_specs = (pl.BlockSpec((None, N, HH), perb),
                 pl.BlockSpec((None, N, 3), perb))
    return pl.pallas_call(
        equivariant_block_kernel,
        grid=(B,),
        out_shape=(jax.ShapeDtypeStruct((B, N, HH), jnp.float32),
                   jax.ShapeDtypeStruct((B, N, 3), jnp.float32)),
        in_specs=in_specs,
        out_specs=out_specs,
        compiler_params=pltpu.CompilerParams(
            dimension_semantics=("parallel",)),
        cost_estimate=_cost_estimate(B, N, E, HH),
    )(grow, gcol, h, x, edge_attr_in, node_mask, edge_mask, wg, vg, we, ve)


# ---------------------------------------------------------------------------
# Parameter init (PyTorch-like layouts) and packing into kernel slabs
# ---------------------------------------------------------------------------
def _linear_init(key, fan_in, fan_out):
    wk, bk = jax.random.split(key)
    bound = 1.0 / (fan_in ** 0.5)
    w = jax.random.uniform(wk, (fan_in, fan_out), minval=-bound, maxval=bound,
                           dtype=jnp.float32)
    b = jax.random.uniform(bk, (fan_out,), minval=-bound, maxval=bound,
                           dtype=jnp.float32)
    return w, b


def init_gcl_params(key):
    ks = jax.random.split(key, 5)
    w1, b1 = _linear_init(ks[0], 2 * H + 2, H)     # edge_mlp linear 1
    w2, b2 = _linear_init(ks[1], H, H)             # edge_mlp linear 2
    wa, ba = _linear_init(ks[2], H, 1)             # attention linear
    wn1, bn1 = _linear_init(ks[3], 2 * H, H)       # node_mlp linear 1
    wn2, bn2 = _linear_init(ks[4], H, H)           # node_mlp linear 2
    ones = jnp.ones((H,), jnp.float32)
    zeros = jnp.zeros((H,), jnp.float32)
    return dict(w1=w1, b1=b1, g1=ones, bt1=zeros, w2=w2, b2=b2, wa=wa, ba=ba,
                wn1=wn1, bn1=bn1, gn1=ones, btn1=zeros, wn2=wn2, bn2=bn2)


def init_equiv_params(key):
    ks = jax.random.split(key, 3)
    wc1, bc1 = _linear_init(ks[0], 2 * H + 2, H)   # coord_mlp linear 1
    wc2, bc2 = _linear_init(ks[1], H, H)           # coord_mlp linear 2
    bound = 0.001 * (6.0 / (H + 1)) ** 0.5         # xavier_uniform gain=0.001
    wc3 = jax.random.uniform(ks[2], (H, 1), minval=-bound, maxval=bound,
                             dtype=jnp.float32)
    ones = jnp.ones((H,), jnp.float32)
    zeros = jnp.zeros((H,), jnp.float32)
    return dict(wc1=wc1, bc1=bc1, gc1=ones, btc1=zeros,
                wc2=wc2, bc2=bc2, gc2=ones, btc2=zeros, wc3=wc3)


def pack_gcl_params(p):
    wg = jnp.concatenate(
        [p["w1"][:H], p["w1"][H:2 * H], p["w2"],
         p["wn1"][:H], p["wn1"][H:] * (1.0 / NORM_FACTOR),   # fold 'sum' norm
         p["wn2"]], axis=0)                                  # (6H, H)
    ba_row = jnp.zeros((H,), jnp.float32).at[0].set(p["ba"][0])
    vg = jnp.stack(
        [p["w1"][2 * H], p["w1"][2 * H + 1],                 # radial / edge_attr cols
         p["b1"], p["g1"], p["bt1"], p["b2"],
         p["wa"][:, 0], ba_row,
         p["bn1"], p["gn1"], p["btn1"], p["bn2"]], axis=0)   # (12, H)
    return wg, vg


def pack_gcl_stack(layers):
    packed = [pack_gcl_params(p) for p in layers]
    return (jnp.stack([w for w, _ in packed], axis=0),       # (L, 6H, H)
            jnp.stack([v for _, v in packed], axis=0))       # (L, 12, H)


def pack_equiv_params(p):
    we = jnp.concatenate([p["wc1"][:H], p["wc1"][H:2 * H], p["wc2"]], axis=0)
    ve = jnp.stack(
        [p["wc1"][2 * H], p["wc1"][2 * H + 1],
         p["bc1"], p["gc1"], p["btc1"],
         p["bc2"], p["gc2"], p["btc2"],
         p["wc3"][:, 0] * (1.0 / NORM_FACTOR)], axis=0)      # (9, H)
    return we, ve


# ---------------------------------------------------------------------------
# Pure-JAX reference (mirrors the PyTorch forward), uses the raw params
# ---------------------------------------------------------------------------
def _ref_gcl(h, row, col, edge_attr, emask, nmask, p):
    inp = jnp.concatenate([h[row], h[col], edge_attr], axis=1)
    a1 = _silu(_layernorm(inp @ p["w1"] + p["b1"], p["g1"], p["bt1"]))
    mij = _silu(a1 @ p["w2"] + p["b2"])
    att = jax.nn.sigmoid(mij @ p["wa"] + p["ba"])
    ef = mij * att * emask
    agg = jax.ops.segment_sum(ef, row, num_segments=h.shape[0]) / NORM_FACTOR
    inp_n = jnp.concatenate([h, agg], axis=1)
    n1 = _silu(_layernorm(inp_n @ p["wn1"] + p["bn1"], p["gn1"], p["btn1"]))
    return (h + n1 @ p["wn2"] + p["bn2"]) * nmask


def _ref_equiv(h, x, row, col, edge_attr, cdiff, emask, nmask, p):
    inp = jnp.concatenate([h[row], h[col], edge_attr], axis=1)
    c1 = _silu(_layernorm(inp @ p["wc1"] + p["bc1"], p["gc1"], p["btc1"]))
    c2 = _silu(_layernorm(c1 @ p["wc2"] + p["bc2"], p["gc2"], p["btc2"]))
    trans = cdiff * (c2 @ p["wc3"]) * emask
    agg = jax.ops.segment_sum(trans, row, num_segments=x.shape[0]) / NORM_FACTOR
    return (x + agg) * nmask


def ref_block(h, x, row, col, node_mask, edge_mask, edge_attr_in, params):
    cdiff = x[row] - x[col]
    radial = jnp.sum(cdiff ** 2, axis=1, keepdims=True)
    cdiff = cdiff / (jnp.sqrt(radial + 1e-8) + NORM_CONSTANT)
    edge_attr = jnp.concatenate([radial, edge_attr_in], axis=1)
    for i in range(N_LAYERS):
        h = _ref_gcl(h, row, col, edge_attr, edge_mask, node_mask,
                     params["gcl"][i])
    x = _ref_equiv(h, x, row, col, edge_attr, cdiff, edge_mask, node_mask,
                   params["equiv"])
    return h * node_mask, x


# ---------------------------------------------------------------------------
if __name__ == "__main__":
    key = jax.random.PRNGKey(0)
    k_h, k_x, k_ea, k_p0, k_p1, k_pe = jax.random.split(key, 6)

    B = 4  # graphs per batch (grid axis, 'parallel')

    # fully-connected graph (no self loops), topology shared across the batch
    rows, cols = [], []
    for i in range(N_NODES):
        for j in range(N_NODES):
            if i != j:
                rows.append(i)
                cols.append(j)
    row = jnp.array(rows, dtype=jnp.int32)
    col = jnp.array(cols, dtype=jnp.int32)
    E = int(row.shape[0])
    grow = jax.nn.one_hot(row, N_NODES, dtype=jnp.float32)     # (E, N)
    gcol = jax.nn.one_hot(col, N_NODES, dtype=jnp.float32)     # (E, N)

    h = jax.random.normal(k_h, (B, N_NODES, H), dtype=jnp.float32)
    x = jax.random.normal(k_x, (B, N_NODES, 3), dtype=jnp.float32)
    edge_attr_in = jax.random.normal(k_ea, (B, E, 1), dtype=jnp.float32)

    # per-graph node masks with varying valid-node counts
    n_valid = jnp.array([8, 7, 6, 8], dtype=jnp.int32)
    node_mask = (jnp.arange(N_NODES)[None, :] < n_valid[:, None]
                 ).astype(jnp.float32)[..., None]              # (B, N, 1)
    edge_mask = (node_mask[:, row, 0] * node_mask[:, col, 0])[..., None]  # (B, E, 1)

    raw_params = {"gcl": [init_gcl_params(k_p0), init_gcl_params(k_p1)],
                  "equiv": init_equiv_params(k_pe)}
    wg, vg = pack_gcl_stack(raw_params["gcl"])
    we, ve = pack_equiv_params(raw_params["equiv"])

    h_out, x_out = equivariant_block_forward(
        h, x, edge_attr_in, node_mask, edge_mask, grow, gcol, wg, vg, we, ve)
    jax.block_until_ready((h_out, x_out))

    # float32-precision reference; kernel uses default (bf16 MXU pass) precision,
    # so compare with a bf16-appropriate tolerance.
    with jax.default_matmul_precision("float32"):
        ref_fn = jax.vmap(lambda hh, xx, ea, nm, em: ref_block(
            hh, xx, row, col, nm, em, ea, raw_params))
        h_ref, x_ref = ref_fn(h, x, edge_attr_in, node_mask, edge_mask)

    max_dh = float(jnp.max(jnp.abs(h_out - h_ref)))
    max_dx = float(jnp.max(jnp.abs(x_out - x_ref)))
    assert max_dh < 5e-2 and max_dx < 5e-2, (max_dh, max_dx)

    print("KERNEL_OK")
</pallas_src>

<mosaic_0001>
module attributes {stable_mosaic.version = 11 : i64} {
  func.func @equivariant_block_kernel(%arg0: i32, %arg1: memref<56x8xf32, #tpu.memory_space<vmem>>, %arg2: memref<56x8xf32, #tpu.memory_space<vmem>>, %arg3: memref<1x8x32xf32, #tpu.memory_space<vmem>>, %arg4: memref<1x8x3xf32, #tpu.memory_space<vmem>>, %arg5: memref<1x56x1xf32, #tpu.memory_space<vmem>>, %arg6: memref<1x8x1xf32, #tpu.memory_space<vmem>>, %arg7: memref<1x56x1xf32, #tpu.memory_space<vmem>>, %arg8: memref<2x192x32xf32, #tpu.memory_space<vmem>>, %arg9: memref<2x12x32xf32, #tpu.memory_space<vmem>>, %arg10: memref<96x32xf32, #tpu.memory_space<vmem>>, %arg11: memref<9x32xf32, #tpu.memory_space<vmem>>, %arg12: memref<1x8x32xf32, #tpu.memory_space<vmem>>, %arg13: memref<1x8x3xf32, #tpu.memory_space<vmem>>) attributes {dimension_semantics = [#tpu.dimension_semantics<parallel>], iteration_bounds = array<i64: 4>, scalar_prefetch = 0 : i64, scratch_operands = 0 : i64, tpu.core_type = #tpu.core_type<tc>, window_params = [{pipeline_mode = #tpu.pipeline_mode<synchronous>, transform_indices = @transform_0, window_bounds = array<i64: 56, 8>}, {pipeline_mode = #tpu.pipeline_mode<synchronous>, transform_indices = @transform_1, window_bounds = array<i64: 56, 8>}, {transform_indices = @transform_2, window_bounds = array<i64: 1, 8, 32>}, {transform_indices = @transform_3, window_bounds = array<i64: 1, 8, 3>}, {transform_indices = @transform_4, window_bounds = array<i64: 1, 56, 1>}, {transform_indices = @transform_5, window_bounds = array<i64: 1, 8, 1>}, {transform_indices = @transform_6, window_bounds = array<i64: 1, 56, 1>}, {pipeline_mode = #tpu.pipeline_mode<synchronous>, transform_indices = @transform_7, window_bounds = array<i64: 2, 192, 32>}, {pipeline_mode = #tpu.pipeline_mode<synchronous>, transform_indices = @transform_8, window_bounds = array<i64: 2, 12, 32>}, {pipeline_mode = #tpu.pipeline_mode<synchronous>, transform_indices = @transform_9, window_bounds = array<i64: 96, 32>}, {pipeline_mode = #tpu.pipeline_mode<synchronous>, transform_indices = @transform_10, window_bounds = array<i64: 9, 32>}, {transform_indices = @transform_11, window_bounds = array<i64: 1, 8, 32>}, {transform_indices = @transform_12, window_bounds = array<i64: 1, 8, 3>}]} {
    %c0 = arith.constant 0 : index
    %c0_0 = arith.constant 0 : index
    %0 = vector.load %arg1[%c0, %c0_0] : memref<56x8xf32, #tpu.memory_space<vmem>>, vector<56x8xf32>
    %c0_1 = arith.constant 0 : index
    %c0_2 = arith.constant 0 : index
    %1 = vector.load %arg2[%c0_1, %c0_2] : memref<56x8xf32, #tpu.memory_space<vmem>>, vector<56x8xf32>
    %c0_3 = arith.constant 0 : index
    %c0_4 = arith.constant 0 : index
    %c0_5 = arith.constant 0 : index
    %2 = vector.load %arg3[%c0_3, %c0_4, %c0_5] : memref<1x8x32xf32, #tpu.memory_space<vmem>>, vector<1x8x32xf32>
    %3 = vector.shape_cast %2 : vector<1x8x32xf32> to vector<8x32xf32>
    %c0_6 = arith.constant 0 : index
    %c0_7 = arith.constant 0 : index
    %c0_8 = arith.constant 0 : index
    %4 = vector.load %arg4[%c0_6, %c0_7, %c0_8] : memref<1x8x3xf32, #tpu.memory_space<vmem>>, vector<1x8x3xf32>
    %5 = vector.shape_cast %4 : vector<1x8x3xf32> to vector<8x3xf32>
    %c0_9 = arith.constant 0 : index
    %c0_10 = arith.constant 0 : index
    %c0_11 = arith.constant 0 : index
    %6 = vector.load %arg5[%c0_9, %c0_10, %c0_11] : memref<1x56x1xf32, #tpu.memory_space<vmem>>, vector<1x56x1xf32>
    %7 = vector.shape_cast %6 : vector<1x56x1xf32> to vector<56x1xf32>
    %c0_12 = arith.constant 0 : index
    %c0_13 = arith.constant 0 : index
    %c0_14 = arith.constant 0 : index
    %8 = vector.load %arg6[%c0_12, %c0_13, %c0_14] : memref<1x8x1xf32, #tpu.memory_space<vmem>>, vector<1x8x1xf32>
    %9 = vector.shape_cast %8 : vector<1x8x1xf32> to vector<8x1xf32>
    %c0_15 = arith.constant 0 : index
    %c0_16 = arith.constant 0 : index
    %c0_17 = arith.constant 0 : index
    %10 = vector.load %arg7[%c0_15, %c0_16, %c0_17] : memref<1x56x1xf32, #tpu.memory_space<vmem>>, vector<1x56x1xf32>
    %11 = vector.shape_cast %10 : vector<1x56x1xf32> to vector<56x1xf32>
    %cst = arith.constant dense<0.000000e+00> : vector<56x3xf32>
    %12 = tpu.matmul %0, %5, %cst {dimension_numbers = #tpu.dot_dimension_numbers<[1], [0], [0], [1], [0, 0, 1, 1], [], []>} : vector<56x8xf32>, vector<8x3xf32>, vector<56x3xf32> -> vector<56x3xf32>
    %cst_18 = arith.constant dense<0.000000e+00> : vector<56x3xf32>
    %13 = tpu.matmul %1, %5, %cst_18 {dimension_numbers = #tpu.dot_dimension_numbers<[1], [0], [0], [1], [0, 0, 1, 1], [], []>} : vector<56x8xf32>, vector<8x3xf32>, vector<56x3xf32> -> vector<56x3xf32>
    %14 = arith.subf %12, %13 : vector<56x3xf32>
    %15 = arith.mulf %14, %14 : vector<56x3xf32>
    %cst_19 = arith.constant dense<0.000000e+00> : vector<56xf32>
    %16 = vector.multi_reduction <add>, %15, %cst_19 [1] : vector<56x3xf32> to vector<56xf32>
    %17 = vector.shape_cast %16 : vector<56xf32> to vector<56x1xf32>
    %cst_20 = arith.constant 9.99999993E-9 : f32
    %18 = vector.broadcast %cst_20 : f32 to vector<56x1xf32>
    %19 = arith.addf %17, %18 : vector<56x1xf32>
    %20 = math.sqrt %19 : vector<56x1xf32>
    %cst_21 = arith.constant 1.000000e+00 : f32
    %21 = vector.broadcast %cst_21 : f32 to vector<56x1xf32>
    %22 = arith.addf %20, %21 : vector<56x1xf32>
    %23 = tpu.reciprocal %22 {approx = true} : vector<56x1xf32> -> vector<56x1xf32>
    %24 = vector.broadcast %23 : vector<56x1xf32> to vector<56x3xf32>
    %25 = arith.mulf %14, %24 : vector<56x3xf32>
    %c0_22 = arith.constant 0 : index
    %c0_23 = arith.constant 0 : index
    %c0_24 = arith.constant 0 : index
    %26 = vector.load %arg8[%c0_22, %c0_23, %c0_24] : memref<2x192x32xf32, #tpu.memory_space<vmem>>, vector<1x192x32xf32>
    %27 = vector.shape_cast %26 : vector<1x192x32xf32> to vector<192x32xf32>
    %c0_25 = arith.constant 0 : index
    %c0_26 = arith.constant 0 : index
    %c0_27 = arith.constant 0 : index
    %28 = vector.load %arg9[%c0_25, %c0_26, %c0_27] : memref<2x12x32xf32, #tpu.memory_space<vmem>>, vector<1x12x32xf32>
    %29 = vector.shape_cast %28 : vector<1x12x32xf32> to vector<12x32xf32>
    %30 = vector.extract_strided_slice %27 {offsets = [0, 0], sizes = [32, 32], strides = [1, 1]} : vector<192x32xf32> to vector<32x32xf32>
    %31 = vector.extract_strided_slice %27 {offsets = [32, 0], sizes = [32, 32], strides = [1, 1]} : vector<192x32xf32> to vector<32x32xf32>
    %32 = vector.extract_strided_slice %27 {offsets = [64, 0], sizes = [32, 32], strides = [1, 1]} : vector<192x32xf32> to vector<32x32xf32>
    %33 = vector.extract_strided_slice %27 {offsets = [96, 0], sizes = [32, 32], strides = [1, 1]} : vector<192x32xf32> to vector<32x32xf32>
    %34 = vector.extract_strided_slice %27 {offsets = [128, 0], sizes = [32, 32], strides = [1, 1]} : vector<192x32xf32> to vector<32x32xf32>
    %35 = vector.extract_strided_slice %27 {offsets = [160, 0], sizes = [32, 32], strides = [1, 1]} : vector<192x32xf32> to vector<32x32xf32>
    %cst_28 = arith.constant dense<0.000000e+00> : vector<8x32xf32>
    %36 = tpu.matmul %3, %30, %cst_28 {dimension_numbers = #tpu.dot_dimension_numbers<[1], [0], [0], [1], [0, 0, 1, 1], [], []>} : vector<8x32xf32>, vector<32x32xf32>, vector<8x32xf32> -> vector<8x32xf32>
    %cst_29 = arith.constant dense<0.000000e+00> : vector<56x32xf32>
    %37 = tpu.matmul %0, %36, %cst_29 {dimension_numbers = #tpu.dot_dimension_numbers<[1], [0], [0], [1], [0, 0, 1, 1], [], []>} : vector<56x8xf32>, vector<8x32xf32>, vector<56x32xf32> -> vector<56x32xf32>
    %cst_30 = arith.constant dense<0.000000e+00> : vector<8x32xf32>
    %38 = tpu.matmul %3, %31, %cst_30 {dimension_numbers = #tpu.dot_dimension_numbers<[1], [0], [0], [1], [0, 0, 1, 1], [], []>} : vector<8x32xf32>, vector<32x32xf32>, vector<8x32xf32> -> vector<8x32xf32>
    %cst_31 = arith.constant dense<0.000000e+00> : vector<56x32xf32>
    %39 = tpu.matmul %1, %38, %cst_31 {dimension_numbers = #tpu.dot_dimension_numbers<[1], [0], [0], [1], [0, 0, 1, 1], [], []>} : vector<56x8xf32>, vector<8x32xf32>, vector<56x32xf32> -> vector<56x32xf32>
    %40 = arith.addf %37, %39 : vector<56x32xf32>
    %41 = vector.extract_strided_slice %29 {offsets = [0, 0], sizes = [1, 32], strides = [1, 1]} : vector<12x32xf32> to vector<1x32xf32>
    %42 = vector.broadcast %17 : vector<56x1xf32> to vector<56x32xf32>
    %43 = vector.broadcast %41 : vector<1x32xf32> to vector<56x32xf32>
    %44 = arith.mulf %42, %43 : vector<56x32xf32>
    %45 = arith.addf %40, %44 : vector<56x32xf32>
    %46 = vector.extract_strided_slice %29 {offsets = [1, 0], sizes = [1, 32], strides = [1, 1]} : vector<12x32xf32> to vector<1x32xf32>
    %47 = vector.broadcast %7 : vector<56x1xf32> to vector<56x32xf32>
    %48 = vector.broadcast %46 : vector<1x32xf32> to vector<56x32xf32>
    %49 = arith.mulf %47, %48 : vector<56x32xf32>
    %50 = arith.addf %45, %49 : vector<56x32xf32>
    %51 = vector.extract_strided_slice %29 {offsets = [2, 0], sizes = [1, 32], strides = [1, 1]} : vector<12x32xf32> to vector<1x32xf32>
    %52 = vector.broadcast %51 : vector<1x32xf32> to vector<56x32xf32>
    %53 = arith.addf %50, %52 : vector<56x32xf32>
    %54 = vector.extract_strided_slice %29 {offsets = [3, 0], sizes = [1, 32], strides = [1, 1]} : vector<12x32xf32> to vector<1x32xf32>
    %55 = vector.extract_strided_slice %29 {offsets = [4, 0], sizes = [1, 32], strides = [1, 1]} : vector<12x32xf32> to vector<1x32xf32>
    %cst_32 = arith.constant dense<0.000000e+00> : vector<56xf32>
    %56 = vector.multi_reduction <add>, %53, %cst_32 [1] : vector<56x32xf32> to vector<56xf32>
    %57 = vector.shape_cast %56 : vector<56xf32> to vector<56x1xf32>
    %cst_33 = arith.constant 3.200000e+01 : f32
    %58 = vector.broadcast %cst_33 : f32 to vector<56x1xf32>
    %59 = arith.divf %57, %58 : vector<56x1xf32>
    %60 = vector.broadcast %59 : vector<56x1xf32> to vector<56x32xf32>
    %61 = arith.subf %53, %60 : vector<56x32xf32>
    %62 = arith.mulf %61, %61 : vector<56x32xf32>
    %cst_34 = arith.constant dense<0.000000e+00> : vector<56xf32>
    %63 = vector.multi_reduction <add>, %62, %cst_34 [1] : vector<56x32xf32> to vector<56xf32>
    %64 = vector.shape_cast %63 : vector<56xf32> to vector<56x1xf32>
    %cst_35 = arith.constant 3.200000e+01 : f32
    %65 = vector.broadcast %cst_35 : f32 to vector<56x1xf32>
    %66 = arith.divf %64, %65 : vector<56x1xf32>
    %67 = vector.broadcast %59 : vector<56x1xf32> to vector<56x32xf32>
    %68 = arith.subf %53, %67 : vector<56x32xf32>
    %cst_36 = arith.constant 9.99999974E-6 : f32
    %69 = vector.broadcast %cst_36 : f32 to vector<56x1xf32>
    %70 = arith.addf %66, %69 : vector<56x1xf32>
    %71 = math.rsqrt %70 : vector<56x1xf32>
    %72 = vector.broadcast %71 : vector<56x1xf32> to vector<56x32xf32>
    %73 = arith.mulf %68, %72 : vector<56x32xf32>
    %74 = vector.broadcast %54 : vector<1x32xf32> to vector<56x32xf32>
    %75 = arith.mulf %73, %74 : vector<56x32xf32>
    %76 = vector.broadcast %55 : vector<1x32xf32> to vector<56x32xf32>
    %77 = arith.addf %75, %76 : vector<56x32xf32>
    %78 = arith.negf %77 : vector<56x32xf32>
    %79 = math.exp %78 : vector<56x32xf32>
    %cst_37 = arith.constant 1.000000e+00 : f32
    %80 = vector.broadcast %cst_37 : f32 to vector<56x32xf32>
    %81 = arith.addf %80, %79 : vector<56x32xf32>
    %82 = arith.divf %80, %81 : vector<56x32xf32>
    %83 = arith.mulf %77, %82 : vector<56x32xf32>
    %cst_38 = arith.constant dense<0.000000e+00> : vector<56x32xf32>
    %84 = tpu.matmul %83, %32, %cst_38 {dimension_numbers = #tpu.dot_dimension_numbers<[1], [0], [0], [1], [0, 0, 1, 1], [], []>} : vector<56x32xf32>, vector<32x32xf32>, vector<56x32xf32> -> vector<56x32xf32>
    %85 = vector.extract_strided_slice %29 {offsets = [5, 0], sizes = [1, 32], strides = [1, 1]} : vector<12x32xf32> to vector<1x32xf32>
    %86 = vector.broadcast %85 : vector<1x32xf32> to vector<56x32xf32>
    %87 = arith.addf %84, %86 : vector<56x32xf32>
    %88 = arith.negf %87 : vector<56x32xf32>
    %89 = math.exp %88 : vector<56x32xf32>
    %cst_39 = arith.constant 1.000000e+00 : f32
    %90 = vector.broadcast %cst_39 : f32 to vector<56x32xf32>
    %91 = arith.addf %90, %89 : vector<56x32xf32>
    %92 = arith.divf %90, %91 : vector<56x32xf32>
    %93 = arith.mulf %87, %92 : vector<56x32xf32>
    %94 = vector.extract_strided_slice %29 {offsets = [6, 0], sizes = [1, 32], strides = [1, 1]} : vector<12x32xf32> to vector<1x32xf32>
    %95 = vector.broadcast %94 : vector<1x32xf32> to vector<56x32xf32>
    %96 = arith.mulf %93, %95 : vector<56x32xf32>
    %97 = vector.extract_strided_slice %29 {offsets = [7, 0], sizes = [1, 32], strides = [1, 1]} : vector<12x32xf32> to vector<1x32xf32>
    %98 = vector.broadcast %97 : vector<1x32xf32> to vector<56x32xf32>
    %99 = arith.addf %96, %98 : vector<56x32xf32>
    %cst_40 = arith.constant dense<0.000000e+00> : vector<56xf32>
    %100 = vector.multi_reduction <add>, %99, %cst_40 [1] : vector<56x32xf32> to vector<56xf32>
    %101 = vector.shape_cast %100 : vector<56xf32> to vector<56x1xf32>
    %102 = arith.negf %101 : vector<56x1xf32>
    %103 = math.exp %102 : vector<56x1xf32>
    %cst_41 = arith.constant 1.000000e+00 : f32
    %104 = vector.broadcast %cst_41 : f32 to vector<56x1xf32>
    %105 = arith.addf %104, %103 : vector<56x1xf32>
    %106 = arith.divf %104, %105 : vector<56x1xf32>
    %107 = vector.broadcast %106 : vector<56x1xf32> to vector<56x32xf32>
    %108 = arith.mulf %93, %107 : vector<56x32xf32>
    %109 = vector.broadcast %11 : vector<56x1xf32> to vector<56x32xf32>
    %110 = arith.mulf %108, %109 : vector<56x32xf32>
    %cst_42 = arith.constant dense<0.000000e+00> : vector<8x32xf32>
    %111 = tpu.matmul %0, %110, %cst_42 {dimension_numbers = #tpu.dot_dimension_numbers<[0], [0], [1], [1], [0, 1, 1, 1], [], []>} : vector<56x8xf32>, vector<56x32xf32>, vector<8x32xf32> -> vector<8x32xf32>
    %cst_43 = arith.constant dense<0.000000e+00> : vector<8x32xf32>
    %112 = tpu.matmul %3, %33, %cst_43 {dimension_numbers = #tpu.dot_dimension_numbers<[1], [0], [0], [1], [0, 0, 1, 1], [], []>} : vector<8x32xf32>, vector<32x32xf32>, vector<8x32xf32> -> vector<8x32xf32>
    %cst_44 = arith.constant dense<0.000000e+00> : vector<8x32xf32>
    %113 = tpu.matmul %111, %34, %cst_44 {dimension_numbers = #tpu.dot_dimension_numbers<[1], [0], [0], [1], [0, 0, 1, 1], [], []>} : vector<8x32xf32>, vector<32x32xf32>, vector<8x32xf32> -> vector<8x32xf32>
    %114 = arith.addf %112, %113 : vector<8x32xf32>
    %115 = vector.extract_strided_slice %29 {offsets = [8, 0], sizes = [1, 32], strides = [1, 1]} : vector<12x32xf32> to vector<1x32xf32>
    %116 = vector.broadcast %115 : vector<1x32xf32> to vector<8x32xf32>
    %117 = arith.addf %114, %116 : vector<8x32xf32>
    %118 = vector.extract_strided_slice %29 {offsets = [9, 0], sizes = [1, 32], strides = [1, 1]} : vector<12x32xf32> to vector<1x32xf32>
    %119 = vector.extract_strided_slice %29 {offsets = [10, 0], sizes = [1, 32], strides = [1, 1]} : vector<12x32xf32> to vector<1x32xf32>
    %cst_45 = arith.constant dense<0.000000e+00> : vector<8xf32>
    %120 = vector.multi_reduction <add>, %117, %cst_45 [1] : vector<8x32xf32> to vector<8xf32>
    %121 = vector.shape_cast %120 : vector<8xf32> to vector<8x1xf32>
    %cst_46 = arith.constant 3.200000e+01 : f32
    %122 = vector.broadcast %cst_46 : f32 to vector<8x1xf32>
    %123 = arith.divf %121, %122 : vector<8x1xf32>
    %124 = vector.broadcast %123 : vector<8x1xf32> to vector<8x32xf32>
    %125 = arith.subf %117, %124 : vector<8x32xf32>
    %126 = arith.mulf %125, %125 : vector<8x32xf32>
    %cst_47 = arith.constant dense<0.000000e+00> : vector<8xf32>
    %127 = vector.multi_reduction <add>, %126, %cst_47 [1] : vector<8x32xf32> to vector<8xf32>
    %128 = vector.shape_cast %127 : vector<8xf32> to vector<8x1xf32>
    %cst_48 = arith.constant 3.200000e+01 : f32
    %129 = vector.broadcast %cst_48 : f32 to vector<8x1xf32>
    %130 = arith.divf %128, %129 : vector<8x1xf32>
    %131 = vector.broadcast %123 : vector<8x1xf32> to vector<8x32xf32>
    %132 = arith.subf %117, %131 : vector<8x32xf32>
    %cst_49 = arith.constant 9.99999974E-6 : f32
    %133 = vector.broadcast %cst_49 : f32 to vector<8x1xf32>
    %134 = arith.addf %130, %133 : vector<8x1xf32>
    %135 = math.rsqrt %134 : vector<8x1xf32>
    %136 = vector.broadcast %135 : vector<8x1xf32> to vector<8x32xf32>
    %137 = arith.mulf %132, %136 : vector<8x32xf32>
    %138 = vector.broadcast %118 : vector<1x32xf32> to vector<8x32xf32>
    %139 = arith.mulf %137, %138 : vector<8x32xf32>
    %140 = vector.broadcast %119 : vector<1x32xf32> to vector<8x32xf32>
    %141 = arith.addf %139, %140 : vector<8x32xf32>
    %142 = arith.negf %141 : vector<8x32xf32>
    %143 = math.exp %142 : vector<8x32xf32>
    %cst_50 = arith.constant 1.000000e+00 : f32
    %144 = vector.broadcast %cst_50 : f32 to vector<8x32xf32>
    %145 = arith.addf %144, %143 : vector<8x32xf32>
    %146 = arith.divf %144, %145 : vector<8x32xf32>
    %147 = arith.mulf %141, %146 : vector<8x32xf32>
    %cst_51 = arith.constant dense<0.000000e+00> : vector<8x32xf32>
    %148 = tpu.matmul %147, %35, %cst_51 {dimension_numbers = #tpu.dot_dimension_numbers<[1], [0], [0], [1], [0, 0, 1, 1], [], []>} : vector<8x32xf32>, vector<32x32xf32>, vector<8x32xf32> -> vector<8x32xf32>
    %149 = arith.addf %3, %148 : vector<8x32xf32>
    %150 = vector.extract_strided_slice %29 {offsets = [11, 0], sizes = [1, 32], strides = [1, 1]} : vector<12x32xf32> to vector<1x32xf32>
    %151 = vector.broadcast %150 : vector<1x32xf32> to vector<8x32xf32>
    %152 = arith.addf %149, %151 : vector<8x32xf32>
    %153 = vector.broadcast %9 : vector<8x1xf32> to vector<8x32xf32>
    %154 = arith.mulf %152, %153 : vector<8x32xf32>
    %c1 = arith.constant 1 : index
    %c0_52 = arith.constant 0 : index
    %c0_53 = arith.constant 0 : index
    %155 = vector.load %arg8[%c1, %c0_52, %c0_53] : memref<2x192x32xf32, #tpu.memory_space<vmem>>, vector<1x192x32xf32>
    %156 = vector.shape_cast %155 : vector<1x192x32xf32> to vector<192x32xf32>
    %c1_54 = arith.constant 1 : index
    %c0_55 = arith.constant 0 : index
    %c0_56 = arith.constant 0 : index
    %157 = vector.load %arg9[%c1_54, %c0_55, %c0_56] : memref<2x12x32xf32, #tpu.memory_space<vmem>>, vector<1x12x32xf32>
    %158 = vector.shape_cast %157 : vector<1x12x32xf32> to vector<12x32xf32>
    %159 = vector.extract_strided_slice %156 {offsets = [0, 0], sizes = [32, 32], strides = [1, 1]} : vector<192x32xf32> to vector<32x32xf32>
    %160 = vector.extract_strided_slice %156 {offsets = [32, 0], sizes = [32, 32], strides = [1, 1]} : vector<192x32xf32> to vector<32x32xf32>
    %161 = vector.extract_strided_slice %156 {offsets = [64, 0], sizes = [32, 32], strides = [1, 1]} : vector<192x32xf32> to vector<32x32xf32>
    %162 = vector.extract_strided_slice %156 {offsets = [96, 0], sizes = [32, 32], strides = [1, 1]} : vector<192x32xf32> to vector<32x32xf32>
    %163 = vector.extract_strided_slice %156 {offsets = [128, 0], sizes = [32, 32], strides = [1, 1]} : vector<192x32xf32> to vector<32x32xf32>
    %164 = vector.extract_strided_slice %156 {offsets = [160, 0], sizes = [32, 32], strides = [1, 1]} : vector<192x32xf32> to vector<32x32xf32>
    %cst_57 = arith.constant dense<0.000000e+00> : vector<8x32xf32>
    %165 = tpu.matmul %154, %159, %cst_57 {dimension_numbers = #tpu.dot_dimension_numbers<[1], [0], [0], [1], [0, 0, 1, 1], [], []>} : vector<8x32xf32>, vector<32x32xf32>, vector<8x32xf32> -> vector<8x32xf32>
    %cst_58 = arith.constant dense<0.000000e+00> : vector<56x32xf32>
    %166 = tpu.matmul %0, %165, %cst_58 {dimension_numbers = #tpu.dot_dimension_numbers<[1], [0], [0], [1], [0, 0, 1, 1], [], []>} : vector<56x8xf32>, vector<8x32xf32>, vector<56x32xf32> -> vector<56x32xf32>
    %cst_59 = arith.constant dense<0.000000e+00> : vector<8x32xf32>
    %167 = tpu.matmul %154, %160, %cst_59 {dimension_numbers = #tpu.dot_dimension_numbers<[1], [0], [0], [1], [0, 0, 1, 1], [], []>} : vector<8x32xf32>, vector<32x32xf32>, vector<8x32xf32> -> vector<8x32xf32>
    %cst_60 = arith.constant dense<0.000000e+00> : vector<56x32xf32>
    %168 = tpu.matmul %1, %167, %cst_60 {dimension_numbers = #tpu.dot_dimension_numbers<[1], [0], [0], [1], [0, 0, 1, 1], [], []>} : vector<56x8xf32>, vector<8x32xf32>, vector<56x32xf32> -> vector<56x32xf32>
    %169 = arith.addf %166, %168 : vector<56x32xf32>
    %170 = vector.extract_strided_slice %158 {offsets = [0, 0], sizes = [1, 32], strides = [1, 1]} : vector<12x32xf32> to vector<1x32xf32>
    %171 = vector.broadcast %17 : vector<56x1xf32> to vector<56x32xf32>
    %172 = vector.broadcast %170 : vector<1x32xf32> to vector<56x32xf32>
    %173 = arith.mulf %171, %172 : vector<56x32xf32>
    %174 = arith.addf %169, %173 : vector<56x32xf32>
    %175 = vector.extract_strided_slice %158 {offsets = [1, 0], sizes = [1, 32], strides = [1, 1]} : vector<12x32xf32> to vector<1x32xf32>
    %176 = vector.broadcast %7 : vector<56x1xf32> to vector<56x32xf32>
    %177 = vector.broadcast %175 : vector<1x32xf32> to vector<56x32xf32>
    %178 = arith.mulf %176, %177 : vector<56x32xf32>
    %179 = arith.addf %174, %178 : vector<56x32xf32>
    %180 = vector.extract_strided_slice %158 {offsets = [2, 0], sizes = [1, 32], strides = [1, 1]} : vector<12x32xf32> to vector<1x32xf32>
    %181 = vector.broadcast %180 : vector<1x32xf32> to vector<56x32xf32>
    %182 = arith.addf %179, %181 : vector<56x32xf32>
    %183 = vector.extract_strided_slice %158 {offsets = [3, 0], sizes = [1, 32], strides = [1, 1]} : vector<12x32xf32> to vector<1x32xf32>
    %184 = vector.extract_strided_slice %158 {offsets = [4, 0], sizes = [1, 32], strides = [1, 1]} : vector<12x32xf32> to vector<1x32xf32>
    %cst_61 = arith.constant dense<0.000000e+00> : vector<56xf32>
    %185 = vector.multi_reduction <add>, %182, %cst_61 [1] : vector<56x32xf32> to vector<56xf32>
    %186 = vector.shape_cast %185 : vector<56xf32> to vector<56x1xf32>
    %cst_62 = arith.constant 3.200000e+01 : f32
    %187 = vector.broadcast %cst_62 : f32 to vector<56x1xf32>
    %188 = arith.divf %186, %187 : vector<56x1xf32>
    %189 = vector.broadcast %188 : vector<56x1xf32> to vector<56x32xf32>
    %190 = arith.subf %182, %189 : vector<56x32xf32>
    %191 = arith.mulf %190, %190 : vector<56x32xf32>
    %cst_63 = arith.constant dense<0.000000e+00> : vector<56xf32>
    %192 = vector.multi_reduction <add>, %191, %cst_63 [1] : vector<56x32xf32> to vector<56xf32>
    %193 = vector.shape_cast %192 : vector<56xf32> to vector<56x1xf32>
    %cst_64 = arith.constant 3.200000e+01 : f32
    %194 = vector.broadcast %cst_64 : f32 to vector<56x1xf32>
    %195 = arith.divf %193, %194 : vector<56x1xf32>
    %196 = vector.broadcast %188 : vector<56x1xf32> to vector<56x32xf32>
    %197 = arith.subf %182, %196 : vector<56x32xf32>
    %cst_65 = arith.constant 9.99999974E-6 : f32
    %198 = vector.broadcast %cst_65 : f32 to vector<56x1xf32>
    %199 = arith.addf %195, %198 : vector<56x1xf32>
    %200 = math.rsqrt %199 : vector<56x1xf32>
    %201 = vector.broadcast %200 : vector<56x1xf32> to vector<56x32xf32>
    %202 = arith.mulf %197, %201 : vector<56x32xf32>
    %203 = vector.broadcast %183 : vector<1x32xf32> to vector<56x32xf32>
    %204 = arith.mulf %202, %203 : vector<56x32xf32>
    %205 = vector.broadcast %184 : vector<1x32xf32> to vector<56x32xf32>
    %206 = arith.addf %204, %205 : vector<56x32xf32>
    %207 = arith.negf %206 : vector<56x32xf32>
    %208 = math.exp %207 : vector<56x32xf32>
    %cst_66 = arith.constant 1.000000e+00 : f32
    %209 = vector.broadcast %cst_66 : f32 to vector<56x32xf32>
    %210 = arith.addf %209, %208 : vector<56x32xf32>
    %211 = arith.divf %209, %210 : vector<56x32xf32>
    %212 = arith.mulf %206, %211 : vector<56x32xf32>
    %cst_67 = arith.constant dense<0.000000e+00> : vector<56x32xf32>
    %213 = tpu.matmul %212, %161, %cst_67 {dimension_numbers = #tpu.dot_dimension_numbers<[1], [0], [0], [1], [0, 0, 1, 1], [], []>} : vector<56x32xf32>, vector<32x32xf32>, vector<56x32xf32> -> vector<56x32xf32>
    %214 = vector.extract_strided_slice %158 {offsets = [5, 0], sizes = [1, 32], strides = [1, 1]} : vector<12x32xf32> to vector<1x32xf32>
    %215 = vector.broadcast %214 : vector<1x32xf32> to vector<56x32xf32>
    %216 = arith.addf %213, %215 : vector<56x32xf32>
    %217 = arith.negf %216 : vector<56x32xf32>
    %218 = math.exp %217 : vector<56x32xf32>
    %cst_68 = arith.constant 1.000000e+00 : f32
    %219 = vector.broadcast %cst_68 : f32 to vector<56x32xf32>
    %220 = arith.addf %219, %218 : vector<56x32xf32>
    %221 = arith.divf %219, %220 : vector<56x32xf32>
    %222 = arith.mulf %216, %221 : vector<56x32xf32>
    %223 = vector.extract_strided_slice %158 {offsets = [6, 0], sizes = [1, 32], strides = [1, 1]} : vector<12x32xf32> to vector<1x32xf32>
    %224 = vector.broadcast %223 : vector<1x32xf32> to vector<56x32xf32>
    %225 = arith.mulf %222, %224 : vector<56x32xf32>
    %226 = vector.extract_strided_slice %158 {offsets = [7, 0], sizes = [1, 32], strides = [1, 1]} : vector<12x32xf32> to vector<1x32xf32>
    %227 = vector.broadcast %226 : vector<1x32xf32> to vector<56x32xf32>
    %228 = arith.addf %225, %227 : vector<56x32xf32>
    %cst_69 = arith.constant dense<0.000000e+00> : vector<56xf32>
    %229 = vector.multi_reduction <add>, %228, %cst_69 [1] : vector<56x32xf32> to vector<56xf32>
    %230 = vector.shape_cast %229 : vector<56xf32> to vector<56x1xf32>
    %231 = arith.negf %230 : vector<56x1xf32>
    %232 = math.exp %231 : vector<56x1xf32>
    %cst_70 = arith.constant 1.000000e+00 : f32
    %233 = vector.broadcast %cst_70 : f32 to vector<56x1xf32>
    %234 = arith.addf %233, %232 : vector<56x1xf32>
    %235 = arith.divf %233, %234 : vector<56x1xf32>
    %236 = vector.broadcast %235 : vector<56x1xf32> to vector<56x32xf32>
    %237 = arith.mulf %222, %236 : vector<56x32xf32>
    %238 = vector.broadcast %11 : vector<56x1xf32> to vector<56x32xf32>
    %239 = arith.mulf %237, %238 : vector<56x32xf32>
    %cst_71 = arith.constant dense<0.000000e+00> : vector<8x32xf32>
    %240 = tpu.matmul %0, %239, %cst_71 {dimension_numbers = #tpu.dot_dimension_numbers<[0], [0], [1], [1], [0, 1, 1, 1], [], []>} : vector<56x8xf32>, vector<56x32xf32>, vector<8x32xf32> -> vector<8x32xf32>
    %cst_72 = arith.constant dense<0.000000e+00> : vector<8x32xf32>
    %241 = tpu.matmul %154, %162, %cst_72 {dimension_numbers = #tpu.dot_dimension_numbers<[1], [0], [0], [1], [0, 0, 1, 1], [], []>} : vector<8x32xf32>, vector<32x32xf32>, vector<8x32xf32> -> vector<8x32xf32>
    %cst_73 = arith.constant dense<0.000000e+00> : vector<8x32xf32>
    %242 = tpu.matmul %240, %163, %cst_73 {dimension_numbers = #tpu.dot_dimension_numbers<[1], [0], [0], [1], [0, 0, 1, 1], [], []>} : vector<8x32xf32>, vector<32x32xf32>, vector<8x32xf32> -> vector<8x32xf32>
    %243 = arith.addf %241, %242 : vector<8x32xf32>
    %244 = vector.extract_strided_slice %158 {offsets = [8, 0], sizes = [1, 32], strides = [1, 1]} : vector<12x32xf32> to vector<1x32xf32>
    %245 = vector.broadcast %244 : vector<1x32xf32> to vector<8x32xf32>
    %246 = arith.addf %243, %245 : vector<8x32xf32>
    %247 = vector.extract_strided_slice %158 {offsets = [9, 0], sizes = [1, 32], strides = [1, 1]} : vector<12x32xf32> to vector<1x32xf32>
    %248 = vector.extract_strided_slice %158 {offsets = [10, 0], sizes = [1, 32], strides = [1, 1]} : vector<12x32xf32> to vector<1x32xf32>
    %cst_74 = arith.constant dense<0.000000e+00> : vector<8xf32>
    %249 = vector.multi_reduction <add>, %246, %cst_74 [1] : vector<8x32xf32> to vector<8xf32>
    %250 = vector.shape_cast %249 : vector<8xf32> to vector<8x1xf32>
    %cst_75 = arith.constant 3.200000e+01 : f32
    %251 = vector.broadcast %cst_75 : f32 to vector<8x1xf32>
    %252 = arith.divf %250, %251 : vector<8x1xf32>
    %253 = vector.broadcast %252 : vector<8x1xf32> to vector<8x32xf32>
    %254 = arith.subf %246, %253 : vector<8x32xf32>
    %255 = arith.mulf %254, %254 : vector<8x32xf32>
    %cst_76 = arith.constant dense<0.000000e+00> : vector<8xf32>
    %256 = vector.multi_reduction <add>, %255, %cst_76 [1] : vector<8x32xf32> to vector<8xf32>
    %257 = vector.shape_cast %256 : vector<8xf32> to vector<8x1xf32>
    %cst_77 = arith.constant 3.200000e+01 : f32
    %258 = vector.broadcast %cst_77 : f32 to vector<8x1xf32>
    %259 = arith.divf %257, %258 : vector<8x1xf32>
    %260 = vector.broadcast %252 : vector<8x1xf32> to vector<8x32xf32>
    %261 = arith.subf %246, %260 : vector<8x32xf32>
    %cst_78 = arith.constant 9.99999974E-6 : f32
    %262 = vector.broadcast %cst_78 : f32 to vector<8x1xf32>
    %263 = arith.addf %259, %262 : vector<8x1xf32>
    %264 = math.rsqrt %263 : vector<8x1xf32>
    %265 = vector.broadcast %264 : vector<8x1xf32> to vector<8x32xf32>
    %266 = arith.mulf %261, %265 : vector<8x32xf32>
    %267 = vector.broadcast %247 : vector<1x32xf32> to vector<8x32xf32>
    %268 = arith.mulf %266, %267 : vector<8x32xf32>
    %269 = vector.broadcast %248 : vector<1x32xf32> to vector<8x32xf32>
    %270 = arith.addf %268, %269 : vector<8x32xf32>
    %271 = arith.negf %270 : vector<8x32xf32>
    %272 = math.exp %271 : vector<8x32xf32>
    %cst_79 = arith.constant 1.000000e+00 : f32
    %273 = vector.broadcast %cst_79 : f32 to vector<8x32xf32>
    %274 = arith.addf %273, %272 : vector<8x32xf32>
    %275 = arith.divf %273, %274 : vector<8x32xf32>
    %276 = arith.mulf %270, %275 : vector<8x32xf32>
    %cst_80 = arith.constant dense<0.000000e+00> : vector<8x32xf32>
    %277 = tpu.matmul %276, %164, %cst_80 {dimension_numbers = #tpu.dot_dimension_numbers<[1], [0], [0], [1], [0, 0, 1, 1], [], []>} : vector<8x32xf32>, vector<32x32xf32>, vector<8x32xf32> -> vector<8x32xf32>
    %278 = arith.addf %154, %277 : vector<8x32xf32>
    %279 = vector.extract_strided_slice %158 {offsets = [11, 0], sizes = [1, 32], strides = [1, 1]} : vector<12x32xf32> to vector<1x32xf32>
    %280 = vector.broadcast %279 : vector<1x32xf32> to vector<8x32xf32>
    %281 = arith.addf %278, %280 : vector<8x32xf32>
    %282 = vector.broadcast %9 : vector<8x1xf32> to vector<8x32xf32>
    %283 = arith.mulf %281, %282 : vector<8x32xf32>
    %c0_81 = arith.constant 0 : index
    %c0_82 = arith.constant 0 : index
    %284 = vector.load %arg10[%c0_81, %c0_82] : memref<96x32xf32, #tpu.memory_space<vmem>>, vector<96x32xf32>
    %c0_83 = arith.constant 0 : index
    %c0_84 = arith.constant 0 : index
    %285 = vector.load %arg11[%c0_83, %c0_84] : memref<9x32xf32, #tpu.memory_space<vmem>>, vector<9x32xf32>
    %286 = vector.extract_strided_slice %284 {offsets = [0, 0], sizes = [32, 32], strides = [1, 1]} : vector<96x32xf32> to vector<32x32xf32>
    %287 = vector.extract_strided_slice %284 {offsets = [32, 0], sizes = [32, 32], strides = [1, 1]} : vector<96x32xf32> to vector<32x32xf32>
    %288 = vector.extract_strided_slice %284 {offsets = [64, 0], sizes = [32, 32], strides = [1, 1]} : vector<96x32xf32> to vector<32x32xf32>
    %cst_85 = arith.constant dense<0.000000e+00> : vector<8x32xf32>
    %289 = tpu.matmul %283, %286, %cst_85 {dimension_numbers = #tpu.dot_dimension_numbers<[1], [0], [0], [1], [0, 0, 1, 1], [], []>} : vector<8x32xf32>, vector<32x32xf32>, vector<8x32xf32> -> vector<8x32xf32>
    %cst_86 = arith.constant dense<0.000000e+00> : vector<56x32xf32>
    %290 = tpu.matmul %0, %289, %cst_86 {dimension_numbers = #tpu.dot_dimension_numbers<[1], [0], [0], [1], [0, 0, 1, 1], [], []>} : vector<56x8xf32>, vector<8x32xf32>, vector<56x32xf32> -> vector<56x32xf32>
    %cst_87 = arith.constant dense<0.000000e+00> : vector<8x32xf32>
    %291 = tpu.matmul %283, %287, %cst_87 {dimension_numbers = #tpu.dot_dimension_numbers<[1], [0], [0], [1], [0, 0, 1, 1], [], []>} : vector<8x32xf32>, vector<32x32xf32>, vector<8x32xf32> -> vector<8x32xf32>
    %cst_88 = arith.constant dense<0.000000e+00> : vector<56x32xf32>
    %292 = tpu.matmul %1, %291, %cst_88 {dimension_numbers = #tpu.dot_dimension_numbers<[1], [0], [0], [1], [0, 0, 1, 1], [], []>} : vector<56x8xf32>, vector<8x32xf32>, vector<56x32xf32> -> vector<56x32xf32>
    %293 = arith.addf %290, %292 : vector<56x32xf32>
    %294 = vector.extract_strided_slice %285 {offsets = [0, 0], sizes = [1, 32], strides = [1, 1]} : vector<9x32xf32> to vector<1x32xf32>
    %295 = vector.broadcast %17 : vector<56x1xf32> to vector<56x32xf32>
    %296 = vector.broadcast %294 : vector<1x32xf32> to vector<56x32xf32>
    %297 = arith.mulf %295, %296 : vector<56x32xf32>
    %298 = arith.addf %293, %297 : vector<56x32xf32>
    %299 = vector.extract_strided_slice %285 {offsets = [1, 0], sizes = [1, 32], strides = [1, 1]} : vector<9x32xf32> to vector<1x32xf32>
    %300 = vector.broadcast %7 : vector<56x1xf32> to vector<56x32xf32>
    %301 = vector.broadcast %299 : vector<1x32xf32> to vector<56x32xf32>
    %302 = arith.mulf %300, %301 : vector<56x32xf32>
    %303 = arith.addf %298, %302 : vector<56x32xf32>
    %304 = vector.extract_strided_slice %285 {offsets = [2, 0], sizes = [1, 32], strides = [1, 1]} : vector<9x32xf32> to vector<1x32xf32>
    %305 = vector.broadcast %304 : vector<1x32xf32> to vector<56x32xf32>
    %306 = arith.addf %303, %305 : vector<56x32xf32>
    %307 = vector.extract_strided_slice %285 {offsets = [3, 0], sizes = [1, 32], strides = [1, 1]} : vector<9x32xf32> to vector<1x32xf32>
    %308 = vector.extract_strided_slice %285 {offsets = [4, 0], sizes = [1, 32], strides = [1, 1]} : vector<9x32xf32> to vector<1x32xf32>
    %cst_89 = arith.constant dense<0.000000e+00> : vector<56xf32>
    %309 = vector.multi_reduction <add>, %306, %cst_89 [1] : vector<56x32xf32> to vector<56xf32>
    %310 = vector.shape_cast %309 : vector<56xf32> to vector<56x1xf32>
    %cst_90 = arith.constant 3.200000e+01 : f32
    %311 = vector.broadcast %cst_90 : f32 to vector<56x1xf32>
    %312 = arith.divf %310, %311 : vector<56x1xf32>
    %313 = vector.broadcast %312 : vector<56x1xf32> to vector<56x32xf32>
    %314 = arith.subf %306, %313 : vector<56x32xf32>
    %315 = arith.mulf %314, %314 : vector<56x32xf32>
    %cst_91 = arith.constant dense<0.000000e+00> : vector<56xf32>
    %316 = vector.multi_reduction <add>, %315, %cst_91 [1] : vector<56x32xf32> to vector<56xf32>
    %317 = vector.shape_cast %316 : vector<56xf32> to vector<56x1xf32>
    %cst_92 = arith.constant 3.200000e+01 : f32
    %318 = vector.broadcast %cst_92 : f32 to vector<56x1xf32>
    %319 = arith.divf %317, %318 : vector<56x1xf32>
    %320 = vector.broadcast %312 : vector<56x1xf32> to vector<56x32xf32>
    %321 = arith.subf %306, %320 : vector<56x32xf32>
    %cst_93 = arith.constant 9.99999974E-6 : f32
    %322 = vector.broadcast %cst_93 : f32 to vector<56x1xf32>
    %323 = arith.addf %319, %322 : vector<56x1xf32>
    %324 = math.rsqrt %323 : vector<56x1xf32>
    %325 = vector.broadcast %324 : vector<56x1xf32> to vector<56x32xf32>
    %326 = arith.mulf %321, %325 : vector<56x32xf32>
    %327 = vector.broadcast %307 : vector<1x32xf32> to vector<56x32xf32>
    %328 = arith.mulf %326, %327 : vector<56x32xf32>
    %329 = vector.broadcast %308 : vector<1x32xf32> to vector<56x32xf32>
    %330 = arith.addf %328, %329 : vector<56x32xf32>
    %331 = arith.negf %330 : vector<56x32xf32>
    %332 = math.exp %331 : vector<56x32xf32>
    %cst_94 = arith.constant 1.000000e+00 : f32
    %333 = vector.broadcast %cst_94 : f32 to vector<56x32xf32>
    %334 = arith.addf %333, %332 : vector<56x32xf32>
    %335 = arith.divf %333, %334 : vector<56x32xf32>
    %336 = arith.mulf %330, %335 : vector<56x32xf32>
    %cst_95 = arith.constant dense<0.000000e+00> : vector<56x32xf32>
    %337 = tpu.matmul %336, %288, %cst_95 {dimension_numbers = #tpu.dot_dimension_numbers<[1], [0], [0], [1], [0, 0, 1, 1], [], []>} : vector<56x32xf32>, vector<32x32xf32>, vector<56x32xf32> -> vector<56x32xf32>
    %338 = vector.extract_strided_slice %285 {offsets = [5, 0], sizes = [1, 32], strides = [1, 1]} : vector<9x32xf32> to vector<1x32xf32>
    %339 = vector.broadcast %338 : vector<1x32xf32> to vector<56x32xf32>
    %340 = arith.addf %337, %339 : vector<56x32xf32>
    %341 = vector.extract_strided_slice %285 {offsets = [6, 0], sizes = [1, 32], strides = [1, 1]} : vector<9x32xf32> to vector<1x32xf32>
    %342 = vector.extract_strided_slice %285 {offsets = [7, 0], sizes = [1, 32], strides = [1, 1]} : vector<9x32xf32> to vector<1x32xf32>
    %cst_96 = arith.constant dense<0.000000e+00> : vector<56xf32>
    %343 = vector.multi_reduction <add>, %340, %cst_96 [1] : vector<56x32xf32> to vector<56xf32>
    %344 = vector.shape_cast %343 : vector<56xf32> to vector<56x1xf32>
    %cst_97 = arith.constant 3.200000e+01 : f32
    %345 = vector.broadcast %cst_97 : f32 to vector<56x1xf32>
    %346 = arith.divf %344, %345 : vector<56x1xf32>
    %347 = vector.broadcast %346 : vector<56x1xf32> to vector<56x32xf32>
    %348 = arith.subf %340, %347 : vector<56x32xf32>
    %349 = arith.mulf %348, %348 : vector<56x32xf32>
    %cst_98 = arith.constant dense<0.000000e+00> : vector<56xf32>
    %350 = vector.multi_reduction <add>, %349, %cst_98 [1] : vector<56x32xf32> to vector<56xf32>
    %351 = vector.shape_cast %350 : vector<56xf32> to vector<56x1xf32>
    %cst_99 = arith.constant 3.200000e+01 : f32
    %352 = vector.broadcast %cst_99 : f32 to vector<56x1xf32>
    %353 = arith.divf %351, %352 : vector<56x1xf32>
    %354 = vector.broadcast %346 : vector<56x1xf32> to vector<56x32xf32>
    %355 = arith.subf %340, %354 : vector<56x32xf32>
    %cst_100 = arith.constant 9.99999974E-6 : f32
    %356 = vector.broadcast %cst_100 : f32 to vector<56x1xf32>
    %357 = arith.addf %353, %356 : vector<56x1xf32>
    %358 = math.rsqrt %357 : vector<56x1xf32>
    %359 = vector.broadcast %358 : vector<56x1xf32> to vector<56x32xf32>
    %360 = arith.mulf %355, %359 : vector<56x32xf32>
    %361 = vector.broadcast %341 : vector<1x32xf32> to vector<56x32xf32>
    %362 = arith.mulf %360, %361 : vector<56x32xf32>
    %363 = vector.broadcast %342 : vector<1x32xf32> to vector<56x32xf32>
    %364 = arith.addf %362, %363 : vector<56x32xf32>
    %365 = arith.negf %364 : vector<56x32xf32>
    %366 = math.exp %365 : vector<56x32xf32>
    %cst_101 = arith.constant 1.000000e+00 : f32
    %367 = vector.broadcast %cst_101 : f32 to vector<56x32xf32>
    %368 = arith.addf %367, %366 : vector<56x32xf32>
    %369 = arith.divf %367, %368 : vector<56x32xf32>
    %370 = arith.mulf %364, %369 : vector<56x32xf32>
    %371 = vector.extract_strided_slice %285 {offsets = [8, 0], sizes = [1, 32], strides = [1, 1]} : vector<9x32xf32> to vector<1x32xf32>
    %372 = vector.broadcast %371 : vector<1x32xf32> to vector<56x32xf32>
    %373 = arith.mulf %370, %372 : vector<56x32xf32>
    %cst_102 = arith.constant dense<0.000000e+00> : vector<56xf32>
    %374 = vector.multi_reduction <add>, %373, %cst_102 [1] : vector<56x32xf32> to vector<56xf32>
    %375 = vector.shape_cast %374 : vector<56xf32> to vector<56x1xf32>
    %376 = vector.broadcast %375 : vector<56x1xf32> to vector<56x3xf32>
    %377 = arith.mulf %25, %376 : vector<56x3xf32>
    %378 = vector.broadcast %11 : vector<56x1xf32> to vector<56x3xf32>
    %379 = arith.mulf %377, %378 : vector<56x3xf32>
    %cst_103 = arith.constant dense<0.000000e+00> : vector<8x3xf32>
    %380 = tpu.matmul %0, %379, %cst_103 {dimension_numbers = #tpu.dot_dimension_numbers<[0], [0], [1], [1], [0, 1, 1, 1], [], []>} : vector<56x8xf32>, vector<56x3xf32>, vector<8x3xf32> -> vector<8x3xf32>
    %381 = arith.addf %5, %380 : vector<8x3xf32>
    %382 = vector.broadcast %9 : vector<8x1xf32> to vector<8x3xf32>
    %383 = arith.mulf %381, %382 : vector<8x3xf32>
    %c0_104 = arith.constant 0 : index
    %c0_105 = arith.constant 0 : index
    %c0_106 = arith.constant 0 : index
    %384 = vector.load %arg13[%c0_104, %c0_105, %c0_106] : memref<1x8x3xf32, #tpu.memory_space<vmem>>, vector<1x8x3xf32>
    %385 = vector.shape_cast %384 : vector<1x8x3xf32> to vector<8x3xf32>
    %386 = vector.shape_cast %383 : vector<8x3xf32> to vector<1x8x3xf32>
    tpu.vector_store %arg13[%c0_104, %c0_105, %c0_106], %386 {strides = array<i32>} : memref<1x8x3xf32, #tpu.memory_space<vmem>>, vector<1x8x3xf32>,
    %387 = vector.broadcast %9 : vector<8x1xf32> to vector<8x32xf32>
    %388 = arith.mulf %283, %387 : vector<8x32xf32>
    %c0_107 = arith.constant 0 : index
    %c0_108 = arith.constant 0 : index
    %c0_109 = arith.constant 0 : index
    %389 = vector.load %arg12[%c0_107, %c0_108, %c0_109] : memref<1x8x32xf32, #tpu.memory_space<vmem>>, vector<1x8x32xf32>
    %390 = vector.shape_cast %389 : vector<1x8x32xf32> to vector<8x32xf32>
    %391 = vector.shape_cast %388 : vector<8x32xf32> to vector<1x8x32xf32>
    tpu.vector_store %arg12[%c0_107, %c0_108, %c0_109], %391 {strides = array<i32>} : memref<1x8x32xf32, #tpu.memory_space<vmem>>, vector<1x8x32xf32>,
    return
  }
  func.func @transform_0(%arg0: i32) -> (i32, i32) {
    %c0_i32 = arith.constant 0 : i32
    %c0_i32_0 = arith.constant 0 : i32
    %c0_i32_1 = arith.constant 0 : i32
    return %c0_i32, %c0_i32_0 : i32, i32
  }
  func.func @transform_1(%arg0: i32) -> (i32, i32) {
    %c0_i32 = arith.constant 0 : i32
    %c0_i32_0 = arith.constant 0 : i32
    %c0_i32_1 = arith.constant 0 : i32
    return %c0_i32, %c0_i32_0 : i32, i32
  }
  func.func @transform_2(%arg0: i32) -> (i32, i32, i32) {
    %c0_i32 = arith.constant 0 : i32
    %c0_i32_0 = arith.constant 0 : i32
    %c0_i32_1 = arith.constant 0 : i32
    return %arg0, %c0_i32, %c0_i32_0 : i32, i32, i32
  }
  func.func @transform_3(%arg0: i32) -> (i32, i32, i32) {
    %c0_i32 = arith.constant 0 : i32
    %c0_i32_0 = arith.constant 0 : i32
    %c0_i32_1 = arith.constant 0 : i32
    return %arg0, %c0_i32, %c0_i32_0 : i32, i32, i32
  }
  func.func @transform_4(%arg0: i32) -> (i32, i32, i32) {
    %c0_i32 = arith.constant 0 : i32
    %c0_i32_0 = arith.constant 0 : i32
    %c0_i32_1 = arith.constant 0 : i32
    return %arg0, %c0_i32, %c0_i32_0 : i32, i32, i32
  }
  func.func @transform_5(%arg0: i32) -> (i32, i32, i32) {
    %c0_i32 = arith.constant 0 : i32
    %c0_i32_0 = arith.constant 0 : i32
    %c0_i32_1 = arith.constant 0 : i32
    return %arg0, %c0_i32, %c0_i32_0 : i32, i32, i32
  }
  func.func @transform_6(%arg0: i32) -> (i32, i32, i32) {
    %c0_i32 = arith.constant 0 : i32
    %c0_i32_0 = arith.constant 0 : i32
    %c0_i32_1 = arith.constant 0 : i32
    return %arg0, %c0_i32, %c0_i32_0 : i32, i32, i32
  }
  func.func @transform_7(%arg0: i32) -> (i32, i32, i32) {
    %c0_i32 = arith.constant 0 : i32
    %c0_i32_0 = arith.constant 0 : i32
    %c0_i32_1 = arith.constant 0 : i32
    %c0_i32_2 = arith.constant 0 : i32
    return %c0_i32, %c0_i32_0, %c0_i32_1 : i32, i32, i32
  }
  func.func @transform_8(%arg0: i32) -> (i32, i32, i32) {
    %c0_i32 = arith.constant 0 : i32
    %c0_i32_0 = arith.constant 0 : i32
    %c0_i32_1 = arith.constant 0 : i32
    %c0_i32_2 = arith.constant 0 : i32
    return %c0_i32, %c0_i32_0, %c0_i32_1 : i32, i32, i32
  }
  func.func @transform_9(%arg0: i32) -> (i32, i32) {
    %c0_i32 = arith.constant 0 : i32
    %c0_i32_0 = arith.constant 0 : i32
    %c0_i32_1 = arith.constant 0 : i32
    return %c0_i32, %c0_i32_0 : i32, i32
  }
  func.func @transform_10(%arg0: i32) -> (i32, i32) {
    %c0_i32 = arith.constant 0 : i32
    %c0_i32_0 = arith.constant 0 : i32
    %c0_i32_1 = arith.constant 0 : i32
    return %c0_i32, %c0_i32_0 : i32, i32
  }
  func.func @transform_11(%arg0: i32) -> (i32, i32, i32) {
    %c0_i32 = arith.constant 0 : i32
    %c0_i32_0 = arith.constant 0 : i32
    %c0_i32_1 = arith.constant 0 : i32
    return %arg0, %c0_i32, %c0_i32_0 : i32, i32, i32
  }
  func.func @transform_12(%arg0: i32) -> (i32, i32, i32) {
    %c0_i32 = arith.constant 0 : i32
    %c0_i32_0 = arith.constant 0 : i32
    %c0_i32_1 = arith.constant 0 : i32
    return %arg0, %c0_i32, %c0_i32_0 : i32, i32, i32
  }
}

</mosaic_0001>

<bundles_post_ra>
// kernel: equivariant_block_forward.1
= control target key start
LH: loop header
LB: loop body
LE: loop exit
PB: predicated region body
PF: predicated region fallthrough
CT: control target
= control target key end

     0   :  { %s6735_s0 = inlined_call_operand.vmem [shape: f32[56,8], index: 0, kind: input, shape index: {}]   ;;  %s6736_s1 = inlined_call_operand.vmem [shape: f32[56,8], index: 1, kind: input, shape index: {}]   ;;  %s6737_s2 = inlined_call_operand.vmem [shape: f32[4,8,32], index: 2, kind: input, shape index: {}]   ;;  %s6738_s3 = inlined_call_operand.vmem [shape: f32[4,8,3], index: 3, kind: input, shape index: {}]   ;;  %s6739_s4 = inlined_call_operand.vmem [shape: f32[4,56,1], index: 4, kind: input, shape index: {}]   ;;  %s6740_s5 = inlined_call_operand.vmem [shape: f32[4,8,1], index: 5, kind: input, shape index: {}]   ;;  %s6741_s6 = inlined_call_operand.vmem [shape: f32[4,56,1], index: 6, kind: input, shape index: {}]   ;;  %s6742_s7 = inlined_call_operand.vmem [shape: f32[2,192,32], index: 7, kind: input, shape index: {}]   ;;  %s6743_s8 = inlined_call_operand.vmem [shape: f32[2,12,32], index: 8, kind: input, shape index: {}]   ;;  %s6744_s9 = inlined_call_operand.vmem [shape: f32[96,32], index: 9, kind: input, shape index: {}]   ;;  %s6745_s10 = inlined_call_operand.vmem [shape: f32[9,32], index: 10, kind: input, shape index: {}]   ;;  %s6746_s11 = inlined_call_operand.hbm [shape: f32[4,8,32], index: 11, kind: output, shape index: {0}]   ;;  %s6747_s12 = inlined_call_operand.vmem [shape: f32[4,8,3], index: 12, kind: output, shape index: {1}]  }
   0x1   :  { %6769 = sst [smem:[#allocation20_spill]] %s6735_s0 }
   0x2   :  { %6770 = sst [smem:[#allocation21_spill]] %s6736_s1 }
   0x3   :  { %6771 = sst [smem:[#allocation22_spill]] %s6738_s3 }
   0x4   :  { %18 = vsyncpa [#allocation3], 0 }
   0x5   :  { %20 = vsyncpa [#allocation3 + $0x1], 0  ;;  %s4738_s21 = smov 0   ;;  %s4740_s22 = smov 0  }
   0x6   :  { %s4742_s23 = smov 0   ;;  %s4744_s24 = smov 0  }
   0x7 LB: > { %6772 = sst [smem:[#allocation5_spill]] %s4665_s23  ;;  %s4759_s25 = sadd.s32 4294967295, %s4669_s24   ;;  %s4669_s24 = sphi %s4744_s24, %s6858_s24   ;;  %s4665_s23 = sphi %s4742_s23, %s6860_s23   ;;  %s4661_s22 = sphi %s4740_s22, %s6862_s22   ;;  %s4657_s21 = sphi %s4738_s21, %s6861_s21  }
   0x8   : > { %s4016_s26 = sadd.s32 4294967294, %s4669_s24   ;;  %s4763_s27 = sadd.s32 1, %s4669_s24  }
   0x9   : > { %6773 = sst [smem:[#allocation6_spill]] %s4763_s27  ;;  %s289_s28 = sadd.s32 1, %s4665_s23 }
   0xa   : > { %s286_s29 = ssub.s32 %s4669_s24, %s4763_s27  ;;  %p299_p0 = scmp.ne.s32.totalorder %s4665_s23, %s4661_s22 }
   0xb   : > { %p287_p1 = scmp.eq.s32.totalorder %s286_s29, 0  ;;  %p300_p2 = scmp.eq.s32.totalorder %s4759_s25, 3 }
   0xc   : > { %p305_p3 = scmp.ne.s32.totalorder %s4661_s22, %s4657_s21  ;;  %p306_p4 = scmp.eq.s32.totalorder %s4016_s26, 3 }
   0xd   : > { %s4774_s30 = scalar_select %p287_p1, %s4665_s23, %s289_s28  }
   0xe   : > { %p4776_p5 = por %p300_p2, %p299_p0  ;;  %p4780_p6 = por %p306_p4, %p305_p3 }
   0xf   : > { %6774 = sst [smem:[#allocation7_spill]] %s4774_s30  ;;  %p4019_p7 = scmp.ge.s32.totalorder %s4669_s24, 1 }
  0x10   : > { %s6776_s14 = scalar_select %p4780_p6, 1, 0 }
  0x11   : > { %p405_p8 = scmp.lt.s32.totalorder %s4669_s24, 5 }
  0x12   : > { %6777 = sst [smem:[#allocation8_spill]] %s6776_s14 }
  0x13   : > { %p406_p9 = pnand %p4019_p7, %p405_p8 }
  0x15   : > { %409 = sbr.rel (%p406_p9) target bundleno = 4836 (0x12e4), region = 64 }
  0x1a   : > { %p468_p10 = scmp.lt.s32.totalorder %s4759_s25, 3  ;;  %s6778_s3 = sld [smem:[#allocation22_spill]]  ;;  %vm6768_vm0 = vcmask 64512   ;;  %v795_v9 = vld [vmem:[%s6742_s7 + $0x18] sm:$0xff]  ;;  %v794_v10 = vld [vmem:[%s6742_s7 + $0x10] sm:$0xff]  ;;  %v793_v11 = vld [vmem:[%s6742_s7 + $0x8] sm:$0xff] }
  0x1b   : > { %s6779_s0 = sld [smem:[#allocation20_spill]]  ;;  %v792_v12 = vld [vmem:[%s6742_s7] sm:$0xff]  ;;  %v799_v15 = vld [vmem:[%s6742_s7 + $0x38] sm:$0xff]  ;;  %v798_v16 = vld [vmem:[%s6742_s7 + $0x30] sm:$0xff]  ;;  %v4671_v23 = vmov 0   ;;  %vm818_vm1 = vcmask 261120  }
  0x1c   : > { %s4788_s15 = scalar_select %p468_p10, %s4759_s25, 3  ;;  %v797_v17 = vld [vmem:[%s6742_s7 + $0x28] sm:$0xff]  ;;  %v796_v18 = vld [vmem:[%s6742_s7 + $0x20] sm:$0xff]  ;;  %4251 = vset.pattern.permute.xlu0 %v4671_v23  ;;  %4252 = vset.pattern.permute.xlu1 %v4671_v23  ;;  %vm6767_vm2 = vcmask 23552  }
  0x1d   : > { %s6780_s1 = sld [smem:[#allocation21_spill]]  ;;  %4253 = vset.pattern.permute.xlu2 %v4671_v23  ;;  %s459_s29 = sand.u32 1, %s4661_s22  }
  0x1e   : > { %s4791_s16 = sshll.u32 %s4788_s15, 3  ;;  %s4208_s18 = smul.u32 56, %s4788_s15 }
  0x1f   : > { %s4937_s17 = scalar_lea.vmem %s6737_s2, %s4791_s16  ;;  %s4204_s15 = sshll.u32 %s4759_s25, 3 }
  0x20   : > { %s4797_s19 = scalar_lea.vmem %s6778_s3, %s4791_s16  ;;  %s4910_s20 = scalar_lea.vmem %s6739_s4, %s4208_s18  ;;  %v508_v27 = vld [vmem:[%s4937_s17] sm:$0xff] }
  0x21   : > { %v4802_v0 = vld [vmem:[%s6779_s0 + $0x30] sm:$0xff]  ;;  %v4807_v1 = vld [vmem:[%s6779_s0] sm:$0xff]  ;;  %v4822_v4 = vld [vmem:[%s6779_s0 + $0x8] sm:$0xff]  ;;  %s5111_s26 = scalar_lea.vmem %s6741_s6, %s4208_s18  ;;  %s3877_s3 = scalar_lea.hbm %s6746_s11, %s4204_s15 }
  0x22   : > { %v509_v2 = vld [vmem:[%s4797_s19] sm:$0xff]  ;;  %v4836_v6 = vld [vmem:[%s6779_s0 + $0x10] sm:$0xff]  ;;  %v4850_v8 = vld [vmem:[%s6779_s0 + $0x18] sm:$0xff]  ;;  %s3881_s23 = sshll.u32 %s3877_s3, 4  ;;  %s3863_s27 = scalar_lea.sflag [#allocation3], %s459_s29  ;;  %s3882_s23 = int_to_ptr.hbm [resolvable:$true] %s3881_s23 }
  0x23   : > { %4207 = vmatpush.msra.mxu1 %v509_v2  ;;  %562 = vmatpush.msra.mxu0 %v509_v2  ;;  %v4817_v3 = vld [vmem:[%s6780_s1] sm:$0xff]  ;;  %v4831_v5 = vld [vmem:[%s6780_s1 + $0x8] sm:$0xff]  ;;  %v4845_v7 = vld [vmem:[%s6780_s1 + $0x10] sm:$0xff] }
  0x24   : > { %4033 = vmatmul.msk.f32.vlgmr.msra.gmra.mxu1 %vm6768_vm0, %v4802_v0  ;;  %4027 = vmatmul.msk.f32.vlgmr.msra.gmra.mxu0 %vm6768_vm0, %v4807_v1  ;;  %v4871_v13 = vld [vmem:[%s6780_s1 + $0x18] sm:$0xff]  ;;  %v4876_v14 = vld [vmem:[%s6779_s0 + $0x20] sm:$0xff]  ;;  %v4903_v20 = vld [vmem:[%s6779_s0 + $0x28] sm:$0xff] }
  0x25   : > { %621 = vmatpush.msrb.mxu1 %v509_v2  ;;  %v4898_v19 = vld [vmem:[%s6780_s1 + $0x20] sm:$0xff]  ;;  %v511_v22 = vld [vmem:[%s4910_s20 + $0x8] sm:$0xff]  ;;  %v512_v24 = vld [vmem:[%s4910_s20 + $0x10] sm:$0xff] }
  0x26   : > { %v510_v21 = vld [vmem:[%s4910_s20] sm:$0xff]  ;;  %960 = vperm.xlu1 %4252, %v511_v22   ;;  %965 = vperm.xlu2 %4253, %v512_v24   ;;  %v4922_v25 = vld [vmem:[%s6780_s1 + $0x28] sm:$0xff]  ;;  %v4929_v26 = vld [vmem:[%s6780_s1 + $0x30] sm:$0xff] }
  0x27   : > { %834 = vmatpush.msra.mxu1 %v795_v9  ;;  %955 = vperm.xlu0 %4251, %v510_v21   ;;  %v514_v45 = vld [vmem:[%s4910_s20 + $0x20] sm:$0xff]  ;;  %v513_v51 = vld [vmem:[%s4910_s20 + $0x18] sm:$0xff]  ;;  %v515_v55 = vld [vmem:[%s4910_s20 + $0x28] sm:$0xff] }
  0x28   : > { %v516_v59 = vld [vmem:[%s4910_s20 + $0x30] sm:$0xff]  ;;  %s484_s20 = scalar_lea.vmem %s6740_s5, %s4791_s16 }
  0x29   : > { %835 = vmatpush.msra.mxu1 %v794_v10 }
  0x2b   : > { %836 = vmatpush.msra.mxu1 %v793_v11 }
  0x2c   : > { %4034 = vmatmul.msk.f32.vlgmr.msrb.gmra.mxu1 %vm6768_vm0, %v4817_v3  ;;  %4028 = vmatmul.msk.f32.gmra.mxu0 %vm6768_vm0, %v4822_v4 }
  0x2d   : > { %837 = vmatpush.msra.mxu1 %v792_v12 }
  0x2f   : > { %854 = vmatpush.msrb.mxu1 %v799_v15 }
  0x31   : > { %855 = vmatpush.msrb.mxu1 %v798_v16 }
  0x33   : > { %856 = vmatpush.msrb.mxu1 %v797_v17 }
  0x34   : > { %4035 = vmatmul.msk.f32.gmra.mxu1 %vm6768_vm0, %v4831_v5  ;;  %4029 = vmatmul.msk.f32.gmra.mxu0 %vm6768_vm0, %v4836_v6 }
  0x35   : > { %857 = vmatpush.msrb.mxu1 %v796_v18 }
  0x3c   : > { %4036 = vmatmul.msk.f32.gmra.mxu1 %vm6768_vm0, %v4845_v7  ;;  %4030 = vmatmul.msk.f32.gmra.mxu0 %vm6768_vm0, %v4850_v8 }
  0x44   : > { %4037 = vmatmul.msk.f32.gmra.mxu1 %vm6768_vm0, %v4871_v13  ;;  %4031 = vmatmul.msk.f32.gmra.mxu0 %vm6768_vm0, %v4876_v14 }
  0x4c   : > { %4038 = vmatmul.msk.f32.gmra.mxu1 %vm6768_vm0, %v4898_v19  ;;  %4032 = vmatmul.msk.f32.gmra.mxu0 %vm6768_vm0, %v4903_v20 }
  0x54   : > { %4039 = vmatmul.msk.f32.gmra.mxu1 %vm6768_vm0, %v4922_v25 }
  0x5c   : > { %4040 = vmatmul.msk.f32.gmra.mxu1 %vm6768_vm0, %v4929_v26 }
  0x64   : > { %4041 = vmatmul.msk.f32.vlgmr.msra.gmra.mxu1 %vm818_vm1, %v508_v27 }
  0x6c   : > { %4042 = vmatmul.msk.f32.vlgmr.msrb.gmra.mxu1 %vm818_vm1, %v508_v27 }
  0x80   : > { %v5028_v16 = vpop.permute.xlu2 %965 }
  0x98   : > { %v5019_v10 = vpop.permute.xlu1 %960 }
  0xa1   : > { %v582_v28 = vpop.f32.mrf.mxu1  ;;  %v564_v29 = vpop.f32.mrf.mxu0 }
  0xa9   : > { %v623_v30 = vpop.f32.mrf.mxu1  ;;  %v567_v32 = vpop.f32.mrf.mxu0 }
  0xaa   : > { %v4942_v31 = vsub.f32 %v564_v29, %v623_v30 }
  0xac   : > { %6781 = vst [vmem:[#allocation9_spill] sm:$0xff] %v4942_v31  ;;  %v651_v33 = vmul.f32 %v4942_v31, %v4942_v31 }
  0xae   : > { %v659_v34 = vsel %vm6767_vm2, %v651_v33, 0.0 }
  0xaf   : > { %660 = vadd.xlane.f32.xlu0 %v659_v34 }
  0xb1   : > { %v626_v35 = vpop.f32.mrf.mxu1  ;;  %v570_v38 = vpop.f32.mrf.mxu0 }
  0xb2   : > { %v4947_v36 = vsub.f32 %v567_v32, %v626_v35 }
  0xb4   : > { %6782 = vst [vmem:[#allocation10_spill] sm:$0xff] %v4947_v36  ;;  %v652_v37 = vmul.f32 %v4947_v36, %v4947_v36 }
  0xb6   : > { %v662_v39 = vsel %vm6767_vm2, %v652_v37, 0.0 }
  0xb7   : > { %663 = vadd.xlane.f32.xlu1 %v662_v39 }
  0xb9   : > { %v629_v40 = vpop.f32.mrf.mxu1  ;;  %v573_v44 = vpop.f32.mrf.mxu0 }
  0xba   : > { %v4952_v41 = vsub.f32 %v570_v38, %v629_v40 }
  0xbc   : > { %6783 = vst [vmem:[#allocation11_spill] sm:$0xff] %v4952_v41  ;;  %v653_v42 = vmul.f32 %v4952_v41, %v4952_v41 }
  0xbe   : > { %v665_v43 = vsel %vm6767_vm2, %v653_v42, 0.0 }
  0xbf   : > { %666 = vadd.xlane.f32.xlu2 %v665_v43 }
  0xc1   : > { %v632_v46 = vpop.f32.mrf.mxu1  ;;  %v576_v53 = vpop.f32.mrf.mxu0 }
  0xc2   : > { %v4958_v47 = vsub.f32 %v573_v44, %v632_v46 }
  0xc3   : > { %975 = vperm.xlu0 %4251, %v514_v45  }
  0xc4   : > { %6784 = vst [vmem:[#allocation12_spill] sm:$0xff] %v4958_v47  ;;  %v654_v48 = vmul.f32 %v4958_v47, %v4958_v47 }
  0xc6   : > { %v668_v49 = vsel %vm6767_vm2, %v654_v48, 0.0 }
  0xc7   : > { %669 = vadd.xlane.f32.xlu2 %v668_v49 }
  0xc9   : > { %v635_v50 = vpop.f32.mrf.mxu1  ;;  %v579_v56 = vpop.f32.mrf.mxu0 }
  0xca   : > { %v4977_v63 = vsub.f32 %v576_v53, %v635_v50 }
  0xcc   : > { %6786 = vst [vmem:[#allocation14_spill] sm:$0xff] %v4977_v63 }
  0xd0   : > { %970 = vperm.xlu1 %4252, %v513_v51  }
  0xd1   : > { %v638_v52 = vpop.f32.mrf.mxu1 }
  0xd2   : > { %v4967_v58 = vsub.f32 %v579_v56, %v638_v52 }
  0xd4   : > { %6785 = vst [vmem:[#allocation13_spill] sm:$0xff] %v4967_v58  ;;  %v656_v60 = vmul.f32 %v4967_v58, %v4967_v58 }
  0xd6   : > { %v674_v62 = vsel %vm6767_vm2, %v656_v60, 0.0 }
  0xd9   : > { %v641_v54 = vpop.f32.mrf.mxu1 }
  0xda   : > { %v4985_v2 = vsub.f32 %v582_v28, %v641_v54 }
  0xdc   : > { %6787 = vst [vmem:[#allocation15_spill] sm:$0xff] %v4985_v2 }
  0xdf   : > { %980 = vperm.xlu2 %4253, %v515_v55  }
  0xe1   : > { %v839_v57 = vpop.f32.mrf.mxu1 }
  0xe2   : > { %915 = vmatpush.msra.mxu3 %v839_v57 }
  0xe3   : > { %4050 = vmatmul.msk.f32.vlgmr.msra.gmra.mxu3 %vm6768_vm0, %v4807_v1  ;;  %v655_v1 = vmul.f32 %v4977_v63, %v4977_v63 }
  0xe7   : > { %985 = vperm.xlu2 %4253, %v516_v59  }
  0xe9   : > { %v859_v61 = vpop.f32.mrf.mxu1 }
  0xea   : > { %877 = vmatpush.msra.mxu2 %v859_v61 }
  0xeb   : > { %4043 = vmatmul.msk.f32.vlgmr.msra.gmra.mxu2 %vm6768_vm0, %v4817_v3  ;;  %4051 = vmatmul.msk.f32.gmra.mxu3 %vm6768_vm0, %v4822_v4  ;;  %v671_v3 = vsel %vm6767_vm2, %v655_v1, 0.0  ;;  %v657_v4 = vmul.f32 %v4985_v2, %v4985_v2 }
  0xed   : > { %675 = vadd.xlane.f32.xlu0 %v674_v62 }
  0xf3   : > { %4044 = vmatmul.msk.f32.gmra.mxu2 %vm6768_vm0, %v4831_v5  ;;  %4052 = vmatmul.msk.f32.gmra.mxu3 %vm6768_vm0, %v4836_v6  ;;  %v677_v5 = vsel %vm6767_vm2, %v657_v4, 0.0  ;;  %v5009_v6 = vpop.permute.xlu0 %955 }
  0xfa   : > { %672 = vadd.xlane.f32.xlu1 %v671_v3 }
  0xfb   : > { %4045 = vmatmul.msk.f32.gmra.mxu2 %vm6768_vm0, %v4845_v7  ;;  %4053 = vmatmul.msk.f32.gmra.mxu3 %vm6768_vm0, %v4850_v8  ;;  %v5014_v8 = vld [vmem:[%s6743_s8] sm:$0xff] }
  0xfc   : > { %v5017_v9 = vperm.slane %v5014_v8, 0 }
 0x102   : > { %678 = vadd.xlane.f32.xlu1 %v677_v5 }
 0x103   : > { %4046 = vmatmul.msk.f32.gmra.mxu2 %vm6768_vm0, %v4871_v13  ;;  %4054 = vmatmul.msk.f32.gmra.mxu3 %vm6768_vm0, %v4876_v14  ;;  %v5024_v13 = vperm.slane %v5014_v8, 1 }
 0x105   : > { %v989_v17 = vmul.f32 %v5024_v13, %v5009_v6  ;;  %v990_v28 = vmul.f32 %v5024_v13, %v5019_v10  ;;  %v991_v40 = vmul.f32 %v5024_v13, %v5028_v16 }
 0x10b   : > { %4047 = vmatmul.msk.f32.gmra.mxu2 %vm6768_vm0, %v4898_v19  ;;  %4055 = vmatmul.msk.f32.gmra.mxu3 %vm6768_vm0, %v4903_v20  ;;  %v5033_v19 = vperm.slane %v5014_v8, 2 }
 0x113   : > { %4048 = vmatmul.msk.f32.gmra.mxu2 %vm6768_vm0, %v4922_v25  ;;  %4056 = vmatmul.msk.f32.gmra.mxu3 %vm6768_vm0, %v4802_v0 }
 0x11b   : > { %4049 = vmatmul.msk.f32.gmra.mxu2 %vm6768_vm0, %v4929_v26 }
 0x122   : > { %v5021_v11 = vpop.xlane.xlu0 %660 }
 0x123   : > { %v939_v15 = vmul.f32 %v5017_v9, %v5021_v11 }
 0x12a   : > { %v5035_v21 = vpop.xlane.xlu1 %663 }
 0x12b   : > { %v940_v26 = vmul.f32 %v5017_v9, %v5035_v21 }
 0x132   : > { %v5046_v30 = vpop.xlane.xlu2 %666 }
 0x133   : > { %v941_v38 = vmul.f32 %v5017_v9, %v5046_v30 }
 0x135   : > { %v5070_v56 = vpop.permute.xlu0 %975 }
 0x136   : > { %v993_v3 = vmul.f32 %v5024_v13, %v5070_v56 }
 0x13a   : > { %v5057_v44 = vpop.xlane.xlu2 %669 }
 0x13b   : > { %v942_v50 = vmul.f32 %v5017_v9, %v5057_v44 }
 0x142   : > { %v5059_v45 = vpop.permute.xlu1 %970 }
 0x143   : > { %v992_v53 = vmul.f32 %v5024_v13, %v5059_v45 }
 0x166   : > { %v917_v7 = vpop.f32.mrf.mxu3 }
 0x16d   : > { %v5072_v57 = vpop.xlane.xlu1 %672 }
 0x16e   : > { %v879_v12 = vpop.f32.mrf.mxu2  ;;  %v920_v0 = vpop.f32.mrf.mxu3  ;;  %v943_v62 = vmul.f32 %v5017_v9, %v5072_v57 }
 0x16f   : > { %v918_v14 = vadd.f32 %v917_v7, %v879_v12  ;;  %v5083_v12 = vpop.permute.xlu2 %980 }
 0x170   : > { %6788 = vst [vmem:[#allocation16_spill] sm:$0xff] %v5083_v12 }
 0x171   : > { %v946_v18 = vadd.f32 %v939_v15, %v918_v14 }
 0x173   : > { %v996_v20 = vadd.f32 %v989_v17, %v946_v18 }
 0x175   : > { %v5038_v22 = vadd.f32 %v5033_v19, %v996_v20 }
 0x176   : > { %v882_v23 = vpop.f32.mrf.mxu2  ;;  %v923_v24 = vpop.f32.mrf.mxu3 }
 0x177   : > { %v921_v25 = vadd.f32 %v920_v0, %v882_v23  ;;  %v1011_v27 = vsel %vm818_vm1, %v5038_v22, 0.0  ;;  %v5085_v0 = vpop.xlane.xlu0 %675  ;;  %v994_v23 = vmul.f32 %v5024_v13, %v5083_v12 }
 0x178   : > { %1012 = vadd.xlane.f32.xlu1 %v1011_v27  ;;  %6789 = vst [vmem:[#allocation17_spill] sm:$0xff] %v5085_v0  ;;  %v944_v18 = vmul.f32 %v5017_v9, %v5085_v0 }
 0x179   : > { %v947_v29 = vadd.f32 %v940_v26, %v921_v25  ;;  %v5096_v26 = vpop.xlane.xlu1 %678 }
 0x17a   : > { %6790 = vst [vmem:[#allocation18_spill] sm:$0xff] %v5096_v26 }
 0x17b   : > { %v997_v32 = vadd.f32 %v990_v28, %v947_v29  ;;  %v5099_v29 = vpop.permute.xlu2 %985 }
 0x17c   : > { %6791 = vst [vmem:[#allocation19_spill] sm:$0xff] %v5099_v29 }
 0x17d   : > { %v5049_v33 = vadd.f32 %v5033_v19, %v997_v32 }
 0x17e   : > { %v885_v34 = vpop.f32.mrf.mxu2  ;;  %v926_v35 = vpop.f32.mrf.mxu3 }
 0x17f   : > { %v924_v37 = vadd.f32 %v923_v24, %v885_v34  ;;  %v1014_v39 = vsel %vm818_vm1, %v5049_v33, 0.0 }
 0x180   : > { %1015 = vadd.xlane.f32.xlu0 %v1014_v39 }
 0x181   : > { %v948_v42 = vadd.f32 %v941_v38, %v924_v37  ;;  %v995_v38 = vmul.f32 %v5024_v13, %v5099_v29  ;;  %v4672_v13 = vmov 32.0  }
 0x182   : > { %4255 = vrcp.f32 %v4672_v13 }
 0x183   : > { %v998_v43 = vadd.f32 %v991_v40, %v948_v42  ;;  %v524_v42 = vld [vmem:[%s5111_s26 + $0x30] sm:$0xff] }
 0x185   : > { %v5062_v46 = vadd.f32 %v5033_v19, %v998_v43 }
 0x186   : > { %v888_v48 = vpop.f32.mrf.mxu2  ;;  %v929_v52 = vpop.f32.mrf.mxu3 }
 0x187   : > { %v927_v49 = vadd.f32 %v926_v35, %v888_v48  ;;  %v1017_v51 = vsel %vm818_vm1, %v5062_v46, 0.0  ;;  %v945_v35 = vmul.f32 %v5017_v9, %v5096_v26  ;;  %v521_v48 = vld [vmem:[%s5111_s26 + $0x18] sm:$0xff] }
 0x188   : > { %1018 = vadd.xlane.f32.xlu1 %v1017_v51 }
 0x189   : > { %v949_v54 = vadd.f32 %v942_v50, %v927_v49  ;;  %v4256_v49 = vpop.eup %4255 }
 0x18a   : > { %v1033_v50 = vmul.f32 32.0, %v4256_v49  ;;  %vm1037_vm3 = vweird.f32 %v4256_v49 }
 0x18b   : > { %v999_v55 = vadd.f32 %v992_v53, %v949_v54 }
 0x18c   : > { %v1034_v51 = vsub.f32 1.0, %v1033_v50  ;;  %v522_v50 = vld [vmem:[%s5111_s26 + $0x20] sm:$0xff] }
 0x18d   : > { %v5075_v59 = vadd.f32 %v5033_v19, %v999_v55 }
 0x18e   : > { %v891_v60 = vpop.f32.mrf.mxu2  ;;  %v932_v5 = vpop.f32.mrf.mxu3 }
 0x18f   : > { %v930_v61 = vadd.f32 %v929_v52, %v891_v60  ;;  %v1020_v1 = vsel %vm818_vm1, %v5075_v59, 0.0  ;;  %v1035_v52 = vmul.f32 %v4256_v49, %v1034_v51  ;;  %v520_v51 = vld [vmem:[%s5111_s26 + $0x10] sm:$0xff] }
 0x190   : > { %1021 = vadd.xlane.f32.xlu2 %v1020_v1 }
 0x191   : > { %v950_v4 = vadd.f32 %v943_v62, %v930_v61  ;;  %v1036_v53 = vadd.f32 %v4256_v49, %v1035_v52 }
 0x193   : > { %v1000_v7 = vadd.f32 %v993_v3, %v950_v4  ;;  %v5117_v54 = vsel %vm1037_vm3, %v4256_v49, %v1036_v53 }
 0x195   : > { %v5088_v14 = vadd.f32 %v5033_v19, %v1000_v7 }
 0x196   : > { %v894_v15 = vpop.f32.mrf.mxu2  ;;  %v935_v27 = vpop.f32.mrf.mxu3 }
 0x197   : > { %v933_v17 = vadd.f32 %v932_v5, %v894_v15  ;;  %v1023_v20 = vsel %vm818_vm1, %v5088_v14, 0.0 }
 0x198   : > { %1024 = vadd.xlane.f32.xlu0 %v1023_v20 }
 0x199   : > { %v951_v24 = vadd.f32 %v944_v18, %v933_v17 }
 0x19b   : > { %v1001_v25 = vadd.f32 %v994_v23, %v951_v24 }
 0x19d   : > { %v1009_v28 = vadd.f32 %v5033_v19, %v1001_v25 }
 0x19e   : > { %v897_v32 = vpop.f32.mrf.mxu2 }
 0x19f   : > { %v936_v34 = vadd.f32 %v935_v27, %v897_v32  ;;  %v1026_v37 = vsel %vm818_vm1, %v1009_v28, 0.0 }
 0x1a0   : > { %1027 = vadd.xlane.f32.xlu1 %v1026_v37 }
 0x1a1   : > { %v952_v39 = vadd.f32 %v945_v35, %v936_v34 }
 0x1a3   : > { %v1002_v40 = vadd.f32 %v995_v38, %v952_v39 }
 0x1a5   : > { %v1010_v43 = vadd.f32 %v5033_v19, %v1002_v40 }
 0x1a7   : > { %v1029_v9 = vsel %vm818_vm1, %v1010_v43, 0.0 }
 0x1a8   : > { %1737 = vperm.xlu2 %4253, %v524_v42   ;;  %1030 = vadd.xlane.f32.xlu1 %v1029_v9 }
 0x1b0   : > { %1722 = vperm.xlu2 %4253, %v521_v48  }
 0x1eb   : > { %v1013_v55 = vpop.xlane.xlu1 %1012 }
 0x1ec   : > { %v1039_v60 = vmul.f32 %v5117_v54, %v1013_v55 }
 0x1ee   : > { %v5121_v19 = vsub.f32 %v5038_v22, %v1039_v60 }
 0x1f0   : > { %v1053_v61 = vmul.f32 %v5121_v19, %v5121_v19 }
 0x1f2   : > { %v1060_v62 = vsel %vm818_vm1, %v1053_v61, 0.0 }
 0x1f3   : > { %v1016_v1 = vpop.xlane.xlu0 %1015  ;;  %1061 = vadd.xlane.f32.xlu0 %v1060_v62 }
 0x1f4   : > { %v1040_v3 = vmul.f32 %v5117_v54, %v1016_v1 }
 0x1f6   : > { %v5128_v4 = vsub.f32 %v5049_v33, %v1040_v3 }
 0x1f8   : > { %v1054_v5 = vmul.f32 %v5128_v4, %v5128_v4 }
 0x1fa   : > { %v1063_v7 = vsel %vm818_vm1, %v1054_v5, 0.0 }
 0x1fb   : > { %v1019_v15 = vpop.xlane.xlu1 %1018  ;;  %1064 = vadd.xlane.f32.xlu0 %v1063_v7 }
 0x1fc   : > { %v1041_v22 = vmul.f32 %v5117_v54, %v1019_v15 }
 0x1fe   : > { %v5135_v17 = vsub.f32 %v5062_v46, %v1041_v22 }
 0x200   : > { %v1055_v18 = vmul.f32 %v5135_v17, %v5135_v17 }
 0x202   : > { %v1066_v20 = vsel %vm818_vm1, %v1055_v18, 0.0 }
 0x203   : > { %v1022_v23 = vpop.xlane.xlu2 %1021  ;;  %1067 = vadd.xlane.f32.xlu1 %v1066_v20 }
 0x204   : > { %v1042_v33 = vmul.f32 %v5117_v54, %v1022_v23 }
 0x206   : > { %v5142_v24 = vsub.f32 %v5075_v59, %v1042_v33 }
 0x208   : > { %v1056_v25 = vmul.f32 %v5142_v24, %v5142_v24 }
 0x20a   : > { %v1069_v27 = vsel %vm818_vm1, %v1056_v25, 0.0  ;;  %v803_v25 = vld [vmem:[%s6742_s7 + $0x58] sm:$0xff] }
 0x20b   : > { %1070 = vadd.xlane.f32.xlu0 %v1069_v27  ;;  %v1025_v46 = vpop.xlane.xlu0 %1024  ;;  %1362 = vmatpush.msrb.mxu0 %v803_v25  ;;  %v5176_v27 = vperm.slane %v5014_v8, 3 }
 0x20c   : > { %v1043_v32 = vmul.f32 %v5117_v54, %v1025_v46 }
 0x20e   : > { %v5149_v34 = vsub.f32 %v5088_v14, %v1043_v32 }
 0x210   : > { %v1057_v35 = vmul.f32 %v5149_v34, %v5149_v34 }
 0x212   : > { %v1072_v37 = vsel %vm818_vm1, %v1057_v35, 0.0  ;;  %v802_v35 = vld [vmem:[%s6742_s7 + $0x50] sm:$0xff] }
 0x213   : > { %v1028_v59 = vpop.xlane.xlu1 %1027  ;;  %1073 = vadd.xlane.f32.xlu1 %v1072_v37  ;;  %1363 = vmatpush.msrb.mxu0 %v802_v35 }
 0x214   : > { %v1044_v38 = vmul.f32 %v5117_v54, %v1028_v59  ;;  %v5183_v59 = vperm.slane %v5014_v8, 4 }
 0x216   : > { %v5155_v39 = vsub.f32 %v1009_v28, %v1044_v38  ;;  %v523_v28 = vld [vmem:[%s5111_s26 + $0x28] sm:$0xff] }
 0x218   : > { %v1058_v40 = vmul.f32 %v5155_v39, %v5155_v39 }
 0x21a   : > { %v1075_v14 = vsel %vm818_vm1, %v1058_v40, 0.0 }
 0x21b   : > { %1076 = vadd.xlane.f32.xlu0 %v1075_v14  ;;  %v1031_v42 = vpop.xlane.xlu1 %1030  ;;  %v801_v14 = vld [vmem:[%s6742_s7 + $0x48] sm:$0xff] }
 0x21c   : > { %v1045_v9 = vmul.f32 %v5117_v54, %v1031_v42  ;;  %1364 = vmatpush.msrb.mxu0 %v801_v14 }
 0x21e   : > { %v5161_v48 = vsub.f32 %v1010_v43, %v1045_v9 }
 0x220   : > { %v1059_v13 = vmul.f32 %v5161_v48, %v5161_v48 }
 0x222   : > { %v1078_v49 = vsel %vm818_vm1, %v1059_v13, 0.0 }
 0x223   : > { %1079 = vadd.xlane.f32.xlu1 %v1078_v49 }
 0x22f   : > { %1727 = vperm.xlu0 %4251, %v522_v50  }
 0x23c   : > { %1732 = vperm.xlu1 %4252, %v523_v28  }
 0x244   : > { %1717 = vperm.xlu1 %4252, %v520_v51  }
 0x266   : > { %v1062_v52 = vpop.xlane.xlu0 %1061 }
 0x267   : > { %v1081_v53 = vmul.f32 %v1062_v52, %v5117_v54 }
 0x269   : > { %v1088_v55 = vadd.f32 1e-05, %v1081_v53 }
 0x26b   : > { %4257 = vrsqrt.f32 %v1088_v55  ;;  %vm1101_vm5 = vweird.f32 %v1088_v55 }
 0x26e   : > { %v1065_v60 = vpop.xlane.xlu0 %1064 }
 0x26f   : > { %v1082_v43 = vmul.f32 %v1065_v60, %v5117_v54 }
 0x271   : > { %v4258_v61 = vpop.eup %4257  ;;  %v1089_v62 = vadd.f32 1e-05, %v1082_v43 }
 0x272   : > { %v1096_v1 = vmul.f32 %v4258_v61, %v1088_v55  ;;  %vm1102_vm4 = vweird.f32 %v4258_v61 }
 0x273   : > { %4259 = vrsqrt.f32 %v1089_v62  ;;  %vm1103_vm6 = vmor %vm1101_vm5, %vm1102_vm4  ;;  %vm1111_vm8 = vweird.f32 %v1089_v62 }
 0x274   : > { %v1097_v3 = vmul.f32 %v4258_v61, %v1096_v1 }
 0x276   : > { %v1098_v5 = vmul.f32 0.5, %v1097_v3  ;;  %v1068_v7 = vpop.xlane.xlu1 %1067 }
 0x277   : > { %v1083_v15 = vmul.f32 %v1068_v7, %v5117_v54 }
 0x278   : > { %v1099_v22 = vsub.f32 1.5, %v1098_v5 }
 0x279   : > { %v4260_v18 = vpop.eup %4259  ;;  %v1090_v20 = vadd.f32 1e-05, %v1083_v15 }
 0x27a   : > { %v1100_v23 = vmul.f32 %v4258_v61, %v1099_v22  ;;  %v1106_v33 = vmul.f32 %v4260_v18, %v1089_v62  ;;  %vm1112_vm7 = vweird.f32 %v4260_v18 }
 0x27b   : > { %4261 = vrsqrt.f32 %v1090_v20  ;;  %vm1113_vm9 = vmor %vm1111_vm8, %vm1112_vm7  ;;  %vm1121_vm11 = vweird.f32 %v1090_v20 }
 0x27c   : > { %v1104_v46 = vsel %vm1103_vm6, %v4258_v61, %v1100_v23  ;;  %v1107_v32 = vmul.f32 %v4260_v18, %v1106_v33 }
 0x27d   : > { %v1165_v37 = vmul.f32 %v1104_v46, %v5121_v19  ;;  %v800_v19 = vld [vmem:[%s6742_s7 + $0x40] sm:$0xff] }
 0x27e   : > { %v1108_v38 = vmul.f32 0.5, %v1107_v32  ;;  %v1071_v40 = vpop.xlane.xlu0 %1070  ;;  %1365 = vmatpush.msrb.mxu0 %v800_v19 }
 0x27f   : > { %v1084_v42 = vmul.f32 %v1071_v40, %v5117_v54  ;;  %v1173_v9 = vmul.f32 %v5176_v27, %v1165_v37 }
 0x280   : > { %v1109_v13 = vsub.f32 1.5, %v1108_v38 }
 0x281   : > { %v4262_v49 = vpop.eup %4261  ;;  %v1091_v50 = vadd.f32 1e-05, %v1084_v42  ;;  %v5194_v28 = vadd.f32 %v5183_v59, %v1173_v9 }
 0x282   : > { %v1110_v51 = vmul.f32 %v4260_v18, %v1109_v13  ;;  %v1116_v52 = vmul.f32 %v4262_v49, %v1090_v20  ;;  %vm1122_vm10 = vweird.f32 %v4262_v49 }
 0x283   : > { %4263 = vrsqrt.f32 %v1091_v50  ;;  %v4057_v53 = vmul.f32 -1.442695, %v5194_v28  ;;  %vm1123_vm12 = vmor %vm1121_vm11, %vm1122_vm10  ;;  %vm1131_vm14 = vweird.f32 %v1091_v50 }
 0x284   : > { %v1114_v55 = vsel %vm1113_vm9, %v4260_v18, %v1110_v51  ;;  %v1117_v60 = vmul.f32 %v4262_v49, %v1116_v52 }
 0x285   : > { %v1166_v43 = vmul.f32 %v1114_v55, %v5128_v4  ;;  %4265 = vpow2.f32 %v4057_v53 }
 0x286   : > { %v1118_v61 = vmul.f32 0.5, %v1117_v60  ;;  %v1074_v1 = vpop.xlane.xlu1 %1073 }
 0x287   : > { %v1085_v3 = vmul.f32 %v1074_v1, %v5117_v54  ;;  %v1174_v5 = vmul.f32 %v5176_v27, %v1166_v43 }
 0x288   : > { %v1119_v7 = vsub.f32 1.5, %v1118_v61 }
 0x289   : > { %v4264_v15 = vpop.eup %4263  ;;  %v1092_v62 = vadd.f32 1e-05, %v1085_v3  ;;  %v5201_v22 = vadd.f32 %v5183_v59, %v1174_v5 }
 0x28a   : > { %v1120_v23 = vmul.f32 %v4262_v49, %v1119_v7  ;;  %v1126_v18 = vmul.f32 %v4264_v15, %v1091_v50  ;;  %vm1132_vm13 = vweird.f32 %v4264_v15 }
 0x28b   : > { %v4266_v33 = vpop.eup %4265  ;;  %4267 = vrsqrt.f32 %v1092_v62  ;;  %v4058_v4 = vmul.f32 -1.442695, %v5201_v22  ;;  %vm1133_vm15 = vmor %vm1131_vm14, %vm1132_vm13  ;;  %vm1141_vm5 = vweird.f32 %v1092_v62 }
 0x28c   : > { %v1124_v25 = vsel %vm1123_vm12, %v4262_v49, %v1120_v23  ;;  %v1127_v46 = vmul.f32 %v4264_v15, %v1126_v18  ;;  %v1209_v32 = vadd.f32 1.0, %v4266_v33 }
 0x28d   : > { %v1167_v35 = vmul.f32 %v1124_v25, %v5135_v17  ;;  %4269 = vpow2.f32 %v4058_v4 }
 0x28e   : > { %v1128_v37 = vmul.f32 0.5, %v1127_v46  ;;  %v1077_v38 = vpop.xlane.xlu0 %1076  ;;  %4271 = vrcp.f32 %v1209_v32  ;;  %v1227_v7 = vand.u32 2147483648, %v1209_v32  ;;  %vm1221_vm7 = vweird.f32 %v1209_v32 }
 0x28f   : > { %v1086_v40 = vmul.f32 %v1077_v38, %v5117_v54  ;;  %v1175_v14 = vmul.f32 %v5176_v27, %v1167_v35 }
 0x290   : > { %v1129_v20 = vsub.f32 1.5, %v1128_v37 }
 0x291   : > { %v4268_v42 = vpop.eup %4267  ;;  %v5207_v9 = vadd.f32 1e-05, %v1086_v40  ;;  %v5210_v13 = vadd.f32 %v5183_v59, %v1175_v14  ;;  %v1228_v40 = vor.u32 1.1754944e-38, %v1227_v7 }
 0x292   : > { %v1130_v19 = vmul.f32 %v4264_v15, %v1129_v20  ;;  %v1136_v49 = vmul.f32 %v4268_v42, %v1092_v62  ;;  %vm1142_vm3 = vweird.f32 %v4268_v42 }
 0x293   : > { %v4270_v17 = vpop.eup %4269  ;;  %4273 = vrsqrt.f32 %v5207_v9  ;;  %v4059_v51 = vmul.f32 -1.442695, %v5210_v13  ;;  %vm1143_vm6 = vmor %vm1141_vm5, %vm1142_vm3  ;;  %vm1151_vm12 = vweird.f32 %v5207_v9 }
 0x294   : > { %v4272_v52 = vpop.eup %4271  ;;  %v1134_v53 = vsel %vm1133_vm15, %v4264_v15, %v1130_v19  ;;  %v1137_v55 = vmul.f32 %v4268_v42, %v1136_v49  ;;  %v5214_v60 = vadd.f32 1.0, %v4270_v17  ;;  %v1225_v15 = vand.u32 2147483647, %v1209_v32 }
 0x295   : > { %v1168_v43 = vmul.f32 %v1134_v53, %v5142_v24  ;;  %v1217_v61 = vmul.f32 %v4272_v52, %v1209_v32  ;;  %4275 = vpow2.f32 %v4059_v51  ;;  %vm1222_vm4 = vweird.f32 %v4272_v52 }
 0x296   : > { %v1138_v1 = vmul.f32 0.5, %v1137_v55  ;;  %v1080_v3 = vpop.xlane.xlu1 %1079  ;;  %4277 = vrcp.f32 %v5214_v60  ;;  %vm1223_vm8 = vmor %vm1221_vm7, %vm1222_vm4  ;;  %vm1226_vm9 = vcmp.eq.f32.partialorder %v1225_v15, 8.507059e+37  ;;  %vm1236_vm14 = vweird.f32 %v5214_v60 }
 0x297   : > { %v1087_v50 = vmul.f32 %v1080_v3, %v5117_v54  ;;  %v1218_v5 = vsub.f32 1.0, %v1217_v61  ;;  %v1176_v23 = vmul.f32 %v5176_v27, %v1168_v43 }
 0x298   : > { %v1139_v18 = vsub.f32 1.5, %v1138_v1 }
 0x299   : > { %v4274_v33 = vpop.eup %4273  ;;  %v5220_v4 = vadd.f32 1e-05, %v1087_v50  ;;  %v1219_v25 = vmul.f32 %v4272_v52, %v1218_v5  ;;  %v5223_v24 = vadd.f32 %v5183_v59, %v1176_v23 }
 0x29a   : > { %v1140_v46 = vmul.f32 %v4268_v42, %v1139_v18  ;;  %v1146_v35 = vmul.f32 %v4274_v33, %v5207_v9  ;;  %vm1152_vm10 = vweird.f32 %v4274_v33 }
 0x29b   : > { %v4276_v37 = vpop.eup %4275  ;;  %4279 = vrsqrt.f32 %v5220_v4  ;;  %v1220_v38 = vadd.f32 %v4272_v52, %v1219_v25  ;;  %v4060_v17 = vmul.f32 -1.442695, %v5223_v24  ;;  %vm1153_vm13 = vmor %vm1151_vm12, %vm1152_vm10 }
 0x29c   : > { %v4278_v14 = vpop.eup %4277  ;;  %v1144_v20 = vsel %vm1143_vm6, %v4268_v42, %v1140_v46  ;;  %v1147_v19 = vmul.f32 %v4274_v33, %v1146_v35  ;;  %v5227_v49 = vadd.f32 1.0, %v4276_v37  ;;  %v1242_v42 = vand.u32 2147483648, %v5214_v60 }
 0x29d   : > { %v1169_v51 = vmul.f32 %v1144_v20, %v5149_v34  ;;  %v1224_v62 = vsel %vm1223_vm8, %v4272_v52, %v1220_v38  ;;  %v1232_v53 = vmul.f32 %v4278_v14, %v5214_v60  ;;  %vm1237_vm11 = vweird.f32 %v4278_v14 }
 0x29e   : > { %v1148_v55 = vmul.f32 0.5, %v1147_v19  ;;  %v1229_v43 = vsel %vm1226_vm9, %v1228_v40, %v1224_v62  ;;  %4281 = vrcp.f32 %v5227_v49  ;;  %v1240_v52 = vand.u32 2147483647, %v5214_v60  ;;  %vm1238_vm15 = vmor %vm1236_vm14, %vm1237_vm11 }
 0x29f   : > { %v1321_v32 = vmul.f32 %v1229_v43, %v5194_v28  ;;  %v1233_v61 = vsub.f32 1.0, %v1232_v53  ;;  %4283 = vpow2.f32 %v4060_v17  ;;  %v1177_v3 = vmul.f32 %v5176_v27, %v1169_v51 }
 0x2a0   : > { %v1149_v1 = vsub.f32 1.5, %v1148_v55  ;;  %v1243_v46 = vor.u32 1.1754944e-38, %v1242_v42  ;;  %vm1241_vm3 = vcmp.eq.f32.partialorder %v1240_v52, 8.507059e+37  ;;  %v1257_v53 = vand.u32 2147483648, %v5227_v49 }
 0x2a1   : > { %v4280_v50 = vpop.eup %4279  ;;  %4064 = vmatmul.msk.f32.vlgmr.msrb.gmra.mxu0 %vm818_vm1, %v1321_v32  ;;  %v1234_v34 = vmul.f32 %v4278_v14, %v1233_v61  ;;  %v5241_v7 = vadd.f32 %v5183_v59, %v1177_v3  ;;  %vm1161_vm6 = vweird.f32 %v5220_v4  ;;  %vm1251_vm8 = vweird.f32 %v5227_v49 }
 0x2a2   : > { %v1150_v5 = vmul.f32 %v4274_v33, %v1149_v1  ;;  %v1156_v28 = vmul.f32 %v4280_v50, %v5220_v4  ;;  %vm1162_vm4 = vweird.f32 %v4280_v50  ;;  %v1258_v42 = vor.u32 1.1754944e-38, %v1257_v53 }
 0x2a3   : > { %v1235_v23 = vadd.f32 %v4278_v14, %v1234_v34  ;;  %v4061_v35 = vmul.f32 -1.442695, %v5241_v7  ;;  %vm1163_vm7 = vmor %vm1161_vm6, %vm1162_vm4 }
 0x2a4   : > { %v4282_v18 = vpop.eup %4281  ;;  %v1154_v15 = vsel %vm1153_vm13, %v4274_v33, %v1150_v5  ;;  %v1157_v25 = vmul.f32 %v4280_v50, %v1156_v28 }
 0x2a5   : > { %v1170_v37 = vmul.f32 %v1154_v15, %v5155_v39  ;;  %v1239_v38 = vsel %vm1238_vm15, %v4278_v14, %v1235_v23  ;;  %v1247_v9 = vmul.f32 %v4282_v18, %v5227_v49  ;;  %v4284_v40 = vpop.eup %4283  ;;  %4285 = vpow2.f32 %v4061_v35 }
 0x2a6   : > { %v1158_v20 = vmul.f32 0.5, %v1157_v25  ;;  %v1244_v19 = vsel %vm1241_vm3, %v1243_v46, %v1239_v38  ;;  %v1212_v51 = vadd.f32 1.0, %v4284_v40  ;;  %vm1252_vm5 = vweird.f32 %v4282_v18 }
 0x2a7   : > { %v1322_v17 = vmul.f32 %v1244_v19, %v5201_v22  ;;  %v1248_v60 = vsub.f32 1.0, %v1247_v9  ;;  %v1178_v33 = vmul.f32 %v5176_v27, %v1170_v37  ;;  %v1255_v14 = vand.u32 2147483647, %v5227_v49  ;;  %vm1253_vm9 = vmor %vm1251_vm8, %vm1252_vm5 }
 0x2a8   : > { %v1159_v62 = vsub.f32 1.5, %v1158_v20  ;;  %4287 = vrcp.f32 %v1212_v51  ;;  %v1272_v25 = vand.u32 2147483648, %v1212_v51  ;;  %v1270_v46 = vand.u32 2147483647, %v1212_v51 }
 0x2a9   : > { %4065 = vmatmul.msk.f32.gmra.mxu0 %vm818_vm1, %v1322_v17  ;;  %v1249_v39 = vmul.f32 %v4282_v18, %v1248_v60  ;;  %v5254_v22 = vadd.f32 %v5183_v59, %v1178_v33  ;;  %vm1256_vm10 = vcmp.eq.f32.partialorder %v1255_v14, 8.507059e+37  ;;  %vm1266_vm12 = vweird.f32 %v1212_v51 }
 0x2aa   : > { %v1160_v55 = vmul.f32 %v4280_v50, %v1159_v62  ;;  %vm1271_vm14 = vcmp.eq.f32.partialorder %v1270_v46, 8.507059e+37 }
 0x2ab   : > { %v1250_v43 = vadd.f32 %v4282_v18, %v1249_v39  ;;  %v4286_v32 = vpop.eup %4285  ;;  %v4062_v1 = vmul.f32 -1.442695, %v5254_v22 }
 0x2ac   : > { %v1164_v61 = vsel %vm1163_vm7, %v4280_v50, %v1160_v55  ;;  %v1213_v52 = vadd.f32 1.0, %v4286_v32 }
 0x2ad   : > { %v1171_v3 = vmul.f32 %v1164_v61, %v5161_v48  ;;  %v1254_v34 = vsel %vm1253_vm9, %v4282_v18, %v1250_v43  ;;  %4289 = vpow2.f32 %v4062_v1 }
 0x2ae   : > { %v1259_v5 = vsel %vm1256_vm10, %v1258_v42, %v1254_v34  ;;  %v4288_v4 = vpop.eup %4287  ;;  %4291 = vrcp.f32 %v1213_v52  ;;  %v1287_v19 = vand.u32 2147483648, %v1213_v52  ;;  %v1285_v33 = vand.u32 2147483647, %v1213_v52 }
 0x2af   : > { %v1323_v28 = vmul.f32 %v1259_v5, %v5210_v13  ;;  %v1262_v23 = vmul.f32 %v4288_v4, %v1212_v51  ;;  %v1179_v49 = vmul.f32 %v5176_v27, %v1171_v3  ;;  %vm1267_vm11 = vweird.f32 %v4288_v4 }
 0x2b0   : > { %vm1268_vm13 = vmor %vm1266_vm12, %vm1267_vm11  ;;  %v1273_v27 = vor.u32 1.1754944e-38, %v1272_v25  ;;  %vm1281_vm3 = vweird.f32 %v1213_v52  ;;  %v1288_v39 = vor.u32 1.1754944e-38, %v1287_v19  ;;  %vm1286_vm5 = vcmp.eq.f32.partialorder %v1285_v33, 8.507059e+37 }
 0x2b1   : > { %4066 = vmatmul.msk.f32.gmra.mxu0 %vm818_vm1, %v1323_v28  ;;  %v1263_v50 = vsub.f32 1.0, %v1262_v23  ;;  %v5263_v15 = vadd.f32 %v5183_v59, %v1179_v49 }
 0x2b3   : > { %v4290_v48 = vpop.eup %4289  ;;  %v1264_v18 = vmul.f32 %v4288_v4, %v1263_v50  ;;  %v4063_v35 = vmul.f32 -1.442695, %v5263_v15 }
 0x2b4   : > { %v4292_v37 = vpop.eup %4291  ;;  %v1214_v38 = vadd.f32 1.0, %v4290_v48 }
 0x2b5   : > { %v1265_v13 = vadd.f32 %v4288_v4, %v1264_v18  ;;  %v1277_v9 = vmul.f32 %v4292_v37, %v1213_v52  ;;  %4293 = vpow2.f32 %v4063_v35  ;;  %vm1282_vm15 = vweird.f32 %v4292_v37 }
 0x2b6   : > { %4295 = vrcp.f32 %v1214_v38  ;;  %vm1283_vm4 = vmor %vm1281_vm3, %vm1282_vm15  ;;  %v1302_v42 = vand.u32 2147483648, %v1214_v38  ;;  %v1300_v3 = vand.u32 2147483647, %v1214_v38  ;;  %vm1296_vm7 = vweird.f32 %v1214_v38 }
 0x2b7   : > { %v1269_v40 = vsel %vm1268_vm13, %v4288_v4, %v1265_v13  ;;  %v1278_v59 = vsub.f32 1.0, %v1277_v9 }
 0x2b8   : > { %v1274_v20 = vsel %vm1271_vm14, %v1273_v27, %v1269_v40  ;;  %v1303_v5 = vor.u32 1.1754944e-38, %v1302_v42  ;;  %vm1301_vm9 = vcmp.eq.f32.partialorder %v1300_v3, 8.507059e+37 }
 0x2b9   : > { %v1324_v17 = vmul.f32 %v1274_v20, %v5223_v24  ;;  %v1279_v60 = vmul.f32 %v4292_v37, %v1278_v59 }
 0x2bb   : > { %v4294_v62 = vpop.eup %4293  ;;  %4067 = vmatmul.msk.f32.gmra.mxu0 %vm818_vm1, %v1324_v17  ;;  %v1280_v53 = vadd.f32 %v4292_v37, %v1279_v60 }
 0x2bc   : > { %v4296_v51 = vpop.eup %4295  ;;  %v1215_v14 = vadd.f32 1.0, %v4294_v62 }
 0x2bd   : > { %v1284_v55 = vsel %vm1283_vm4, %v4292_v37, %v1280_v53  ;;  %v1292_v43 = vmul.f32 %v4296_v51, %v1214_v38  ;;  %vm1297_vm6 = vweird.f32 %v4296_v51 }
 0x2be   : > { %v1289_v32 = vsel %vm1286_vm5, %v1288_v39, %v1284_v55  ;;  %4297 = vrcp.f32 %v1215_v14  ;;  %vm1298_vm8 = vmor %vm1296_vm7, %vm1297_vm6  ;;  %v1315_v48 = vand.u32 2147483647, %v1215_v14  ;;  %vm1311_vm11 = vweird.f32 %v1215_v14 }
 0x2bf   : > { %v1325_v61 = vmul.f32 %v1289_v32, %v5241_v7  ;;  %v1293_v24 = vsub.f32 1.0, %v1292_v43  ;;  %v1317_v7 = vand.u32 2147483648, %v1215_v14 }
 0x2c0   : > { %vm1316_vm13 = vcmp.eq.f32.partialorder %v1315_v48, 8.507059e+37 }
 0x2c1   : > { %v1294_v1 = vmul.f32 %v4296_v51, %v1293_v24  ;;  %v1318_v46 = vor.u32 1.1754944e-38, %v1317_v7 }
 0x2c3   : > { %4068 = vmatmul.msk.f32.gmra.mxu0 %vm818_vm1, %v1325_v61  ;;  %v1295_v34 = vadd.f32 %v4296_v51, %v1294_v1 }
 0x2c4   : > { %v4298_v52 = vpop.eup %4297 }
 0x2c5   : > { %v1299_v4 = vsel %vm1298_vm8, %v4296_v51, %v1295_v34  ;;  %v1307_v28 = vmul.f32 %v4298_v52, %v1215_v14  ;;  %vm1312_vm10 = vweird.f32 %v4298_v52 }
 0x2c6   : > { %v1304_v23 = vsel %vm1301_vm9, %v1303_v5, %v1299_v4  ;;  %vm1313_vm12 = vmor %vm1311_vm11, %vm1312_vm10 }
 0x2c7   : > { %v1326_v49 = vmul.f32 %v1304_v23, %v5254_v22  ;;  %v1308_v50 = vsub.f32 1.0, %v1307_v28  ;;  %v5275_v22 = vperm.slane %v5014_v8, 5  ;;  %v5287_v28 = vperm.slane %v5014_v8, 6 }
 0x2c9   : > { %v1309_v25 = vmul.f32 %v4298_v52, %v1308_v50 }
 0x2cb   : > { %4069 = vmatmul.msk.f32.gmra.mxu0 %vm818_vm1, %v1326_v49  ;;  %v1310_v18 = vadd.f32 %v4298_v52, %v1309_v25  ;;  %v5293_v25 = vperm.slane %v5014_v8, 7 }
 0x2cd   : > { %v1314_v35 = vsel %vm1313_vm12, %v4298_v52, %v1310_v18 }
 0x2ce   : > { %v1319_v37 = vsel %vm1316_vm13, %v1318_v46, %v1314_v35 }
 0x2cf   : > { %v1327_v38 = vmul.f32 %v1319_v37, %v5263_v15 }
 0x2d3   : > { %4070 = vmatmul.msk.f32.gmra.mxu0 %vm818_vm1, %v1327_v38 }
 0x31e   : > { %v1367_v13 = vpop.f32.mrf.mxu0 }
 0x31f   : > { %v1368_v9 = vadd.f32 %v1367_v13, %v5275_v22 }
 0x321   : > { %v4071_v27 = vmul.f32 -1.442695, %v1368_v9 }
 0x323   : > { %4299 = vpow2.f32 %v4071_v27 }
 0x326   : > { %v1370_v40 = vpop.f32.mrf.mxu0 }
 0x327   : > { %v1371_v59 = vadd.f32 %v1370_v40, %v5275_v22 }
 0x329   : > { %v4300_v20 = vpop.eup %4299  ;;  %v4072_v19 = vmul.f32 -1.442695, %v1371_v59 }
 0x32a   : > { %v1409_v17 = vadd.f32 1.0, %v4300_v20 }
 0x32b   : > { %4301 = vpow2.f32 %v4072_v19 }
 0x32c   : > { %4303 = vrcp.f32 %v1409_v17  ;;  %v1427_v55 = vand.u32 2147483648, %v1409_v17  ;;  %v1425_v32 = vand.u32 2147483647, %v1409_v17  ;;  %vm1421_vm15 = vweird.f32 %v1409_v17 }
 0x32e   : > { %v1373_v60 = vpop.f32.mrf.mxu0  ;;  %v1428_v3 = vor.u32 1.1754944e-38, %v1427_v55  ;;  %vm1426_vm4 = vcmp.eq.f32.partialorder %v1425_v32, 8.507059e+37 }
 0x32f   : > { %v5280_v15 = vadd.f32 %v1373_v60, %v5275_v22 }
 0x331   : > { %v4302_v33 = vpop.eup %4301  ;;  %v4073_v62 = vmul.f32 -1.442695, %v5280_v15 }
 0x332   : > { %v4304_v53 = vpop.eup %4303  ;;  %v1410_v51 = vadd.f32 1.0, %v4302_v33 }
 0x333   : > { %v1417_v39 = vmul.f32 %v4304_v53, %v1409_v17  ;;  %4305 = vpow2.f32 %v4073_v62  ;;  %vm1422_vm14 = vweird.f32 %v4304_v53 }
 0x334   : > { %4307 = vrcp.f32 %v1410_v51  ;;  %vm1423_vm3 = vmor %vm1421_vm15, %vm1422_vm14  ;;  %v1440_v48 = vand.u32 2147483647, %v1410_v51  ;;  %v1442_v18 = vand.u32 2147483648, %v1410_v51  ;;  %vm1436_vm6 = vweird.f32 %v1410_v51 }
 0x335   : > { %v1418_v14 = vsub.f32 1.0, %v1417_v39 }
 0x336   : > { %v1443_v27 = vor.u32 1.1754944e-38, %v1442_v18  ;;  %vm1441_vm8 = vcmp.eq.f32.partialorder %v1440_v48, 8.507059e+37 }
 0x337   : > { %v1419_v43 = vmul.f32 %v4304_v53, %v1418_v14 }
 0x338   : > { %v1376_v42 = vpop.f32.mrf.mxu0 }
 0x339   : > { %v4306_v61 = vpop.eup %4305  ;;  %v1420_v24 = vadd.f32 %v4304_v53, %v1419_v43  ;;  %v5284_v52 = vadd.f32 %v1376_v42, %v5275_v22 }
 0x33a   : > { %v4308_v1 = vpop.eup %4307  ;;  %v1411_v34 = vadd.f32 1.0, %v4306_v61 }
 0x33b   : > { %v1424_v5 = vsel %vm1423_vm3, %v4304_v53, %v1420_v24  ;;  %v1432_v4 = vmul.f32 %v4308_v1, %v1410_v51  ;;  %v4074_v7 = vmul.f32 -1.442695, %v5284_v52  ;;  %vm1437_vm5 = vweird.f32 %v4308_v1 }
 0x33c   : > { %v1429_v23 = vsel %vm1426_vm4, %v1428_v3, %v1424_v5  ;;  %4309 = vrcp.f32 %v1411_v34  ;;  %vm1438_vm7 = vmor %vm1436_vm6, %vm1437_vm5  ;;  %v1457_v51 = vand.u32 2147483648, %v1411_v34  ;;  %v1455_v55 = vand.u32 2147483647, %v1411_v34 }
 0x33d   : > { %v5289_v49 = vmul.f32 %v1429_v23, %v1368_v9  ;;  %v1433_v50 = vsub.f32 1.0, %v1432_v4  ;;  %4311 = vpow2.f32 %v4074_v7  ;;  %vm1451_vm10 = vweird.f32 %v1411_v34 }
 0x33e   : > { %v1458_v42 = vor.u32 1.1754944e-38, %v1457_v51  ;;  %vm1456_vm12 = vcmp.eq.f32.partialorder %v1455_v55, 8.507059e+37 }
 0x33f   : > { %v1434_v46 = vmul.f32 %v4308_v1, %v1433_v50  ;;  %v1529_v35 = vmul.f32 %v5287_v28, %v5289_v49 }
 0x340   : > { %v1379_v38 = vpop.f32.mrf.mxu0 }
 0x341   : > { %v1435_v37 = vadd.f32 %v4308_v1, %v1434_v46  ;;  %v1537_v13 = vadd.f32 %v5293_v25, %v1529_v35  ;;  %v5299_v40 = vadd.f32 %v1379_v38, %v5275_v22 }
 0x342   : > { %v4310_v9 = vpop.eup %4309 }
 0x343   : > { %v1439_v8 = vsel %vm1438_vm7, %v4308_v1, %v1435_v37  ;;  %v1447_v20 = vmul.f32 %v4310_v9, %v1411_v34  ;;  %v1544_v19 = vsel %vm818_vm1, %v1537_v13, 0.0  ;;  %v4075_v60 = vmul.f32 -1.442695, %v5299_v40  ;;  %v4312_v33 = vpop.eup %4311 }
 0x344   : > { %v1444_v17 = vsel %vm1441_vm8, %v1443_v27, %v1439_v8  ;;  %1545 = vadd.xlane.f32.xlu0 %v1544_v19  ;;  %v1412_v39 = vadd.f32 1.0, %v4312_v33  ;;  %vm1452_vm9 = vweird.f32 %v4310_v9 }
 0x345   : > { %v5303_v62 = vmul.f32 %v1444_v17, %v1371_v59  ;;  %v1448_v53 = vsub.f32 1.0, %v1447_v20  ;;  %4313 = vpow2.f32 %v4075_v60  ;;  %vm1453_vm11 = vmor %vm1451_vm10, %vm1452_vm9 }
 0x346   : > { %4315 = vrcp.f32 %v1412_v39  ;;  %v1472_v37 = vand.u32 2147483648, %v1412_v39  ;;  %vm1466_vm14 = vweird.f32 %v1412_v39 }
 0x347   : > { %v1449_v14 = vmul.f32 %v4310_v9, %v1448_v53  ;;  %v1530_v43 = vmul.f32 %v5287_v28, %v5303_v62 }
 0x348   : > { %v1382_v61 = vpop.f32.mrf.mxu0  ;;  %v1473_v33 = vor.u32 1.1754944e-38, %v1472_v37 }
 0x349   : > { %v1450_v32 = vadd.f32 %v4310_v9, %v1449_v14  ;;  %v1538_v24 = vadd.f32 %v5293_v25, %v1530_v43  ;;  %v5309_v59 = vadd.f32 %v1382_v61, %v5275_v22 }
 0x34b   : > { %v1454_v1 = vsel %vm1453_vm11, %v4310_v9, %v1450_v32  ;;  %v1547_v3 = vsel %vm818_vm1, %v1538_v24, 0.0  ;;  %v4314_v5 = vpop.eup %4313  ;;  %v4076_v23 = vmul.f32 -1.442695, %v5309_v59 }
 0x34c   : > { %v1459_v4 = vsel %vm1456_vm12, %v1458_v42, %v1454_v1  ;;  %1548 = vadd.xlane.f32.xlu1 %v1547_v3  ;;  %v1413_v34 = vadd.f32 1.0, %v4314_v5  ;;  %v4316_v7 = vpop.eup %4315 }
 0x34d   : > { %v5314_v50 = vmul.f32 %v1459_v4, %v5280_v15  ;;  %4317 = vpow2.f32 %v4076_v23  ;;  %v1462_v48 = vmul.f32 %v4316_v7, %v1412_v39  ;;  %vm1467_vm13 = vweird.f32 %v4316_v7 }
 0x34e   : > { %4319 = vrcp.f32 %v1413_v34  ;;  %v1470_v15 = vand.u32 2147483647, %v1412_v39  ;;  %vm1468_vm15 = vmor %vm1466_vm14, %vm1467_vm13  ;;  %v1487_v43 = vand.u32 2147483648, %v1413_v34  ;;  %v1485_v61 = vand.u32 2147483647, %v1413_v34 }
 0x34f   : > { %v1531_v18 = vmul.f32 %v5287_v28, %v5314_v50  ;;  %v1463_v46 = vsub.f32 1.0, %v1462_v48  ;;  %vm1481_vm5 = vweird.f32 %v1413_v34 }
 0x350   : > { %v1385_v35 = vpop.f32.mrf.mxu0  ;;  %vm1471_vm3 = vcmp.eq.f32.partialorder %v1470_v15, 8.507059e+37  ;;  %v1488_v3 = vor.u32 1.1754944e-38, %v1487_v43  ;;  %vm1486_vm7 = vcmp.eq.f32.partialorder %v1485_v61, 8.507059e+37 }
 0x351   : > { %v5319_v38 = vadd.f32 %v1385_v35, %v5275_v22  ;;  %v1539_v13 = vadd.f32 %v5293_v25, %v1531_v18  ;;  %v1464_v9 = vmul.f32 %v4316_v7, %v1463_v46 }
 0x353   : > { %v4318_v27 = vpop.eup %4317  ;;  %v4077_v8 = vmul.f32 -1.442695, %v5319_v38  ;;  %v1550_v20 = vsel %vm818_vm1, %v1539_v13, 0.0  ;;  %v1465_v17 = vadd.f32 %v4316_v7, %v1464_v9 }
 0x354   : > { %v4320_v19 = vpop.eup %4319  ;;  %v1414_v60 = vadd.f32 1.0, %v4318_v27  ;;  %1551 = vadd.xlane.f32.xlu2 %v1550_v20 }
 0x355   : > { %v1477_v53 = vmul.f32 %v4320_v19, %v1413_v34  ;;  %4321 = vpow2.f32 %v4077_v8  ;;  %v1469_v22 = vsel %vm1468_vm15, %v4316_v7, %v1465_v17  ;;  %vm1482_vm4 = vweird.f32 %v4320_v19 }
 0x356   : > { %4323 = vrcp.f32 %v1414_v60  ;;  %v1474_v51 = vsel %vm1471_vm3, %v1473_v33, %v1469_v22  ;;  %vm1483_vm6 = vmor %vm1481_vm5, %vm1482_vm4  ;;  %v1502_v35 = vand.u32 2147483648, %v1414_v60  ;;  %v1500_v37 = vand.u32 2147483647, %v1414_v60 }
 0x357   : > { %v1478_v14 = vsub.f32 1.0, %v1477_v53  ;;  %v5325_v55 = vmul.f32 %v1474_v51, %v5284_v52  ;;  %vm1496_vm9 = vweird.f32 %v1414_v60 }
 0x358   : > { %v1503_v8 = vor.u32 1.1754944e-38, %v1502_v35  ;;  %vm1501_vm11 = vcmp.eq.f32.partialorder %v1500_v37, 8.507059e+37  ;;  %v5388_v35 = vpop.permute.xlu0 %1727 }
 0x359   : > { %v1479_v32 = vmul.f32 %v4320_v19, %v1478_v14  ;;  %v1532_v39 = vmul.f32 %v5287_v28, %v5325_v55 }
 0x35b   : > { %v4322_v24 = vpop.eup %4321  ;;  %v1480_v42 = vadd.f32 %v4320_v19, %v1479_v32  ;;  %v1540_v4 = vadd.f32 %v5293_v25, %v1532_v39 }
 0x35c   : > { %v4324_v1 = vpop.eup %4323  ;;  %v1415_v5 = vadd.f32 1.0, %v4322_v24 }
 0x35d   : > { %v1484_v23 = vsel %vm1483_vm6, %v4320_v19, %v1480_v42  ;;  %v1492_v52 = vmul.f32 %v4324_v1, %v1414_v60  ;;  %v1553_v46 = vsel %vm818_vm1, %v1540_v4, 0.0  ;;  %vm1497_vm8 = vweird.f32 %v4324_v1  ;;  %v518_v4 = vld [vmem:[%s5111_s26] sm:$0xff] }
 0x35e   : > { %v1489_v7 = vsel %vm1486_vm7, %v1488_v3, %v1484_v23  ;;  %4325 = vrcp.f32 %v1415_v5  ;;  %1554 = vadd.xlane.f32.xlu0 %v1553_v46  ;;  %vm1498_vm10 = vmor %vm1496_vm9, %vm1497_vm8  ;;  %v1517_v22 = vand.u32 2147483648, %v1415_v5  ;;  %v1515_v60 = vand.u32 2147483647, %v1415_v5  ;;  %v519_v23 = vld [vmem:[%s5111_s26 + $0x8] sm:$0xff]  ;;  %v5386_v46 = vpop.permute.xlu2 %1737 }
 0x35f   : > { %v5331_v48 = vmul.f32 %v1489_v7, %v5299_v40  ;;  %v1493_v18 = vsub.f32 1.0, %v1492_v52  ;;  %vm1511_vm13 = vweird.f32 %v1415_v5  ;;  %v5357_v52 = vld [vmem:[%s6779_s0] sm:$0xff]  ;;  %v5378_v7 = vpop.permute.xlu1 %1732 }
 0x360   : > { %v1518_v61 = vor.u32 1.1754944e-38, %v1517_v22  ;;  %vm1516_vm15 = vcmp.eq.f32.partialorder %v1515_v60, 8.507059e+37 }
 0x361   : > { %v1494_v34 = vmul.f32 %v4324_v1, %v1493_v18  ;;  %v1533_v13 = vmul.f32 %v5287_v28, %v5331_v48  ;;  %v5383_v18 = vld [vmem:[%s6779_s0 + $0x20] sm:$0xff] }
 0x363   : > { %v1495_v9 = vadd.f32 %v4324_v1, %v1494_v34  ;;  %v1541_v15 = vadd.f32 %v5293_v25, %v1533_v13  ;;  %v5393_v34 = vld [vmem:[%s6779_s0 + $0x28] sm:$0xff] }
 0x364   : > { %v4326_v27 = vpop.eup %4325 }
 0x365   : > { %v1499_v40 = vsel %vm1498_vm10, %v4324_v1, %v1495_v9  ;;  %v1507_v20 = vmul.f32 %v4326_v27, %v1415_v5  ;;  %v1556_v19 = vsel %vm818_vm1, %v1541_v15, 0.0  ;;  %vm1512_vm12 = vweird.f32 %v4326_v27  ;;  %v5403_v15 = vld [vmem:[%s6779_s0 + $0x30] sm:$0xff] }
 0x366   : > { %v1504_v17 = vsel %vm1501_vm11, %v1503_v8, %v1499_v40  ;;  %1557 = vadd.xlane.f32.xlu1 %v1556_v19  ;;  %vm1513_vm14 = vmor %vm1511_vm13, %vm1512_vm12  ;;  %v5398_v9 = vpop.permute.xlu2 %1722 }
 0x367   : > { %v5339_v33 = vmul.f32 %v1504_v17, %v5309_v59  ;;  %v1508_v53 = vsub.f32 1.0, %v1507_v20  ;;  %v5396_v37 = vpop.permute.xlu1 %1717 }
 0x369   : > { %v1509_v51 = vmul.f32 %v4326_v27, %v1508_v53  ;;  %v1534_v14 = vmul.f32 %v5287_v28, %v5339_v33 }
 0x36b   : > { %v1510_v43 = vadd.f32 %v4326_v27, %v1509_v51  ;;  %v1542_v32 = vadd.f32 %v5293_v25, %v1534_v14 }
 0x36d   : > { %v1514_v39 = vsel %vm1513_vm14, %v4326_v27, %v1510_v43  ;;  %v1559_v59 = vsel %vm818_vm1, %v1542_v32, 0.0 }
 0x36e   : > { %v1519_v24 = vsel %vm1516_vm15, %v1518_v61, %v1514_v39  ;;  %1560 = vadd.xlane.f32.xlu2 %v1559_v59 }
 0x36f   : > { %v5346_v42 = vmul.f32 %v1519_v24, %v5319_v38  ;;  %v5375_v38 = vld [vmem:[%s6779_s0 + $0x18] sm:$0xff] }
 0x371   : > { %v1535_v1 = vmul.f32 %v5287_v28, %v5346_v42  ;;  %v5363_v28 = vld [vmem:[%s6779_s0 + $0x8] sm:$0xff] }
 0x373   : > { %v1543_v3 = vadd.f32 %v5293_v25, %v1535_v1  ;;  %v5369_v25 = vld [vmem:[%s6779_s0 + $0x10] sm:$0xff] }
 0x375   : > { %v1562_v5 = vsel %vm818_vm1, %v1543_v3, 0.0 }
 0x376   : > { %1563 = vadd.xlane.f32.xlu0 %v1562_v5 }
 0x386   : > { %1707 = vperm.xlu2 %4253, %v518_v4  }
 0x38a   : > { %1712 = vperm.xlu0 %4251, %v519_v23  }
 0x3a0   : > { %1747 = vxpose.xlu1.b32.start [1/7] (short) (narrow) %v5357_v52, 8 }
 0x3a8   : > { %1748 = vxpose.xlu1.b32.cont [2/7] (short) (narrow) %v5363_v28, 8 }
 0x3b0   : > { %1749 = vxpose.xlu1.b32.cont [3/7] (short) (narrow) %v5369_v25, 8 }
 0x3b7   : > { %v1546_v13 = vpop.xlane.xlu0 %1545 }
 0x3b8   : > { %1750 = vxpose.xlu1.b32.cont [4/7] (short) (narrow) %v5375_v38, 8  ;;  %v4078_v8 = vmul.f32 -1.442695, %v1546_v13 }
 0x3ba   : > { %4327 = vpow2.f32 %v4078_v8 }
 0x3bf   : > { %v1549_v27 = vpop.xlane.xlu1 %1548 }
 0x3c0   : > { %1751 = vxpose.xlu1.b32.cont [5/7] (short) (narrow) %v5383_v18, 8  ;;  %v4079_v20 = vmul.f32 -1.442695, %v1549_v27  ;;  %v4328_v60 = vpop.eup %4327 }
 0x3c1   : > { %v5406_v59 = vadd.f32 1.0, %v4328_v60 }
 0x3c2   : > { %4329 = vpow2.f32 %v4079_v20 }
 0x3c7   : > { %v1552_v19 = vpop.xlane.xlu2 %1551 }
 0x3c8   : > { %1752 = vxpose.xlu1.b32.cont [6/7] (short) (narrow) %v5393_v34, 8  ;;  %v4080_v22 = vmul.f32 -1.442695, %v1552_v19  ;;  %v4330_v14 = vpop.eup %4329 }
 0x3c9   : > { %v5408_v1 = vadd.f32 1.0, %v4330_v14 }
 0x3cb   : > { %vm1613_vm14 = vweird.f32 %v5408_v1 }
 0x3d0   : > { %1753 = vxpose.xlu1.b32.end [7/7] (short) (narrow) %v5403_v15, 8 }
 0x3d1   : > { %v1555_v40 = vpop.xlane.xlu0 %1554 }
 0x3d2   : > { %v4081_v17 = vmul.f32 -1.442695, %v1555_v40 }
 0x3d9   : > { %v1558_v53 = vpop.xlane.xlu1 %1557 }
 0x3da   : > { %v4082_v51 = vmul.f32 -1.442695, %v1558_v53 }
 0x3dc   : > { %4331 = vpow2.f32 %v4082_v51 }
 0x3dd   : > { %4333 = vpow2.f32 %v4081_v17 }
 0x3de   : > { %4335 = vpow2.f32 %v4080_v22 }
 0x3e1   : > { %v1561_v43 = vpop.xlane.xlu2 %1560 }
 0x3e2   : > { %v4332_v32 = vpop.eup %4331  ;;  %v4083_v61 = vmul.f32 -1.442695, %v1561_v43 }
 0x3e3   : > { %v4334_v39 = vpop.eup %4333  ;;  %v5410_v3 = vadd.f32 1.0, %v4332_v32 }
 0x3e4   : > { %v4336_v24 = vpop.eup %4335  ;;  %4337 = vpow2.f32 %v4083_v61  ;;  %v5412_v5 = vadd.f32 1.0, %v4334_v39 }
 0x3e5   : > { %4339 = vrcp.f32 %v5406_v59  ;;  %v5415_v4 = vadd.f32 1.0, %v4336_v24  ;;  %vm1658_vm7 = vweird.f32 %v5410_v3 }
 0x3e6   : > { %4341 = vrcp.f32 %v5408_v1  ;;  %vm1643_vm3 = vweird.f32 %v5412_v5 }
 0x3e7   : > { %4343 = vrcp.f32 %v5410_v3  ;;  %vm1628_vm6 = vweird.f32 %v5415_v4 }
 0x3e8   : > { %4345 = vrcp.f32 %v5412_v5 }
 0x3e9   : > { %v1564_v23 = vpop.xlane.xlu0 %1563  ;;  %4347 = vrcp.f32 %v5415_v4 }
 0x3ea   : > { %v4338_v13 = vpop.eup %4337  ;;  %v4084_v27 = vmul.f32 -1.442695, %v1564_v23 }
 0x3eb   : > { %v5421_v8 = vadd.f32 1.0, %v4338_v13  ;;  %v5423_v40 = vpop.eup %4339 }
 0x3ec   : > { %4349 = vpow2.f32 %v4084_v27  ;;  %v5426_v20 = vpop.eup %4341  ;;  %v1594_v51 = vmul.f32 %v5423_v40, %v5406_v59  ;;  %vm1599_vm13 = vweird.f32 %v5423_v40 }
 0x3ed   : > { %4351 = vrcp.f32 %v5421_v8  ;;  %v5428_v19 = vpop.eup %4343  ;;  %v1609_v43 = vmul.f32 %v5426_v20, %v5408_v1  ;;  %vm1614_vm9 = vweird.f32 %v5426_v20  ;;  %vm1673_vm10 = vweird.f32 %v5421_v8 }
 0x3ee   : > { %v5430_v17 = vpop.eup %4345  ;;  %v1654_v60 = vmul.f32 %v5428_v19, %v5410_v3  ;;  %v1595_v23 = vsub.f32 1.0, %v1594_v51  ;;  %vm1659_vm8 = vweird.f32 %v5428_v19 }
 0x3ef   : > { %v5432_v53 = vpop.eup %4347  ;;  %v1639_v32 = vmul.f32 %v5430_v17, %v5412_v5  ;;  %v1610_v31 = vsub.f32 1.0, %v1609_v43  ;;  %vm1644_vm12 = vweird.f32 %v5430_v17 }
 0x3f0   : > { %v1624_v39 = vmul.f32 %v5432_v53, %v5415_v4  ;;  %v1655_v13 = vsub.f32 1.0, %v1654_v60  ;;  %v5446_v63 = vmul.f32 %v5423_v40, %v1595_v23  ;;  %vm1629_vm4 = vweird.f32 %v5432_v53 }
 0x3f1   : > { %v1640_v36 = vsub.f32 1.0, %v1639_v32  ;;  %v1611_v29 = vmul.f32 %v5426_v20, %v1610_v31  ;;  %v1679_v32 = vand.u32 2147483648, %v5421_v8  ;;  %v1662_v31 = vand.u32 2147483647, %v5410_v3 }
 0x3f2   : > { %v4350_v22 = vpop.eup %4349  ;;  %v1625_v47 = vsub.f32 1.0, %v1624_v39  ;;  %v1656_v2 = vmul.f32 %v5428_v19, %v1655_v13  ;;  %v1664_v23 = vand.u32 2147483648, %v5410_v3 }
 0x3f3   : > { %v4352_v14 = vpop.eup %4351  ;;  %v1592_v61 = vadd.f32 1.0, %v4350_v22  ;;  %v1641_v26 = vmul.f32 %v5430_v17, %v1640_v36  ;;  %vm1663_vm0 = vcmp.eq.f32.partialorder %v1662_v31, 8.507059e+37  ;;  %v1612_v22 = vadd.f32 %v5426_v20, %v1611_v29 }
 0x3f4   : > { %v1669_v24 = vmul.f32 %v4352_v14, %v5421_v8  ;;  %vm1674_vm5 = vweird.f32 %v4352_v14  ;;  %v1626_v43 = vmul.f32 %v5432_v53, %v1625_v47  ;;  %v1657_v39 = vadd.f32 %v5428_v19, %v1656_v2 }
 0x3f5   : > { %4353 = vrcp.f32 %v1592_v61  ;;  %v1694_v47 = vand.u32 2147483648, %v1592_v61  ;;  %vm5464_vm11 = vmor %vm1673_vm10, %vm1674_vm5  ;;  %v1642_v13 = vadd.f32 %v5430_v17, %v1641_v26  ;;  %v1647_v26 = vand.u32 2147483647, %v5412_v5 }
 0x3f6   : > { %v1670_v27 = vsub.f32 1.0, %v1669_v24  ;;  %vm5479_vm5 = vmor %vm1658_vm7, %vm1659_vm8  ;;  %v1627_v12 = vadd.f32 %v5432_v53, %v1626_v43  ;;  %vm1688_vm10 = vweird.f32 %v1592_v61  ;;  %v1665_v24 = vor.u32 1.1754944e-38, %v1664_v23 }
 0x3f7   : > { %vm5493_vm7 = vmor %vm1643_vm3, %vm1644_vm12  ;;  %vm1648_vm3 = vcmp.eq.f32.partialorder %v1647_v26, 8.507059e+37  ;;  %v1619_v31 = vand.u32 2147483648, %v5408_v1 }
 0x3f8   : > { %v1671_v41 = vmul.f32 %v4352_v14, %v1670_v27 }
 0x3fa   : > { %v1672_v60 = vadd.f32 %v4352_v14, %v1671_v41  ;;  %v1677_v41 = vand.u32 2147483647, %v5421_v8  ;;  %v1692_v8 = vand.u32 2147483647, %v1592_v61 }
 0x3fb   : > { %v4354_v58 = vpop.eup %4353 }
 0x3fc   : > { %v1684_v51 = vmul.f32 %v4354_v58, %v1592_v61  ;;  %vm1689_vm15 = vweird.f32 %v4354_v58  ;;  %v1676_v2 = vsel %vm5464_vm11, %v4352_v14, %v1672_v60  ;;  %vm1678_vm2 = vcmp.eq.f32.partialorder %v1677_v41, 8.507059e+37 }
 0x3fd   : > { %v1661_v14 = vsel %vm5479_vm5, %v5428_v19, %v1657_v39  ;;  %vm1690_vm8 = vmor %vm1688_vm10, %vm1689_vm15  ;;  %v1695_v60 = vor.u32 1.1754944e-38, %v1694_v47  ;;  %v1634_v61 = vand.u32 2147483648, %v5415_v4  ;;  %vm1693_vm11 = vcmp.eq.f32.partialorder %v1692_v8, 8.507059e+37  ;;  %v5576_v47 = vld [vmem:[%s4937_s17] sm:$0xff]  ;;  %s6168_s17 = sshll.u32 %s459_s29, 3 }
 0x3fe   : > { %v1685_v36 = vsub.f32 1.0, %v1684_v51  ;;  %v1680_v51 = vor.u32 1.1754944e-38, %v1679_v32  ;;  %v1646_v19 = vsel %vm5493_vm7, %v5430_v17, %v1642_v13  ;;  %v1666_v41 = vsel %vm1663_vm0, %v1665_v24, %v1661_v14  ;;  %v5549_v24 = vpop.permute.xlu2 %1707  ;;  %s461_s30 = scalar_lea.vmem [#allocation2], %s6168_s17 }
 0x3ff   : > { %v1617_v17 = vand.u32 2147483647, %v5408_v1  ;;  %v1635_v13 = vor.u32 1.1754944e-38, %v1634_v61  ;;  %v1620_v1 = vor.u32 1.1754944e-38, %v1619_v31  ;;  %s3879_s26 = sshll.u32 %s461_s30, 4  ;;  %s3880_s26 = int_to_ptr.vmem [resolvable:$true] %s3879_s26 }
 0x400   : > { %v1686_v27 = vmul.f32 %v4354_v58, %v1685_v36  ;;  %v1649_v36 = vand.u32 2147483648, %v5412_v5  ;;  %v1681_v32 = vsel %vm1678_vm2, %v1680_v51, %v1676_v2  ;;  %vm5506_vm2 = vmor %vm1628_vm6, %vm1629_vm4  ;;  %vm1598_vm4 = vweird.f32 %v5406_v59 }
 0x401   : > { %v1631_v29 = vsel %vm5506_vm2, %v5432_v53, %v1627_v12  ;;  %v1604_v12 = vand.u32 2147483648, %v5406_v59  ;;  %vm5529_vm6 = vmor %vm1613_vm14, %vm1614_vm9  ;;  %v1602_v2 = vand.u32 2147483647, %v5406_v59  ;;  %vm1618_vm9 = vcmp.eq.f32.partialorder %v1617_v17, 8.507059e+37  ;;  %v5591_v17 = vld [vmem:[%s6743_s8 + $0x8] sm:$0xf] }
 0x402   : > { %v1687_v0 = vadd.f32 %v4354_v58, %v1686_v27  ;;  %v1650_v39 = vor.u32 1.1754944e-38, %v1649_v36  ;;  %v1597_v27 = vadd.f32 %v5423_v40, %v5446_v63  ;;  %vm1600_vm12 = vmor %vm1598_vm4, %vm1599_vm13  ;;  %vm1779_vm13 = vcmask 457728  }
 0x403   : > { %v1605_v14 = vor.u32 1.1754944e-38, %v1604_v12  ;;  %vm1603_vm14 = vcmp.eq.f32.partialorder %v1602_v2, 8.507059e+37 }
 0x404   : > { %v1691_v43 = vsel %vm1690_vm8, %v4354_v58, %v1687_v0  ;;  %v1703_v0 = vmul.f32 %v1681_v32, %v5339_v33  ;;  %v1651_v23 = vsel %vm1648_vm3, %v1650_v39, %v1646_v19  ;;  %v6800_v33 = vand.u32 2147483647, %v5415_v4  ;;  %v807_v19 = vld [vmem:[%s6742_s7 + $0x78] sm:$0xff]  ;;  %v804_v39 = vld [vmem:[%s6742_s7 + $0x60] sm:$0xff] }
 0x405   : > { %v1696_v5 = vsel %vm1693_vm11, %v1695_v60, %v1691_v43  ;;  %v1701_v51 = vmul.f32 %v1651_v23, %v5325_v55  ;;  %v1601_v26 = vsel %vm1600_vm12, %v5423_v40, %v1597_v27  ;;  %v5545_v55 = vpop.permute.xlu0 %1712  ;;  %1838 = vmatpush.msrb.mxu2 %v807_v19  ;;  %v1846_v23 = vperm.slane %v5591_v17, 0 }
 0x406   : > { %v1704_v58 = vmul.f32 %v1696_v5, %v5346_v42  ;;  %v1702_v42 = vmul.f32 %v1666_v41, %v5331_v48  ;;  %vm1633_vm0 = vcmp.eq.f32.partialorder %v6800_v33, 8.507059e+37  ;;  %v1616_v48 = vsel %vm5529_vm6, %v5426_v20, %v1612_v22  ;;  %v810_v22 = vld [vmem:[%s6742_s7 + $0x90] sm:$0xff]  ;;  %v805_v5 = vld [vmem:[%s6742_s7 + $0x68] sm:$0xff]  ;;  %v517_v33 = vld [vmem:[%s484_s20] sm:$0xff]  ;;  %s4621_s20 = sshra.s32 %s3882_s23, 4  ;;  %s4622_s20 = int_to_ptr.hbm [resolvable:$true] %s4621_s20 }
 0x407   : > { %v1636_v63 = vsel %vm1633_vm0, %v1635_v13, %v1631_v29  ;;  %v1745_v4 = vmul.f32 %v5378_v7, %v1703_v0  ;;  %v1621_v3 = vsel %vm1618_vm9, %v1620_v1, %v1616_v48  ;;  %v1743_v20 = vmul.f32 %v5398_v9, %v1701_v51  ;;  %v809_v41 = vld [vmem:[%s6742_s7 + $0x88] sm:$0xff]  ;;  %v808_v0 = vld [vmem:[%s6742_s7 + $0x80] sm:$0xff]  ;;  %v814_v51 = vld [vmem:[%s6742_s7 + $0xb0] sm:$0xff]  ;;  %s4623_s14 = scalar_lea.hbm %s4622_s20, 8  ;;  %p4628_p0 = scmp.lt.s32.totalorder %s4622_s20, %s6746_s11 }
 0x408   : > { %v1746_v8 = vmul.f32 %v5386_v46, %v1704_v58  ;;  %v1744_v36 = vmul.f32 %v5388_v35, %v1702_v42  ;;  %v1700_v59 = vmul.f32 %v1636_v63, %v5314_v50  ;;  %v1606_v60 = vsel %vm1603_vm14, %v1605_v14, %v1601_v26  ;;  %v813_v1 = vld [vmem:[%s6742_s7 + $0xa8] sm:$0xff]  ;;  %v812_v26 = vld [vmem:[%s6742_s7 + $0xa0] sm:$0xff]  ;;  %p4624_p11 = scmp.ne.s32.totalorder %s4622_s20, %s4623_s14 }
 0x409   : > { %v1699_v32 = vmul.f32 %v1621_v3, %v5303_v62  ;;  %v1698_v61 = vmul.f32 %v1606_v60, %v5289_v49  ;;  %v806_v62 = vld [vmem:[%s6742_s7 + $0x70] sm:$0xff]  ;;  %v811_v49 = vld [vmem:[%s6742_s7 + $0x98] sm:$0xff]  ;;  %vm6803_vm3 = vcmask 64512  }
 0x40a   : > { %1792 = vmatpush.msra.mxu1 %v1746_v8  ;;  %v1742_v40 = vmul.f32 %v5396_v37, %v1700_v59  ;;  %1839 = vmatpush.msrb.mxu2 %v806_v62  ;;  %v1872_v62 = vperm.slane %v5591_v17, 2  ;;  %vm6804_vm0 = vmmov %vm6803_vm3  ;;  %p4625_p12 = pnand %p4624_p11, %p4776_p5 }
 0x40b   : > { %v1741_v50 = vmul.f32 %v5545_v55, %v1699_v32  ;;  %v1740_v43 = vmul.f32 %v5549_v24, %v1698_v61  ;;  %vm6805_vm4 = vmmov %vm6804_vm0 }
 0x40c   : > { %1793 = vmatpush.msra.mxu1 %v1745_v4  ;;  %1840 = vmatpush.msrb.mxu2 %v805_v5  ;;  %v815_v4 = vld [vmem:[%s6742_s7 + $0xb8] sm:$0xff]  ;;  %vm6806_vm6 = vmmov %vm6804_vm0  ;;  %p4626_p13 = pneg %p4625_p12 }
 0x40d   : > { %1909 = vmatpush.msrb.mxu3 %v815_v4  ;;  %v4096_v4 = vld [vmem:[%s6742_s7 + $0xf0] sm:$0xff]  ;;  %vm6807_vm12 = vmmov %vm6804_vm0 }
 0x40e   : > { %1794 = vmatpush.msra.mxu1 %v1744_v36  ;;  %1841 = vmatpush.msrb.mxu2 %v804_v39  ;;  %vm6808_vm9 = vmmov %vm6804_vm0 }
 0x40f   : > { %4087 = vmatmul.msk.f32.vlgmr.msrb.gmra.mxu2 %vm818_vm1, %v5576_v47  ;;  %1910 = vmatpush.msrb.mxu3 %v814_v51  ;;  %v4091_v51 = vld [vmem:[%s6742_s7 + $0xc8] sm:$0xff]  ;;  %vm6809_vm14 = vmmov %vm6804_vm0 }
 0x410   : > { %1795 = vmatpush.msra.mxu1 %v1743_v20 }
 0x411   : > { %1911 = vmatpush.msrb.mxu3 %v813_v1  ;;  %v4095_v1 = vld [vmem:[%s6742_s7 + $0xe8] sm:$0xff] }
 0x412   : > { %1796 = vmatpush.msra.mxu1 %v1742_v40 }
 0x413   : > { %1912 = vmatpush.msrb.mxu3 %v812_v26  ;;  %v4090_v26 = vld [vmem:[%s6742_s7 + $0xc0] sm:$0xff] }
 0x414   : > { %1797 = vmatpush.msra.mxu1 %v1741_v50  ;;  %v1870_v50 = vperm.slane %v5591_v17, 1 }
 0x416   : > { %1798 = vmatpush.msra.mxu1 %v1740_v43 }
 0x418   : > { %1818 = vmatpush.msrb.mxu1 %v811_v49 }
 0x41a   : > { %1819 = vmatpush.msrb.mxu1 %v810_v22 }
 0x41c   : > { %1820 = vmatpush.msrb.mxu1 %v809_v41 }
 0x41e   : > { %1821 = vmatpush.msrb.mxu1 %v808_v0 }
 0x444   : > { %v5580_v58 = vpop.trf.xlu1 }
 0x445   : > { %4085 = vmatmul.msk.f32.vlgmr.msra.gmra.mxu1 %vm1779_vm13, %v5580_v58 }
 0x492   : > { %v1843_v31 = vpop.f32.mrf.mxu2 }
 0x4c2   : > { %v1800_v29 = vpop.f32.mrf.mxu1 }
 0x4c3   : > { %4086 = vmatmul.msk.f32.vlgmr.msrb.gmra.mxu1 %vm818_vm1, %v1800_v29 }
 0x540   : > { %v1823_v13 = vpop.f32.mrf.mxu1 }
 0x541   : > { %v1844_v27 = vadd.f32 %v1843_v31, %v1823_v13 }
 0x543   : > { %v1847_v8 = vadd.f32 %v1846_v23, %v1844_v27 }
 0x545   : > { %v1848_v42 = vsel %vm818_vm1, %v1847_v8, 0.0 }
 0x546   : > { %1849 = vadd.xlane.f32.xlu0 %v1848_v42 }
 0x55a   : > { %1922 = vperm.xlu0 %4251, %v517_v33  }
 0x5b9   : > { %v1850_v12 = vpop.xlane.xlu0 %1849 }
 0x5ba   : > { %v1851_v53 = vmul.f32 %v1850_v12, %v5117_v54 }
 0x5bc   : > { %v1852_v63 = vsub.f32 %v1847_v8, %v1851_v53 }
 0x5be   : > { %v1853_v2 = vmul.f32 %v1852_v63, %v1852_v63 }
 0x5c0   : > { %v1854_v48 = vsel %vm818_vm1, %v1853_v2, 0.0  ;;  %v4097_v2 = vld [vmem:[%s6742_s7 + $0xf8] sm:$0xff] }
 0x5c1   : > { %1855 = vadd.xlane.f32.xlu2 %v1854_v48  ;;  %1989 = vmatpush.msra.mxu2 %v4097_v2  ;;  %v4092_v48 = vld [vmem:[%s6742_s7 + $0xd0] sm:$0xff] }
 0x5c3   : > { %1990 = vmatpush.msra.mxu2 %v4096_v4 }
 0x5c5   : > { %1991 = vmatpush.msra.mxu2 %v4095_v1 }
 0x634   : > { %v1856_v36 = vpop.xlane.xlu2 %1855 }
 0x635   : > { %v1857_v59 = vmul.f32 %v1856_v36, %v5117_v54  ;;  %v4094_v36 = vld [vmem:[%s6742_s7 + $0xe0] sm:$0xff] }
 0x636   : > { %1992 = vmatpush.msra.mxu2 %v4094_v36 }
 0x637   : > { %v1858_v14 = vadd.f32 1e-05, %v1857_v59  ;;  %v1918_v59 = vperm.slane %v5591_v17, 3 }
 0x639   : > { %4355 = vrsqrt.f32 %v1858_v14  ;;  %vm1865_vm5 = vweird.f32 %v1858_v14 }
 0x63f   : > { %v4356_v3 = vpop.eup %4355 }
 0x640   : > { %v1860_v20 = vmul.f32 %v4356_v3, %v1858_v14  ;;  %vm1866_vm15 = vweird.f32 %v4356_v3 }
 0x641   : > { %vm1867_vm10 = vmor %vm1865_vm5, %vm1866_vm15 }
 0x642   : > { %v1861_v60 = vmul.f32 %v4356_v3, %v1860_v20  ;;  %vm6810_vm15 = vmmov %vm6804_vm0 }
 0x643   : > { %vm6811_vm5 = vmmov %vm6804_vm0 }
 0x644   : > { %v1862_v32 = vmul.f32 0.5, %v1861_v60  ;;  %v5643_v60 = vpop.permute.xlu0 %1922 }
 0x646   : > { %v1863_v40 = vsub.f32 1.5, %v1862_v32 }
 0x648   : > { %v1864_v61 = vmul.f32 %v4356_v3, %v1863_v40 }
 0x64a   : > { %v1868_v43 = vsel %vm1867_vm10, %v4356_v3, %v1864_v61  ;;  %v4586_v61 = vld [vmem:[%s6780_s1 + $0x8] sm:$0xff]  ;;  %vm6812_vm10 = vmmov %vm6804_vm0 }
 0x64b   : > { %v1869_v19 = vmul.f32 %v1868_v43, %v1852_v63  ;;  %v4093_v63 = vld [vmem:[%s6742_s7 + $0xd8] sm:$0xff] }
 0x64c   : > { %1969 = vmatpush.msra.mxu1 %v4093_v63 }
 0x64d   : > { %v1871_v49 = vmul.f32 %v1870_v50, %v1869_v19 }
 0x64e   : > { %1970 = vmatpush.msra.mxu1 %v4092_v48 }
 0x64f   : > { %v1873_v22 = vadd.f32 %v1872_v62, %v1871_v49 }
 0x650   : > { %1971 = vmatpush.msra.mxu1 %v4091_v51 }
 0x651   : > { %v4088_v5 = vmul.f32 -1.442695, %v1873_v22 }
 0x652   : > { %1972 = vmatpush.msra.mxu1 %v4090_v26 }
 0x653   : > { %4357 = vpow2.f32 %v4088_v5 }
 0x659   : > { %v4358_v41 = vpop.eup %4357 }
 0x65a   : > { %v1877_v39 = vadd.f32 1.0, %v4358_v41 }
 0x65c   : > { %4359 = vrcp.f32 %v1877_v39  ;;  %v1889_v23 = vand.u32 2147483648, %v1877_v39  ;;  %v1887_v27 = vand.u32 2147483647, %v1877_v39  ;;  %vm1883_vm8 = vweird.f32 %v1877_v39 }
 0x65e   : > { %v1890_v42 = vor.u32 1.1754944e-38, %v1889_v23  ;;  %vm1888_vm2 = vcmp.eq.f32.partialorder %v1887_v27, 8.507059e+37 }
 0x662   : > { %v4360_v0 = vpop.eup %4359 }
 0x663   : > { %v1879_v29 = vmul.f32 %v4360_v0, %v1877_v39  ;;  %vm1884_vm7 = vweird.f32 %v4360_v0 }
 0x664   : > { %vm1885_vm11 = vmor %vm1883_vm8, %vm1884_vm7 }
 0x665   : > { %v1880_v31 = vsub.f32 1.0, %v1879_v29  ;;  %vm6813_vm7 = vmmov %vm6804_vm0 }
 0x666   : > { %vm6814_vm8 = vmmov %vm6804_vm0 }
 0x667   : > { %v1881_v13 = vmul.f32 %v4360_v0, %v1880_v31 }
 0x669   : > { %v1882_v8 = vadd.f32 %v4360_v0, %v1881_v13 }
 0x66b   : > { %v1886_v33 = vsel %vm1885_vm11, %v4360_v0, %v1882_v8  ;;  %vm6815_vm11 = vmmov %vm6804_vm0 }
 0x66c   : > { %v1891_v12 = vsel %vm1888_vm2, %v1890_v42, %v1886_v33  ;;  %vm6816_vm2 = vmmov %vm6804_vm0 }
 0x66d   : > { %v1893_v53 = vmul.f32 %v1891_v12, %v1873_v22 }
 0x66f   : > { %4089 = vmatmul.msk.f32.vlgmr.msrb.gmra.mxu3 %vm818_vm1, %v1893_v53 }
 0x6f2   : > { %v1914_v14 = vpop.f32.mrf.mxu3 }
 0x6f3   : > { %v1917_v3 = vadd.f32 %v5576_v47, %v1914_v14  ;;  %v4585_v47 = vld [vmem:[%s6780_s1] sm:$0xff] }
 0x6f5   : > { %v1919_v20 = vadd.f32 %v1918_v59, %v1917_v3 }
 0x6f7   : > { %v5646_v32 = vmul.f32 %v5643_v60, %v1919_v20 }
 0x6f9   : > { %4116 = vmatmul.msk.f32.vlgmr.msra.gmra.mxu1 %vm818_vm1, %v5646_v32  ;;  %4117 = vmatmul.msk.f32.vlgmr.msra.gmra.mxu2 %vm818_vm1, %v5646_v32 }
 0x776   : > { %v1974_v40 = vpop.f32.mrf.mxu1 }
 0x777   : > { %2050 = vmatpush.msrb.mxu1 %v1974_v40 }
 0x778   : > { %4125 = vmatmul.msk.f32.vlgmr.msrb.gmra.mxu1 %vm6803_vm3, %v5357_v52  ;;  %v4587_v52 = vld [vmem:[%s6780_s1 + $0x10] sm:$0xff] }
 0x77c   : > { %v1994_v17 = vpop.f32.mrf.mxu2 }
 0x77d   : > { %2012 = vmatpush.msra.mxu3 %v1994_v17 }
 0x77e   : > { %4118 = vmatmul.msk.f32.vlgmr.msra.gmra.mxu3 %vm6804_vm0, %v4585_v47 }
 0x780   : > { %4126 = vmatmul.msk.f32.gmra.mxu1 %vm6805_vm4, %v5363_v28  ;;  %v4588_v28 = vld [vmem:[%s6780_s1 + $0x18] sm:$0xff] }
 0x786   : > { %4119 = vmatmul.msk.f32.gmra.mxu3 %vm6806_vm6, %v4586_v61 }
 0x788   : > { %4127 = vmatmul.msk.f32.gmra.mxu1 %vm6807_vm12, %v5369_v25  ;;  %v4589_v25 = vld [vmem:[%s6780_s1 + $0x20] sm:$0xff] }
 0x78e   : > { %4120 = vmatmul.msk.f32.gmra.mxu3 %vm6808_vm9, %v4587_v52 }
 0x790   : > { %4128 = vmatmul.msk.f32.gmra.mxu1 %vm6809_vm14, %v5375_v38  ;;  %v4590_v38 = vld [vmem:[%s6780_s1 + $0x28] sm:$0xff] }
 0x796   : > { %4121 = vmatmul.msk.f32.gmra.mxu3 %vm6810_vm15, %v4588_v28 }
 0x798   : > { %4129 = vmatmul.msk.f32.gmra.mxu1 %vm6811_vm5, %v5383_v18  ;;  %v4591_v18 = vld [vmem:[%s6780_s1 + $0x30] sm:$0xff] }
 0x79e   : > { %4122 = vmatmul.msk.f32.gmra.mxu3 %vm6812_vm10, %v4589_v25 }
 0x7a0   : > { %4130 = vmatmul.msk.f32.gmra.mxu1 %vm6813_vm7, %v5393_v34  ;;  %v5697_v34 = vld [vmem:[%s6743_s8 + $0x10] sm:$0xff] }
 0x7a1   : > { %v5700_v43 = vperm.slane %v5697_v34, 0  ;;  %v5703_v49 = vperm.slane %v5697_v34, 1  ;;  %v5710_v39 = vperm.slane %v5697_v34, 2 }
 0x7a3   : > { %v2074_v22 = vmul.f32 %v5700_v43, %v5021_v11  ;;  %v2089_v5 = vmul.f32 %v5703_v49, %v5009_v6  ;;  %v2075_v27 = vmul.f32 %v5700_v43, %v5035_v21  ;;  %v2090_v42 = vmul.f32 %v5703_v49, %v5019_v10 }
 0x7a4   : > { %v2076_v48 = vmul.f32 %v5700_v43, %v5046_v30  ;;  %v2091_v1 = vmul.f32 %v5703_v49, %v5028_v16  ;;  %v2077_v20 = vmul.f32 %v5700_v43, %v5057_v44  ;;  %v2092_v17 = vmul.f32 %v5703_v49, %v5059_v45 }
 0x7a6   : > { %4123 = vmatmul.msk.f32.gmra.mxu3 %vm6814_vm8, %v4590_v38 }
 0x7a8   : > { %4131 = vmatmul.msk.f32.gmra.mxu1 %vm6815_vm11, %v5403_v15 }
 0x7ae   : > { %4124 = vmatmul.msk.f32.gmra.mxu3 %vm6816_vm2, %v4591_v18  ;;  %v2078_v18 = vmul.f32 %v5700_v43, %v5072_v57 }
 0x7f5   : > { %v2052_v50 = vpop.f32.mrf.mxu1 }
 0x7fd   : > { %v2055_v19 = vpop.f32.mrf.mxu1 }
 0x801   : > { %v2014_v62 = vpop.f32.mrf.mxu3 }
 0x802   : > { %v2053_v15 = vadd.f32 %v2052_v50, %v2014_v62 }
 0x804   : > { %v2081_v41 = vadd.f32 %v2074_v22, %v2053_v15 }
 0x805   : > { %v2058_v23 = vpop.f32.mrf.mxu1 }
 0x806   : > { %v2096_v0 = vadd.f32 %v2089_v5, %v2081_v41 }
 0x808   : > { %v2104_v29 = vadd.f32 %v5710_v39, %v2096_v0 }
 0x809   : > { %v2017_v31 = vpop.f32.mrf.mxu3 }
 0x80a   : > { %v2056_v13 = vadd.f32 %v2055_v19, %v2017_v31  ;;  %v2111_v8 = vsel %vm818_vm1, %v2104_v29, 0.0  ;;  %v2093_v19 = vmul.f32 %v5703_v49, %v5070_v56  ;;  %v6817_v31 = vld [vmem:[#allocation17_spill] sm:$0xff] }
 0x80b   : > { %2112 = vadd.xlane.f32.xlu2 %v2111_v8 }
 0x80c   : > { %v2082_v33 = vadd.f32 %v2075_v27, %v2056_v13  ;;  %v6818_v27 = vld [vmem:[#allocation16_spill] sm:$0xff] }
 0x80d   : > { %v2061_v51 = vpop.f32.mrf.mxu1  ;;  %v2094_v8 = vmul.f32 %v5703_v49, %v6818_v27 }
 0x80e   : > { %v2097_v12 = vadd.f32 %v2090_v42, %v2082_v33 }
 0x810   : > { %v2105_v53 = vadd.f32 %v5710_v39, %v2097_v12 }
 0x811   : > { %v2020_v63 = vpop.f32.mrf.mxu3 }
 0x812   : > { %v2059_v2 = vadd.f32 %v2058_v23, %v2020_v63  ;;  %v2114_v4 = vsel %vm818_vm1, %v2105_v53, 0.0  ;;  %v2079_v23 = vmul.f32 %v5700_v43, %v6817_v31 }
 0x813   : > { %2115 = vadd.xlane.f32.xlu2 %v2114_v4 }
 0x814   : > { %v2083_v26 = vadd.f32 %v2076_v48, %v2059_v2 }
 0x815   : > { %v2064_v61 = vpop.f32.mrf.mxu1 }
 0x816   : > { %v2098_v36 = vadd.f32 %v2091_v1, %v2083_v26  ;;  %v6819_v1 = vld [vmem:[#allocation18_spill] sm:$0xff] }
 0x817   : > { %v2080_v26 = vmul.f32 %v5700_v43, %v6819_v1 }
 0x818   : > { %v2106_v59 = vadd.f32 %v5710_v39, %v2098_v36 }
 0x819   : > { %v2023_v14 = vpop.f32.mrf.mxu3 }
 0x81a   : > { %v2062_v3 = vadd.f32 %v2061_v51, %v2023_v14  ;;  %v2117_v40 = vsel %vm818_vm1, %v2106_v59, 0.0 }
 0x81b   : > { %2118 = vadd.xlane.f32.xlu2 %v2117_v40 }
 0x81c   : > { %v2084_v47 = vadd.f32 %v2077_v20, %v2062_v3  ;;  %v6820_v20 = vld [vmem:[#allocation19_spill] sm:$0xff] }
 0x81d   : > { %v2067_v22 = vpop.f32.mrf.mxu1  ;;  %v2095_v40 = vmul.f32 %v5703_v49, %v6820_v20 }
 0x81e   : > { %v2099_v52 = vadd.f32 %v2092_v17, %v2084_v47 }
 0x820   : > { %v2107_v28 = vadd.f32 %v5710_v39, %v2099_v52 }
 0x821   : > { %v2026_v25 = vpop.f32.mrf.mxu3 }
 0x822   : > { %v2065_v38 = vadd.f32 %v2064_v61, %v2026_v25  ;;  %v2120_v50 = vsel %vm818_vm1, %v2107_v28, 0.0 }
 0x823   : > { %2121 = vadd.xlane.f32.xlu0 %v2120_v50 }
 0x824   : > { %v2085_v62 = vadd.f32 %v2078_v18, %v2065_v38 }
 0x825   : > { %v2070_v48 = vpop.f32.mrf.mxu1 }
 0x826   : > { %v2100_v15 = vadd.f32 %v2093_v19, %v2085_v62 }
 0x828   : > { %v2108_v5 = vadd.f32 %v5710_v39, %v2100_v15 }
 0x829   : > { %v2029_v41 = vpop.f32.mrf.mxu3 }
 0x82a   : > { %v2068_v0 = vadd.f32 %v2067_v22, %v2029_v41  ;;  %v2123_v13 = vsel %vm818_vm1, %v2108_v5, 0.0 }
 0x82b   : > { %2124 = vadd.xlane.f32.xlu2 %v2123_v13 }
 0x82c   : > { %v2086_v42 = vadd.f32 %v2079_v23, %v2068_v0 }
 0x82e   : > { %v2101_v33 = vadd.f32 %v2094_v8, %v2086_v42 }
 0x830   : > { %v2109_v12 = vadd.f32 %v5710_v39, %v2101_v33 }
 0x831   : > { %v2032_v2 = vpop.f32.mrf.mxu3 }
 0x832   : > { %v2126_v63 = vsel %vm818_vm1, %v2109_v12, 0.0  ;;  %v2071_v4 = vadd.f32 %v2070_v48, %v2032_v2 }
 0x833   : > { %2127 = vadd.xlane.f32.xlu2 %v2126_v63 }
 0x834   : > { %v2087_v14 = vadd.f32 %v2080_v26, %v2071_v4 }
 0x836   : > { %v2102_v61 = vadd.f32 %v2095_v40, %v2087_v14 }
 0x838   : > { %v2110_v43 = vadd.f32 %v5710_v39, %v2102_v61 }
 0x83a   : > { %v2129_v18 = vsel %vm818_vm1, %v2110_v43, 0.0 }
 0x87e   : > { %v2113_v51 = vpop.xlane.xlu2 %2112 }
 0x87f   : > { %v2132_v36 = vmul.f32 %v2113_v51, %v5117_v54 }
 0x881   : > { %v5747_v3 = vsub.f32 %v2104_v29, %v2132_v36 }
 0x883   : > { %v2146_v17 = vmul.f32 %v5747_v3, %v5747_v3 }
 0x885   : > { %v2153_v47 = vsel %vm818_vm1, %v2146_v17, 0.0 }
 0x886   : > { %2154 = vadd.xlane.f32.xlu2 %v2153_v47  ;;  %v2116_v52 = vpop.xlane.xlu2 %2115 }
 0x887   : > { %v2133_v25 = vmul.f32 %v2116_v52, %v5117_v54 }
 0x889   : > { %v5755_v38 = vsub.f32 %v2105_v53, %v2133_v25 }
 0x88b   : > { %v2147_v29 = vmul.f32 %v5755_v38, %v5755_v38 }
 0x88d   : > { %v2156_v49 = vsel %vm818_vm1, %v2147_v29, 0.0 }
 0x88e   : > { %2130 = vadd.xlane.f32.xlu2 %v2129_v18  ;;  %2157 = vadd.xlane.f32.xlu1 %v2156_v49  ;;  %v2119_v50 = vpop.xlane.xlu2 %2118 }
 0x88f   : > { %v2134_v19 = vmul.f32 %v2119_v50, %v5117_v54 }
 0x891   : > { %v5763_v62 = vsub.f32 %v2106_v59, %v2134_v19 }
 0x893   : > { %v2148_v53 = vmul.f32 %v5763_v62, %v5763_v62 }
 0x895   : > { %v2159_v15 = vsel %vm818_vm1, %v2148_v53, 0.0 }
 0x896   : > { %v2122_v39 = vpop.xlane.xlu0 %2121  ;;  %2160 = vadd.xlane.f32.xlu2 %v2159_v15 }
 0x897   : > { %v2135_v22 = vmul.f32 %v2122_v39, %v5117_v54 }
 0x899   : > { %v5769_v41 = vsub.f32 %v2107_v28, %v2135_v22 }
 0x89b   : > { %v2149_v0 = vmul.f32 %v5769_v41, %v5769_v41 }
 0x89d   : > { %v2162_v23 = vsel %vm818_vm1, %v2149_v0, 0.0  ;;  %v5796_v0 = vperm.slane %v5697_v34, 3 }
 0x89e   : > { %2163 = vadd.xlane.f32.xlu0 %v2162_v23  ;;  %v2125_v13 = vpop.xlane.xlu2 %2124  ;;  %v4101_v23 = vld [vmem:[%s6742_s7 + $0x118] sm:$0xff] }
 0x89f   : > { %v2136_v59 = vmul.f32 %v2125_v13, %v5117_v54  ;;  %2455 = vmatpush.msrb.mxu2 %v4101_v23 }
 0x8a1   : > { %v5775_v8 = vsub.f32 %v2108_v5, %v2136_v59 }
 0x8a3   : > { %v2150_v42 = vmul.f32 %v5775_v8, %v5775_v8 }
 0x8a5   : > { %v2165_v33 = vsel %vm818_vm1, %v2150_v42, 0.0  ;;  %v5802_v42 = vperm.slane %v5697_v34, 4 }
 0x8a6   : > { %2166 = vadd.xlane.f32.xlu2 %v2165_v33  ;;  %v2128_v63 = vpop.xlane.xlu2 %2127 }
 0x8a7   : > { %v2137_v28 = vmul.f32 %v2128_v63, %v5117_v54  ;;  %v4100_v63 = vld [vmem:[%s6742_s7 + $0x110] sm:$0xff] }
 0x8a8   : > { %2456 = vmatpush.msrb.mxu2 %v4100_v63 }
 0x8a9   : > { %v5781_v2 = vsub.f32 %v2109_v12, %v2137_v28 }
 0x8ab   : > { %v2151_v48 = vmul.f32 %v5781_v2, %v5781_v2 }
 0x8ad   : > { %v2168_v4 = vsel %vm818_vm1, %v2151_v48, 0.0 }
 0x8ae   : > { %2169 = vadd.xlane.f32.xlu0 %v2168_v4 }
 0x8f9   : > { %v2155_v51 = vpop.xlane.xlu2 %2154 }
 0x8fa   : > { %v2174_v5 = vmul.f32 %v2155_v51, %v5117_v54 }
 0x8fc   : > { %v2181_v26 = vadd.f32 1e-05, %v2174_v5  ;;  %v4099_v5 = vld [vmem:[%s6742_s7 + $0x108] sm:$0xff] }
 0x8fd   : > { %2457 = vmatpush.msrb.mxu2 %v4099_v5 }
 0x8fe   : > { %4361 = vrsqrt.f32 %v2181_v26  ;;  %vm2194_vm0 = vweird.f32 %v2181_v26 }
 0x901   : > { %v2158_v36 = vpop.xlane.xlu1 %2157  ;;  %v2131_v14 = vpop.xlane.xlu2 %2130 }
 0x902   : > { %v2175_v40 = vmul.f32 %v2158_v36, %v5117_v54  ;;  %v2138_v17 = vmul.f32 %v2131_v14, %v5117_v54 }
 0x904   : > { %v4362_v47 = vpop.eup %4361  ;;  %v2182_v12 = vadd.f32 1e-05, %v2175_v40  ;;  %v5789_v61 = vsub.f32 %v2110_v43, %v2138_v17  ;;  %v4098_v40 = vld [vmem:[%s6742_s7 + $0x100] sm:$0xff] }
 0x905   : > { %v2189_v52 = vmul.f32 %v4362_v47, %v2181_v26  ;;  %vm2195_vm3 = vweird.f32 %v4362_v47  ;;  %2458 = vmatpush.msrb.mxu2 %v4098_v40 }
 0x906   : > { %4363 = vrsqrt.f32 %v2182_v12  ;;  %v2152_v25 = vmul.f32 %v5789_v61, %v5789_v61  ;;  %vm2196_vm4 = vmor %vm2194_vm0, %vm2195_vm3  ;;  %vm2204_vm12 = vweird.f32 %v2182_v12 }
 0x907   : > { %v2190_v29 = vmul.f32 %v4362_v47, %v2189_v52 }
 0x908   : > { %v2171_v18 = vsel %vm818_vm1, %v2152_v25, 0.0 }
 0x909   : > { %v2191_v49 = vmul.f32 0.5, %v2190_v29  ;;  %2172 = vadd.xlane.f32.xlu2 %v2171_v18  ;;  %v2161_v50 = vpop.xlane.xlu2 %2160 }
 0x90a   : > { %v2176_v19 = vmul.f32 %v2161_v50, %v5117_v54 }
 0x90b   : > { %v2192_v53 = vsub.f32 1.5, %v2191_v49 }
 0x90c   : > { %v4364_v15 = vpop.eup %4363  ;;  %v2183_v39 = vadd.f32 1e-05, %v2176_v19 }
 0x90d   : > { %v2193_v22 = vmul.f32 %v4362_v47, %v2192_v53  ;;  %v2199_v43 = vmul.f32 %v4364_v15, %v2182_v12  ;;  %vm2205_vm6 = vweird.f32 %v4364_v15 }
 0x90e   : > { %4365 = vrsqrt.f32 %v2183_v39  ;;  %vm2206_vm9 = vmor %vm2204_vm12, %vm2205_vm6  ;;  %vm2214_vm15 = vweird.f32 %v2183_v39 }
 0x90f   : > { %v2197_v13 = vsel %vm2196_vm4, %v4362_v47, %v2193_v22  ;;  %v2200_v59 = vmul.f32 %v4364_v15, %v2199_v43 }
 0x910   : > { %v2258_v33 = vmul.f32 %v2197_v13, %v5747_v3 }
 0x911   : > { %v2201_v28 = vmul.f32 0.5, %v2200_v59  ;;  %v2164_v48 = vpop.xlane.xlu0 %2163 }
 0x912   : > { %v2266_v4 = vmul.f32 %v5796_v0, %v2258_v33  ;;  %v2177_v51 = vmul.f32 %v2164_v48, %v5117_v54 }
 0x913   : > { %v2202_v26 = vsub.f32 1.5, %v2201_v28 }
 0x914   : > { %v4366_v36 = vpop.eup %4365  ;;  %v5814_v3 = vadd.f32 %v5802_v42, %v2266_v4  ;;  %v2184_v14 = vadd.f32 1e-05, %v2177_v51 }
 0x915   : > { %v2203_v17 = vmul.f32 %v4364_v15, %v2202_v26  ;;  %v2209_v47 = vmul.f32 %v4366_v36, %v2183_v39  ;;  %vm2215_vm14 = vweird.f32 %v4366_v36 }
 0x916   : > { %v4132_v52 = vmul.f32 -1.442695, %v5814_v3  ;;  %4367 = vrsqrt.f32 %v2184_v14  ;;  %vm2216_vm5 = vmor %vm2214_vm15, %vm2215_vm14  ;;  %vm2224_vm7 = vweird.f32 %v2184_v14 }
 0x917   : > { %v2207_v25 = vsel %vm2206_vm9, %v4364_v15, %v2203_v17  ;;  %v2210_v29 = vmul.f32 %v4366_v36, %v2209_v47 }
 0x918   : > { %4369 = vpow2.f32 %v4132_v52  ;;  %v2259_v18 = vmul.f32 %v2207_v25, %v5755_v38 }
 0x919   : > { %v2211_v49 = vmul.f32 0.5, %v2210_v29  ;;  %v2167_v50 = vpop.xlane.xlu2 %2166 }
 0x91a   : > { %v2178_v19 = vmul.f32 %v2167_v50, %v5117_v54  ;;  %v2267_v53 = vmul.f32 %v5796_v0, %v2259_v18 }
 0x91b   : > { %v2212_v22 = vsub.f32 1.5, %v2211_v49 }
 0x91c   : > { %v4368_v12 = vpop.eup %4367  ;;  %v2185_v43 = vadd.f32 1e-05, %v2178_v19  ;;  %v5824_v23 = vadd.f32 %v5802_v42, %v2267_v53 }
 0x91d   : > { %v2213_v13 = vmul.f32 %v4366_v36, %v2212_v22  ;;  %v2219_v15 = vmul.f32 %v4368_v12, %v2184_v14  ;;  %vm2225_vm10 = vweird.f32 %v4368_v12 }
 0x91e   : > { %v4370_v59 = vpop.eup %4369  ;;  %4371 = vrsqrt.f32 %v2185_v43  ;;  %v4133_v38 = vmul.f32 -1.442695, %v5824_v23  ;;  %vm2226_vm8 = vmor %vm2224_vm7, %vm2225_vm10  ;;  %vm2234_vm3 = vweird.f32 %v2185_v43 }
 0x91f   : > { %v2302_v33 = vadd.f32 1.0, %v4370_v59  ;;  %v2217_v63 = vsel %vm2216_vm5, %v4366_v36, %v2213_v13  ;;  %v2220_v28 = vmul.f32 %v4368_v12, %v2219_v15 }
 0x920   : > { %v2260_v48 = vmul.f32 %v2217_v63, %v5763_v62  ;;  %4373 = vpow2.f32 %v4133_v38 }
 0x921   : > { %4375 = vrcp.f32 %v2302_v33  ;;  %v2221_v4 = vmul.f32 0.5, %v2220_v28  ;;  %v2170_v51 = vpop.xlane.xlu0 %2169  ;;  %v2320_v15 = vand.u32 2147483648, %v2302_v33  ;;  %v2318_v28 = vand.u32 2147483647, %v2302_v33 }
 0x922   : > { %v2179_v5 = vmul.f32 %v2170_v51, %v5117_v54  ;;  %v2268_v26 = vmul.f32 %v5796_v0, %v2260_v48  ;;  %vm2314_vm4 = vweird.f32 %v2302_v33 }
 0x923   : > { %v2222_v39 = vsub.f32 1.5, %v2221_v4  ;;  %vm2319_vm12 = vcmp.eq.f32.partialorder %v2318_v28, 8.507059e+37 }
 0x924   : > { %v4372_v40 = vpop.eup %4371  ;;  %v5830_v17 = vadd.f32 1e-05, %v2179_v5  ;;  %v5833_v47 = vadd.f32 %v5802_v42, %v2268_v26  ;;  %v2321_v5 = vor.u32 1.1754944e-38, %v2320_v15 }
 0x925   : > { %v2223_v36 = vmul.f32 %v4368_v12, %v2222_v39  ;;  %v2229_v52 = vmul.f32 %v4372_v40, %v2185_v43  ;;  %vm2235_vm11 = vweird.f32 %v4372_v40 }
 0x926   : > { %v4374_v62 = vpop.eup %4373  ;;  %4377 = vrsqrt.f32 %v5830_v17  ;;  %v4134_v25 = vmul.f32 -1.442695, %v5833_v47  ;;  %vm2236_vm0 = vmor %vm2234_vm3, %vm2235_vm11  ;;  %vm2244_vm15 = vweird.f32 %v5830_v17 }
 0x927   : > { %v4376_v29 = vpop.eup %4375  ;;  %v2227_v18 = vsel %vm2226_vm8, %v4368_v12, %v2223_v36  ;;  %v2230_v49 = vmul.f32 %v4372_v40, %v2229_v52  ;;  %v2303_v50 = vadd.f32 1.0, %v4374_v62 }
 0x928   : > { %v2261_v19 = vmul.f32 %v2227_v18, %v5769_v41  ;;  %v2310_v53 = vmul.f32 %v4376_v29, %v2302_v33  ;;  %4379 = vpow2.f32 %v4134_v25  ;;  %vm2315_vm2 = vweird.f32 %v4376_v29 }
 0x929   : > { %v2231_v22 = vmul.f32 0.5, %v2230_v49  ;;  %4381 = vrcp.f32 %v2303_v50  ;;  %vm2316_vm6 = vmor %vm2314_vm4, %vm2315_vm2  ;;  %v2335_v33 = vand.u32 2147483648, %v2303_v50  ;;  %vm2329_vm10 = vweird.f32 %v2303_v50 }
 0x92a   : > { %v2311_v13 = vsub.f32 1.0, %v2310_v53  ;;  %v2269_v14 = vmul.f32 %v5796_v0, %v2261_v19 }
 0x92b   : > { %v2232_v59 = vsub.f32 1.5, %v2231_v22  ;;  %v2336_v28 = vor.u32 1.1754944e-38, %v2335_v33 }
 0x92c   : > { %v4378_v38 = vpop.eup %4377  ;;  %v2312_v63 = vmul.f32 %v4376_v29, %v2311_v13  ;;  %v5840_v12 = vadd.f32 %v5802_v42, %v2269_v14 }
 0x92d   : > { %v2233_v48 = vmul.f32 %v4372_v40, %v2232_v59  ;;  %v2239_v41 = vmul.f32 %v4378_v38, %v5830_v17  ;;  %vm2245_vm9 = vweird.f32 %v4378_v38 }
 0x92e   : > { %v4380_v4 = vpop.eup %4379  ;;  %v2313_v51 = vadd.f32 %v4376_v29, %v2312_v63  ;;  %v4135_v62 = vmul.f32 -1.442695, %v5840_v12  ;;  %vm2246_vm5 = vmor %vm2244_vm15, %vm2245_vm9 }
 0x92f   : > { %v4382_v26 = vpop.eup %4381  ;;  %v2237_v39 = vsel %vm2236_vm0, %v4372_v40, %v2233_v48  ;;  %v2240_v36 = vmul.f32 %v4378_v38, %v2239_v41  ;;  %v2304_v52 = vadd.f32 1.0, %v4380_v4 }
 0x930   : > { %v2262_v25 = vmul.f32 %v2237_v39, %v5775_v8  ;;  %v2317_v18 = vsel %vm2316_vm6, %v4376_v29, %v2313_v51  ;;  %v2325_v49 = vmul.f32 %v4382_v26, %v2303_v50  ;;  %vm2330_vm14 = vweird.f32 %v4382_v26 }
 0x931   : > { %v2241_v43 = vmul.f32 0.5, %v2240_v36  ;;  %v2322_v19 = vsel %vm2319_vm12, %v2321_v5, %v2317_v18  ;;  %4383 = vrcp.f32 %v2304_v52  ;;  %v2333_v8 = vand.u32 2147483647, %v2303_v50  ;;  %vm2331_vm7 = vmor %vm2329_vm10, %vm2330_vm14 }
 0x932   : > { %v2414_v53 = vmul.f32 %v2322_v19, %v5814_v3  ;;  %v2326_v22 = vsub.f32 1.0, %v2325_v49  ;;  %4385 = vpow2.f32 %v4135_v62  ;;  %v2270_v40 = vmul.f32 %v5796_v0, %v2262_v25 }
 0x933   : > { %v2242_v13 = vsub.f32 1.5, %v2241_v43  ;;  %vm2334_vm8 = vcmp.eq.f32.partialorder %v2333_v8, 8.507059e+37  ;;  %v2350_v25 = vand.u32 2147483648, %v2304_v52  ;;  %v2348_v18 = vand.u32 2147483647, %v2304_v52 }
 0x934   : > { %4139 = vmatmul.msk.f32.vlgmr.msrb.gmra.mxu2 %vm818_vm1, %v2414_v53  ;;  %v2327_v15 = vmul.f32 %v4382_v26, %v2326_v22  ;;  %v5850_v14 = vadd.f32 %v5802_v42, %v2270_v40  ;;  %vm2344_vm2 = vweird.f32 %v2304_v52 }
 0x935   : > { %v2243_v29 = vmul.f32 %v4378_v38, %v2242_v13  ;;  %v2351_v43 = vor.u32 1.1754944e-38, %v2350_v25  ;;  %vm2349_vm0 = vcmp.eq.f32.partialorder %v2348_v18, 8.507059e+37 }
 0x936   : > { %v2328_v3 = vadd.f32 %v4382_v26, %v2327_v15  ;;  %v4136_v48 = vmul.f32 -1.442695, %v5850_v14 }
 0x937   : > { %v4384_v59 = vpop.eup %4383  ;;  %v2247_v63 = vsel %vm2246_vm5, %v4378_v38, %v2243_v29 }
 0x938   : > { %v2263_v41 = vmul.f32 %v2247_v63, %v5781_v2  ;;  %v2332_v4 = vsel %vm2331_vm7, %v4382_v26, %v2328_v3  ;;  %v2340_v51 = vmul.f32 %v4384_v59, %v2304_v52  ;;  %v4386_v5 = vpop.eup %4385  ;;  %4387 = vpow2.f32 %v4136_v48 }
 0x939   : > { %v2337_v39 = vsel %vm2334_vm8, %v2336_v28, %v2332_v4  ;;  %v2305_v62 = vadd.f32 1.0, %v4386_v5  ;;  %vm2345_vm11 = vweird.f32 %v4384_v59 }
 0x93a   : > { %v2415_v17 = vmul.f32 %v2337_v39, %v5824_v23  ;;  %v2341_v36 = vsub.f32 1.0, %v2340_v51  ;;  %v2271_v50 = vmul.f32 %v5796_v0, %v2263_v41  ;;  %vm2346_vm3 = vmor %vm2344_vm2, %vm2345_vm11 }
 0x93b   : > { %4389 = vrcp.f32 %v2305_v62  ;;  %v2365_v8 = vand.u32 2147483648, %v2305_v62  ;;  %v2363_v3 = vand.u32 2147483647, %v2305_v62  ;;  %vm2359_vm6 = vweird.f32 %v2305_v62 }
 0x93c   : > { %4140 = vmatmul.msk.f32.gmra.mxu2 %vm818_vm1, %v2415_v17  ;;  %v2342_v38 = vmul.f32 %v4384_v59, %v2341_v36  ;;  %v5858_v2 = vadd.f32 %v5802_v42, %v2271_v50 }
 0x93d   : > { %v2366_v41 = vor.u32 1.1754944e-38, %v2365_v8  ;;  %vm2364_vm9 = vcmp.eq.f32.partialorder %v2363_v3, 8.507059e+37 }
 0x93e   : > { %v2343_v26 = vadd.f32 %v4384_v59, %v2342_v38  ;;  %v4388_v49 = vpop.eup %4387  ;;  %v4137_v23 = vmul.f32 -1.442695, %v5858_v2 }
 0x93f   : > { %v2306_v53 = vadd.f32 1.0, %v4388_v49 }
 0x940   : > { %v2347_v19 = vsel %vm2346_vm3, %v4384_v59, %v2343_v26  ;;  %4391 = vpow2.f32 %v4137_v23 }
 0x941   : > { %v2352_v22 = vsel %vm2349_vm0, %v2351_v43, %v2347_v19  ;;  %v4390_v33 = vpop.eup %4389  ;;  %4393 = vrcp.f32 %v2306_v53  ;;  %v2380_v5 = vand.u32 2147483648, %v2306_v53  ;;  %v2378_v36 = vand.u32 2147483647, %v2306_v53 }
 0x942   : > { %v2416_v13 = vmul.f32 %v2352_v22, %v5833_v47  ;;  %v2355_v40 = vmul.f32 %v4390_v33, %v2305_v62  ;;  %vm2360_vm4 = vweird.f32 %v4390_v33  ;;  %vm2374_vm15 = vweird.f32 %v2306_v53 }
 0x943   : > { %vm2361_vm12 = vmor %vm2359_vm6, %vm2360_vm4  ;;  %v2381_v62 = vor.u32 1.1754944e-38, %v2380_v5  ;;  %vm2379_vm10 = vcmp.eq.f32.partialorder %v2378_v36, 8.507059e+37 }
 0x944   : > { %4141 = vmatmul.msk.f32.gmra.mxu2 %vm818_vm1, %v2416_v13  ;;  %v2356_v15 = vsub.f32 1.0, %v2355_v40 }
 0x946   : > { %v4392_v52 = vpop.eup %4391  ;;  %v2357_v29 = vmul.f32 %v4390_v33, %v2356_v15 }
 0x947   : > { %v4394_v63 = vpop.eup %4393  ;;  %v2307_v28 = vadd.f32 1.0, %v4392_v52 }
 0x948   : > { %v2358_v59 = vadd.f32 %v4390_v33, %v2357_v29  ;;  %v2370_v48 = vmul.f32 %v4394_v63, %v2306_v53  ;;  %vm2375_vm14 = vweird.f32 %v4394_v63 }
 0x949   : > { %4395 = vrcp.f32 %v2307_v28  ;;  %vm2376_vm5 = vmor %vm2374_vm15, %vm2375_vm14  ;;  %v2395_v23 = vand.u32 2147483648, %v2307_v28  ;;  %vm2389_vm8 = vweird.f32 %v2307_v28 }
 0x94a   : > { %v2362_v4 = vsel %vm2361_vm12, %v4390_v33, %v2358_v59  ;;  %v2371_v47 = vsub.f32 1.0, %v2370_v48 }
 0x94b   : > { %v2367_v51 = vsel %vm2364_vm9, %v2366_v41, %v2362_v4  ;;  %v2396_v53 = vor.u32 1.1754944e-38, %v2395_v23  ;;  %v5879_v23 = vperm.slane %v5697_v34, 5 }
 0x94c   : > { %v2417_v39 = vmul.f32 %v2367_v51, %v5840_v12  ;;  %v2372_v17 = vmul.f32 %v4394_v63, %v2371_v47  ;;  %v2393_v12 = vand.u32 2147483647, %v2307_v28 }
 0x94e   : > { %4142 = vmatmul.msk.f32.gmra.mxu2 %vm818_vm1, %v2417_v39  ;;  %v2373_v50 = vadd.f32 %v4394_v63, %v2372_v17  ;;  %vm2394_vm2 = vcmp.eq.f32.partialorder %v2393_v12, 8.507059e+37 }
 0x94f   : > { %v4396_v25 = vpop.eup %4395 }
 0x950   : > { %v2377_v38 = vsel %vm2376_vm5, %v4394_v63, %v2373_v50  ;;  %v2385_v18 = vmul.f32 %v4396_v25, %v2307_v28  ;;  %vm2390_vm7 = vweird.f32 %v4396_v25 }
 0x951   : > { %v2382_v26 = vsel %vm2379_vm10, %v2381_v62, %v2377_v38  ;;  %vm2391_vm11 = vmor %vm2389_vm8, %vm2390_vm7 }
 0x952   : > { %v2418_v49 = vmul.f32 %v2382_v26, %v5850_v14  ;;  %v2386_v43 = vsub.f32 1.0, %v2385_v18 }
 0x954   : > { %v2387_v19 = vmul.f32 %v4396_v25, %v2386_v43 }
 0x956   : > { %4143 = vmatmul.msk.f32.gmra.mxu2 %vm818_vm1, %v2418_v49  ;;  %v2388_v22 = vadd.f32 %v4396_v25, %v2387_v19 }
 0x958   : > { %v2392_v33 = vsel %vm2391_vm11, %v4396_v25, %v2388_v22 }
 0x959   : > { %v2397_v13 = vsel %vm2394_vm2, %v2396_v53, %v2392_v33 }
 0x95a   : > { %v2419_v40 = vmul.f32 %v2397_v13, %v5858_v2 }
 0x95e   : > { %4144 = vmatmul.msk.f32.gmra.mxu2 %vm818_vm1, %v2419_v40 }
 0x97c   : > { %v2173_v15 = vpop.xlane.xlu2 %2172 }
 0x97d   : > { %v2180_v14 = vmul.f32 %v2173_v15, %v5117_v54 }
 0x97f   : > { %v2187_v8 = vadd.f32 1e-05, %v2180_v14 }
 0x981   : > { %4397 = vrsqrt.f32 %v2187_v8  ;;  %vm2254_vm0 = vweird.f32 %v2187_v8 }
 0x987   : > { %v4398_v52 = vpop.eup %4397 }
 0x988   : > { %v2249_v29 = vmul.f32 %v4398_v52, %v2187_v8  ;;  %vm2255_vm3 = vweird.f32 %v4398_v52 }
 0x989   : > { %vm2256_vm4 = vmor %vm2254_vm0, %vm2255_vm3 }
 0x98a   : > { %v2250_v3 = vmul.f32 %v4398_v52, %v2249_v29 }
 0x98c   : > { %v2251_v63 = vmul.f32 0.5, %v2250_v3 }
 0x98e   : > { %v2252_v59 = vsub.f32 1.5, %v2251_v63 }
 0x990   : > { %v2253_v28 = vmul.f32 %v4398_v52, %v2252_v59 }
 0x992   : > { %v2257_v48 = vsel %vm2256_vm4, %v4398_v52, %v2253_v28 }
 0x993   : > { %v2264_v41 = vmul.f32 %v2257_v48, %v5789_v61 }
 0x995   : > { %v2272_v2 = vmul.f32 %v5796_v0, %v2264_v41 }
 0x997   : > { %v2280_v4 = vadd.f32 %v5802_v42, %v2272_v2 }
 0x999   : > { %v4138_v47 = vmul.f32 -1.442695, %v2280_v4 }
 0x99b   : > { %4399 = vpow2.f32 %v4138_v47 }
 0x9a1   : > { %v4400_v51 = vpop.eup %4399 }
 0x9a2   : > { %v2308_v5 = vadd.f32 1.0, %v4400_v51 }
 0x9a4   : > { %4401 = vrcp.f32 %v2308_v5  ;;  %v2410_v50 = vand.u32 2147483648, %v2308_v5  ;;  %v2408_v62 = vand.u32 2147483647, %v2308_v5  ;;  %vm2404_vm12 = vweird.f32 %v2308_v5 }
 0x9a6   : > { %v2411_v61 = vor.u32 1.1754944e-38, %v2410_v50  ;;  %vm2409_vm14 = vcmp.eq.f32.partialorder %v2408_v62, 8.507059e+37 }
 0x9aa   : > { %v4402_v39 = vpop.eup %4401 }
 0x9ab   : > { %v2400_v17 = vmul.f32 %v4402_v39, %v2308_v5  ;;  %vm2405_vm6 = vweird.f32 %v4402_v39 }
 0x9ac   : > { %vm2406_vm9 = vmor %vm2404_vm12, %vm2405_vm6 }
 0x9ad   : > { %v2401_v36 = vsub.f32 1.0, %v2400_v17 }
 0x9af   : > { %v2402_v25 = vmul.f32 %v4402_v39, %v2401_v36 }
 0x9b1   : > { %v2403_v38 = vadd.f32 %v4402_v39, %v2402_v25 }
 0x9b3   : > { %v2407_v18 = vsel %vm2406_vm9, %v4402_v39, %v2403_v38 }
 0x9b4   : > { %v2412_v0 = vsel %vm2409_vm14, %v2411_v61, %v2407_v18 }
 0x9b5   : > { %v2420_v42 = vmul.f32 %v2412_v0, %v2280_v4 }
 0x9b7   : > { %v5873_v26 = vpop.f32.mrf.mxu2  ;;  %4145 = vmatmul.msk.f32.gmra.mxu2 %vm818_vm1, %v2420_v42 }
 0x9bf   : > { %v2463_v49 = vpop.f32.mrf.mxu2 }
 0x9c0   : > { %v5882_v19 = vadd.f32 %v2463_v49, %v5879_v23 }
 0x9c2   : > { %v4147_v22 = vmul.f32 -1.442695, %v5882_v19 }
 0x9c4   : > { %4403 = vpow2.f32 %v4147_v22 }
 0x9c7   : > { %v5876_v43 = vpop.f32.mrf.mxu2 }
 0x9ca   : > { %v4404_v15 = vpop.eup %4403 }
 0x9cb   : > { %v5887_v29 = vadd.f32 1.0, %v4404_v15 }
 0x9cd   : > { %vm2529_vm4 = vweird.f32 %v5887_v29 }
 0x9d1   : > { %v2469_v12 = vpop.f32.mrf.mxu2 }
 0x9d2   : > { %v2470_v53 = vadd.f32 %v2469_v12, %v5879_v23 }
 0x9d4   : > { %v4149_v33 = vmul.f32 -1.442695, %v2470_v53 }
 0x9d6   : > { %4405 = vpow2.f32 %v4149_v33  ;;  %v5901_v33 = vperm.slane %v5697_v34, 6 }
 0x9d9   : > { %v2472_v13 = vpop.f32.mrf.mxu2 }
 0x9da   : > { %v2473_v40 = vadd.f32 %v2472_v13, %v5879_v23 }
 0x9dc   : > { %v4150_v14 = vmul.f32 -1.442695, %v2473_v40  ;;  %v4406_v8 = vpop.eup %4405 }
 0x9dd   : > { %v2505_v52 = vadd.f32 1.0, %v4406_v8  ;;  %v5906_v8 = vperm.slane %v5697_v34, 7 }
 0x9de   : > { %4407 = vpow2.f32 %v4150_v14 }
 0x9df   : > { %4409 = vrcp.f32 %v2505_v52  ;;  %v2565_v51 = vand.u32 2147483648, %v2505_v52  ;;  %v2563_v39 = vand.u32 2147483647, %v2505_v52  ;;  %vm2559_vm5 = vweird.f32 %v2505_v52 }
 0x9e0   : > { %4411 = vrcp.f32 %v5887_v29 }
 0x9e1   : > { %v2475_v3 = vpop.f32.mrf.mxu2  ;;  %v2566_v38 = vor.u32 1.1754944e-38, %v2565_v51  ;;  %vm2564_vm7 = vcmp.eq.f32.partialorder %v2563_v39, 8.507059e+37 }
 0x9e2   : > { %v5890_v63 = vadd.f32 %v2475_v3, %v5879_v23 }
 0x9e4   : > { %v4408_v59 = vpop.eup %4407  ;;  %v4151_v28 = vmul.f32 -1.442695, %v5890_v63 }
 0x9e5   : > { %v2506_v48 = vadd.f32 1.0, %v4408_v59  ;;  %v4410_v41 = vpop.eup %4409 }
 0x9e6   : > { %4413 = vpow2.f32 %v4151_v28  ;;  %v2555_v2 = vmul.f32 %v4410_v41, %v2505_v52  ;;  %v5894_v4 = vpop.eup %4411  ;;  %vm2560_vm15 = vweird.f32 %v4410_v41 }
 0x9e7   : > { %4415 = vrcp.f32 %v2506_v48  ;;  %v2525_v36 = vmul.f32 %v5894_v4, %v5887_v29  ;;  %vm2561_vm10 = vmor %vm2559_vm5, %vm2560_vm15  ;;  %v2580_v22 = vand.u32 2147483648, %v2506_v48  ;;  %v2578_v15 = vand.u32 2147483647, %v2506_v48 }
 0x9e8   : > { %v2556_v47 = vsub.f32 1.0, %v2555_v2  ;;  %vm2574_vm11 = vweird.f32 %v2506_v48  ;;  %vm2530_vm0 = vweird.f32 %v5894_v4 }
 0x9e9   : > { %v2526_v0 = vsub.f32 1.0, %v2525_v36  ;;  %vm2579_vm3 = vcmp.eq.f32.partialorder %v2578_v15, 8.507059e+37  ;;  %vm2531_vm12 = vmor %vm2529_vm4, %vm2530_vm0 }
 0x9ea   : > { %v2557_v5 = vmul.f32 %v4410_v41, %v2556_v47 }
 0x9eb   : > { %v2527_v52 = vmul.f32 %v5894_v4, %v2526_v0 }
 0x9ec   : > { %v4414_v17 = vpop.eup %4413  ;;  %v2558_v25 = vadd.f32 %v4410_v41, %v2557_v5 }
 0x9ed   : > { %v4416_v50 = vpop.eup %4415  ;;  %v2507_v62 = vadd.f32 1.0, %v4414_v17  ;;  %v2528_v5 = vadd.f32 %v5894_v4, %v2527_v52  ;;  %v2535_v17 = vand.u32 2147483648, %v5887_v29 }
 0x9ee   : > { %v2570_v61 = vmul.f32 %v4416_v50, %v2506_v48  ;;  %v2562_v18 = vsel %vm2561_vm10, %v4410_v41, %v2558_v25  ;;  %vm2575_vm8 = vweird.f32 %v4416_v50  ;;  %v2533_v48 = vand.u32 2147483647, %v5887_v29 }
 0x9ef   : > { %4417 = vrcp.f32 %v2507_v62  ;;  %v2567_v42 = vsel %vm2564_vm7, %v2566_v38, %v2562_v18  ;;  %vm2576_vm2 = vmor %vm2574_vm11, %vm2575_vm8  ;;  %v2595_v36 = vand.u32 2147483648, %v2507_v62  ;;  %v2593_v25 = vand.u32 2147483647, %v2507_v62 }
 0x9f0   : > { %v2571_v49 = vsub.f32 1.0, %v2570_v61  ;;  %v5898_v12 = vmul.f32 %v2567_v42, %v2470_v53  ;;  %v2581_v53 = vor.u32 1.1754944e-38, %v2580_v22  ;;  %v2532_v61 = vsel %vm2531_vm12, %v5894_v4, %v2528_v5 }
 0x9f1   : > { %vm2589_vm9 = vweird.f32 %v2507_v62  ;;  %v2536_v0 = vor.u32 1.1754944e-38, %v2535_v17  ;;  %v2596_v42 = vor.u32 1.1754944e-38, %v2595_v36  ;;  %vm2534_vm15 = vcmp.eq.f32.partialorder %v2533_v48, 8.507059e+37 }
 0x9f2   : > { %v2572_v13 = vmul.f32 %v4416_v50, %v2571_v49  ;;  %v2625_v14 = vmul.f32 %v5901_v33, %v5898_v12  ;;  %vm2594_vm5 = vcmp.eq.f32.partialorder %v2593_v25, 8.507059e+37 }
 0x9f3   : > { %v2537_v22 = vsel %vm2534_vm15, %v2536_v0, %v2532_v61 }
 0x9f4   : > { %v2573_v3 = vadd.f32 %v4416_v50, %v2572_v13  ;;  %v2633_v28 = vadd.f32 %v5906_v8, %v2625_v14  ;;  %v5927_v4 = vmul.f32 %v2537_v22, %v5882_v19  ;;  %v2467_v19 = vadd.f32 %v5876_v43, %v5879_v23 }
 0x9f5   : > { %v4418_v59 = vpop.eup %4417 }
 0x9f6   : > { %v2577_v41 = vsel %vm2576_vm2, %v4416_v50, %v2573_v3  ;;  %v2585_v2 = vmul.f32 %v4418_v59, %v2507_v62  ;;  %v2646_v51 = vsel %vm818_vm1, %v2633_v28, 0.0  ;;  %vm2590_vm6 = vweird.f32 %v4418_v59 }
 0x9f7   : > { %v2582_v47 = vsel %vm2579_vm3, %v2581_v53, %v2577_v41  ;;  %2647 = vadd.xlane.f32.xlu2 %v2646_v51  ;;  %vm2591_vm14 = vmor %vm2589_vm9, %vm2590_vm6  ;;  %v2623_v3 = vmul.f32 %v5901_v33, %v5927_v4  ;;  %v5941_v28 = vadd.f32 %v5873_v26, %v5879_v23 }
 0x9f8   : > { %v5913_v34 = vmul.f32 %v2582_v47, %v2473_v40  ;;  %v2586_v39 = vsub.f32 1.0, %v2585_v2 }
 0x9f9   : > { %v4146_v41 = vmul.f32 -1.442695, %v5941_v28 }
 0x9fa   : > { %v2587_v50 = vmul.f32 %v4418_v59, %v2586_v39  ;;  %v2626_v38 = vmul.f32 %v5901_v33, %v5913_v34 }
 0x9fc   : > { %v2588_v40 = vadd.f32 %v4418_v59, %v2587_v50  ;;  %v2634_v18 = vadd.f32 %v5906_v8, %v2626_v38 }
 0x9fe   : > { %v2592_v49 = vsel %vm2591_vm14, %v4418_v59, %v2588_v40  ;;  %v2649_v29 = vsel %vm818_vm1, %v2634_v18, 0.0  ;;  %v2631_v59 = vadd.f32 %v5906_v8, %v2623_v3 }
 0x9ff   : > { %v2597_v13 = vsel %vm2594_vm5, %v2596_v42, %v2592_v49  ;;  %2650 = vadd.xlane.f32.xlu0 %v2649_v29 }
 0xa00   : > { %v5924_v15 = vmul.f32 %v2597_v13, %v5890_v63  ;;  %v2640_v53 = vsel %vm818_vm1, %v2631_v59, 0.0  ;;  %v4148_v63 = vmul.f32 -1.442695, %v2467_v19 }
 0xa02   : > { %v2627_v62 = vmul.f32 %v5901_v33, %v5924_v15  ;;  %4419 = vpow2.f32 %v4148_v63 }
 0xa03   : > { %4421 = vpow2.f32 %v4146_v41 }
 0xa04   : > { %v2635_v14 = vadd.f32 %v5906_v8, %v2627_v62 }
 0xa06   : > { %v2652_v52 = vsel %vm818_vm1, %v2635_v14, 0.0 }
 0xa07   : > { %2653 = vadd.xlane.f32.xlu2 %v2652_v52 }
 0xa08   : > { %v4420_v2 = vpop.eup %4419 }
 0xa09   : > { %v2504_v47 = vadd.f32 1.0, %v4420_v2  ;;  %v4422_v39 = vpop.eup %4421 }
 0xa0a   : > { %v2502_v17 = vadd.f32 1.0, %v4422_v39 }
 0xa0b   : > { %4423 = vrcp.f32 %v2504_v47  ;;  %vm2544_vm7 = vweird.f32 %v2504_v47  ;;  %v2550_v29 = vand.u32 2147483648, %v2504_v47  ;;  %v2548_v13 = vand.u32 2147483647, %v2504_v47 }
 0xa0c   : > { %vm2514_vm12 = vweird.f32 %v2502_v17 }
 0xa0d   : > { %vm2549_vm0 = vcmp.eq.f32.partialorder %v2548_v13, 8.507059e+37 }
 0xa0f   : > { %2641 = vadd.xlane.f32.xlu2 %v2640_v53  ;;  %v2551_v53 = vor.u32 1.1754944e-38, %v2550_v29 }
 0xa11   : > { %v4424_v43 = vpop.eup %4423 }
 0xa12   : > { %v2540_v50 = vmul.f32 %v4424_v43, %v2504_v47  ;;  %vm2545_vm10 = vweird.f32 %v4424_v43  ;;  %v2520_v47 = vand.u32 2147483648, %v2502_v17 }
 0xa13   : > { %vm2546_vm11 = vmor %vm2544_vm7, %vm2545_vm10 }
 0xa14   : > { %v2541_v25 = vsub.f32 1.0, %v2540_v50 }
 0xa16   : > { %v2542_v40 = vmul.f32 %v4424_v43, %v2541_v25 }
 0xa18   : > { %v2543_v49 = vadd.f32 %v4424_v43, %v2542_v40 }
 0xa1a   : > { %v2547_v3 = vsel %vm2546_vm11, %v4424_v43, %v2543_v49 }
 0xa1b   : > { %v2552_v2 = vsel %vm2549_vm0, %v2551_v53, %v2547_v3 }
 0xa1c   : > { %v5947_v50 = vmul.f32 %v2552_v2, %v2467_v19 }
 0xa3a   : > { %v2478_v51 = vpop.f32.mrf.mxu2 }
 0xa3b   : > { %v2479_v5 = vadd.f32 %v2478_v51, %v5879_v23 }
 0xa3d   : > { %v4152_v48 = vmul.f32 -1.442695, %v2479_v5 }
 0xa3f   : > { %4425 = vpow2.f32 %v4152_v48 }
 0xa40   : > { %4427 = vrcp.f32 %v2502_v17 }
 0xa45   : > { %v4426_v36 = vpop.eup %4425 }
 0xa46   : > { %v2508_v26 = vadd.f32 1.0, %v4426_v36  ;;  %v4428_v38 = vpop.eup %4427  ;;  %v2518_v36 = vand.u32 2147483647, %v2502_v17 }
 0xa47   : > { %v2510_v61 = vmul.f32 %v4428_v38, %v2502_v17  ;;  %vm2515_vm6 = vweird.f32 %v4428_v38 }
 0xa48   : > { %4429 = vrcp.f32 %v2508_v26  ;;  %v2610_v22 = vand.u32 2147483648, %v2508_v26  ;;  %v2608_v14 = vand.u32 2147483647, %v2508_v26  ;;  %vm2604_vm2 = vweird.f32 %v2508_v26  ;;  %vm2516_vm9 = vmor %vm2514_vm12, %vm2515_vm6 }
 0xa49   : > { %v2511_v42 = vsub.f32 1.0, %v2510_v61  ;;  %v2521_v61 = vor.u32 1.1754944e-38, %v2520_v47  ;;  %vm2519_vm14 = vcmp.eq.f32.partialorder %v2518_v36, 8.507059e+37 }
 0xa4a   : > { %v2611_v63 = vor.u32 1.1754944e-38, %v2610_v22  ;;  %vm2609_vm4 = vcmp.eq.f32.partialorder %v2608_v14, 8.507059e+37 }
 0xa4b   : > { %v2512_v52 = vmul.f32 %v4428_v38, %v2511_v42 }
 0xa4d   : > { %v2513_v39 = vadd.f32 %v4428_v38, %v2512_v52 }
 0xa4e   : > { %v4430_v18 = vpop.eup %4429 }
 0xa4f   : > { %v2600_v0 = vmul.f32 %v4430_v18, %v2508_v26  ;;  %vm2605_vm8 = vweird.f32 %v4430_v18  ;;  %v2517_v26 = vsel %vm2516_vm9, %v4428_v38, %v2513_v39 }
 0xa50   : > { %vm2606_vm3 = vmor %vm2604_vm2, %vm2605_vm8 }
 0xa51   : > { %v2601_v23 = vsub.f32 1.0, %v2600_v0 }
 0xa53   : > { %v2602_v62 = vmul.f32 %v4430_v18, %v2601_v23 }
 0xa55   : > { %v2603_v59 = vadd.f32 %v4430_v18, %v2602_v62 }
 0xa57   : > { %v2607_v41 = vsel %vm2606_vm3, %v4430_v18, %v2603_v59  ;;  %v2522_v18 = vsel %vm2519_vm14, %v2521_v61, %v2517_v26 }
 0xa58   : > { %v2612_v51 = vsel %vm2609_vm4, %v2611_v63, %v2607_v41  ;;  %v5956_v17 = vmul.f32 %v2522_v18, %v5941_v28 }
 0xa59   : > { %v5945_v48 = vmul.f32 %v2612_v51, %v2479_v5  ;;  %v2624_v5 = vmul.f32 %v5901_v33, %v5947_v50 }
 0xa5a   : > { %v2622_v38 = vmul.f32 %v5901_v33, %v5956_v17 }
 0xa5b   : > { %v2628_v43 = vmul.f32 %v5901_v33, %v5945_v48  ;;  %v2632_v19 = vadd.f32 %v5906_v8, %v2624_v5 }
 0xa5c   : > { %v2630_v42 = vadd.f32 %v5906_v8, %v2622_v38 }
 0xa5d   : > { %v2636_v25 = vadd.f32 %v5906_v8, %v2628_v43  ;;  %v2643_v0 = vsel %vm818_vm1, %v2632_v19, 0.0 }
 0xa5e   : > { %v2637_v49 = vsel %vm818_vm1, %v2630_v42, 0.0 }
 0xa5f   : > { %v2655_v40 = vsel %vm818_vm1, %v2636_v25, 0.0 }
 0xa60   : > { %2656 = vadd.xlane.f32.xlu0 %v2655_v40 }
 0xa68   : > { %2644 = vadd.xlane.f32.xlu0 %v2643_v0 }
 0xa6a   : > { %v2648_v23 = vpop.xlane.xlu2 %2647 }
 0xa6b   : > { %v4156_v13 = vmul.f32 -1.442695, %v2648_v23 }
 0xa6d   : > { %4431 = vpow2.f32 %v4156_v13 }
 0xa70   : > { %2638 = vadd.xlane.f32.xlu0 %v2637_v49 }
 0xa72   : > { %v2651_v22 = vpop.xlane.xlu0 %2650 }
 0xa73   : > { %v4157_v28 = vmul.f32 -1.442695, %v2651_v22  ;;  %v4432_v3 = vpop.eup %4431 }
 0xa74   : > { %v2682_v53 = vadd.f32 1.0, %v4432_v3 }
 0xa76   : > { %v2740_v23 = vand.u32 2147483647, %v2682_v53  ;;  %vm2736_vm15 = vweird.f32 %v2682_v53 }
 0xa78   : > { %vm5994_vm5 = vcmp.eq.f32.partialorder %v2740_v23, 8.507059e+37 }
 0xa7a   : > { %v2654_v29 = vpop.xlane.xlu2 %2653 }
 0xa7b   : > { %v4158_v62 = vmul.f32 -1.442695, %v2654_v29 }
 0xa7d   : > { %4433 = vpow2.f32 %v4158_v62 }
 0xa7e   : > { %4435 = vpow2.f32 %v4157_v28 }
 0xa82   : > { %v2642_v14 = vpop.xlane.xlu2 %2641 }
 0xa83   : > { %v4154_v52 = vmul.f32 -1.442695, %v2642_v14  ;;  %v4434_v59 = vpop.eup %4433 }
 0xa84   : > { %v4436_v33 = vpop.eup %4435  ;;  %v5964_v8 = vadd.f32 1.0, %v4434_v59 }
 0xa85   : > { %4437 = vpow2.f32 %v4154_v52  ;;  %v5966_v63 = vadd.f32 1.0, %v4436_v33  ;;  %v2742_v52 = vand.u32 2147483648, %v2682_v53 }
 0xa86   : > { %4439 = vrcp.f32 %v2682_v53  ;;  %vm2766_vm11 = vweird.f32 %v5964_v8 }
 0xa87   : > { %4441 = vrcp.f32 %v5964_v8  ;;  %v2755_v33 = vand.u32 2147483647, %v5966_v63  ;;  %vm2751_vm2 = vweird.f32 %v5966_v63  ;;  %v2743_v23 = vor.u32 1.1754944e-38, %v2742_v52 }
 0xa88   : > { %4443 = vrcp.f32 %v5966_v63 }
 0xa89   : > { %vm6026_vm4 = vcmp.eq.f32.partialorder %v2755_v33, 8.507059e+37 }
 0xa8b   : > { %v4438_v41 = vpop.eup %4437 }
 0xa8c   : > { %v5970_v51 = vadd.f32 1.0, %v4438_v41  ;;  %v5972_v47 = vpop.eup %4439  ;;  %v2757_v41 = vand.u32 2147483648, %v5966_v63 }
 0xa8d   : > { %v5974_v36 = vpop.eup %4441  ;;  %v2732_v26 = vmul.f32 %v5972_v47, %v2682_v53  ;;  %vm2737_vm10 = vweird.f32 %v5972_v47 }
 0xa8e   : > { %v5976_v43 = vpop.eup %4443  ;;  %v2762_v25 = vmul.f32 %v5974_v36, %v5964_v8  ;;  %vm2767_vm8 = vweird.f32 %v5974_v36  ;;  %vm6017_vm3 = vmor %vm2736_vm15, %vm2737_vm10 }
 0xa8f   : > { %v2747_v61 = vmul.f32 %v5976_v43, %v5966_v63  ;;  %v2733_v19 = vsub.f32 1.0, %v2732_v26  ;;  %vm2752_vm7 = vweird.f32 %v5976_v43  ;;  %vm6022_vm0 = vmor %vm2766_vm11, %vm2767_vm8 }
 0xa90   : > { %v2763_v42 = vsub.f32 1.0, %v2762_v25  ;;  %vm6040_vm12 = vmor %vm2751_vm2, %vm2752_vm7 }
 0xa91   : > { %v2748_v49 = vsub.f32 1.0, %v2747_v61  ;;  %v2734_v22 = vmul.f32 %v5972_v47, %v2733_v19 }
 0xa92   : > { %v2764_v13 = vmul.f32 %v5974_v36, %v2763_v42 }
 0xa93   : > { %v2749_v28 = vmul.f32 %v5976_v43, %v2748_v49  ;;  %v2735_v25 = vadd.f32 %v5972_v47, %v2734_v22 }
 0xa95   : > { %v2750_v19 = vadd.f32 %v5976_v43, %v2749_v28 }
 0xad3   : > { %v2657_v2 = vpop.xlane.xlu0 %2656 }
 0xad4   : > { %v4159_v39 = vmul.f32 -1.442695, %v2657_v2 }
 0xad6   : > { %4445 = vpow2.f32 %v4159_v39 }
 0xad7   : > { %4447 = vrcp.f32 %v5970_v51 }
 0xadb   : > { %v2645_v40 = vpop.xlane.xlu0 %2644 }
 0xadc   : > { %v4446_v5 = vpop.eup %4445  ;;  %v4155_v18 = vmul.f32 -1.442695, %v2645_v40  ;;  %v2765_v40 = vadd.f32 %v5974_v36, %v2764_v13 }
 0xadd   : > { %v5984_v0 = vadd.f32 1.0, %v4446_v5  ;;  %v5986_v38 = vpop.eup %4447  ;;  %v2770_v5 = vand.u32 2147483647, %v5964_v8 }
 0xade   : > { %4449 = vpow2.f32 %v4155_v18  ;;  %v2702_v29 = vmul.f32 %v5986_v38, %v5970_v51  ;;  %v2772_v18 = vand.u32 2147483648, %v5964_v8  ;;  %v2739_v8 = vsel %vm6017_vm3, %v5972_v47, %v2735_v25 }
 0xadf   : > { %4451 = vrcp.f32 %v5984_v0  ;;  %v2769_v28 = vsel %vm6022_vm0, %v5974_v36, %v2765_v40  ;;  %vm2771_vm9 = vcmp.eq.f32.partialorder %v2770_v5, 8.507059e+37  ;;  %v2754_v47 = vsel %vm6040_vm12, %v5976_v43, %v2750_v19 }
 0xae0   : > { %v2703_v39 = vsub.f32 1.0, %v2702_v29  ;;  %v2787_v29 = vand.u32 2147483648, %v5984_v0  ;;  %vm2781_vm14 = vweird.f32 %v5984_v0  ;;  %v2744_v36 = vsel %vm5994_vm5, %v2743_v23, %v2739_v8 }
 0xae1   : > { %vm2707_vm15 = vweird.f32 %v5986_v38  ;;  %vm2706_vm5 = vweird.f32 %v5970_v51  ;;  %v2712_v19 = vand.u32 2147483648, %v5970_v51 }
 0xae2   : > { %v2704_v53 = vmul.f32 %v5986_v38, %v2703_v39  ;;  %v2788_v40 = vor.u32 1.1754944e-38, %v2787_v29  ;;  %vm6062_vm8 = vmor %vm2706_vm5, %vm2707_vm15  ;;  %v4104_v29 = vld [vmem:[%s6742_s7 + $0x130] sm:$0xff] }
 0xae3   : > { %v2639_v62 = vpop.xlane.xlu0 %2638 }
 0xae4   : > { %v4450_v3 = vpop.eup %4449  ;;  %v4153_v59 = vmul.f32 -1.442695, %v2639_v62  ;;  %v2785_v62 = vand.u32 2147483647, %v5984_v0 }
 0xae5   : > { %v4452_v2 = vpop.eup %4451  ;;  %v6001_v26 = vadd.f32 1.0, %v4450_v3  ;;  %v2773_v3 = vor.u32 1.1754944e-38, %v2772_v18  ;;  %v2705_v18 = vadd.f32 %v5986_v38, %v2704_v53 }
 0xae6   : > { %v2777_v61 = vmul.f32 %v4452_v2, %v5984_v0  ;;  %4453 = vpow2.f32 %v4153_v59  ;;  %vm2782_vm6 = vweird.f32 %v4452_v2  ;;  %v2758_v59 = vor.u32 1.1754944e-38, %v2757_v41 }
 0xae7   : > { %4455 = vrcp.f32 %v6001_v26  ;;  %vm2783_vm10 = vmor %vm2781_vm14, %vm2782_vm6  ;;  %v2774_v5 = vsel %vm2771_vm9, %v2773_v3, %v2769_v28  ;;  %vm2786_vm7 = vcmp.eq.f32.partialorder %v2785_v62, 8.507059e+37  ;;  %v2727_v13 = vand.u32 2147483648, %v6001_v26 }
 0xae8   : > { %v2778_v42 = vsub.f32 1.0, %v2777_v61  ;;  %v2759_v0 = vsel %vm6026_vm4, %v2758_v59, %v2754_v47  ;;  %v2796_v23 = vmul.f32 %v2774_v5, %v5924_v15  ;;  %v2709_v8 = vsel %vm6062_vm8, %v5986_v38, %v2705_v18 }
 0xae9   : > { %v2795_v22 = vmul.f32 %v2759_v0, %v5913_v34  ;;  %v2725_v15 = vand.u32 2147483647, %v6001_v26  ;;  %v2713_v62 = vor.u32 1.1754944e-38, %v2712_v19  ;;  %vm2721_vm2 = vweird.f32 %v6001_v26 }
 0xaea   : > { %v2779_v63 = vmul.f32 %v4452_v2, %v2778_v42  ;;  %v2728_v52 = vor.u32 1.1754944e-38, %v2727_v13 }
 0xaeb   : > { %v2802_v47 = vmul.f32 %v2795_v22, %v5388_v35  ;;  %vm2726_vm4 = vcmp.eq.f32.partialorder %v2725_v15, 8.507059e+37  ;;  %v4102_v22 = vld [vmem:[%s6742_s7 + $0x120] sm:$0xff] }
 0xaec   : > { %v4454_v33 = vpop.eup %4453  ;;  %v2780_v39 = vadd.f32 %v4452_v2, %v2779_v63  ;;  %v2794_v63 = vmul.f32 %v2744_v36, %v5898_v12 }
 0xaed   : > { %v4456_v25 = vpop.eup %4455  ;;  %v2679_v61 = vadd.f32 1.0, %v4454_v33 }
 0xaee   : > { %v2717_v43 = vmul.f32 %v4456_v25, %v6001_v26  ;;  %v2784_v41 = vsel %vm2783_vm10, %v4452_v2, %v2780_v39  ;;  %v2710_v2 = vand.u32 2147483647, %v5970_v51  ;;  %vm2722_vm11 = vweird.f32 %v4456_v25 }
 0xaef   : > { %4457 = vrcp.f32 %v2679_v61  ;;  %v2789_v14 = vsel %vm2786_vm7, %v2788_v40, %v2784_v41  ;;  %v2803_v51 = vmul.f32 %v2796_v23, %v5378_v7  ;;  %vm2723_vm0 = vmor %vm2721_vm2, %vm2722_vm11  ;;  %v2801_v39 = vmul.f32 %v2794_v63, %v5398_v9  ;;  %v4105_v23 = vld [vmem:[%s6742_s7 + $0x138] sm:$0xff] }
 0xaf0   : > { %v2718_v42 = vsub.f32 1.0, %v2717_v43  ;;  %v2797_v49 = vmul.f32 %v2789_v14, %v5945_v48  ;;  %vm2711_vm3 = vcmp.eq.f32.partialorder %v2710_v2, 8.507059e+37  ;;  %v2697_v40 = vand.u32 2147483648, %v2679_v61  ;;  %v4103_v2 = vld [vmem:[%s6742_s7 + $0x128] sm:$0xff] }
 0xaf1   : > { %v2714_v38 = vsel %vm2711_vm3, %v2713_v62, %v2709_v8  ;;  %v2695_v43 = vand.u32 2147483647, %v2679_v61  ;;  %vm2691_vm12 = vweird.f32 %v2679_v61  ;;  %vm6833_vm3 = vcmask 64512  }
 0xaf2   : > { %v2804_v48 = vmul.f32 %v2797_v49, %v5386_v46  ;;  %v2719_v53 = vmul.f32 %v4456_v25, %v2718_v42  ;;  %v2792_v26 = vmul.f32 %v2714_v38, %v5927_v4  ;;  %v2698_v0 = vor.u32 1.1754944e-38, %v2697_v40  ;;  %v4109_v42 = vld [vmem:[%s6742_s7 + $0x158] sm:$0xff]  ;;  %v4107_v49 = vld [vmem:[%s6742_s7 + $0x148] sm:$0xff] }
 0xaf3   : > { %vm2696_vm14 = vcmp.eq.f32.partialorder %v2695_v43, 8.507059e+37 }
 0xaf4   : > { %2814 = vmatpush.msra.mxu0 %v2804_v48  ;;  %v2720_v28 = vadd.f32 %v4456_v25, %v2719_v53  ;;  %v6117_v48 = vld [vmem:[%s6743_s8 + $0x18] sm:$0xf] }
 0xaf5   : > { %v4458_v34 = vpop.eup %4457  ;;  %v2868_v53 = vperm.slane %v6117_v48, 0 }
 0xaf6   : > { %v2687_v3 = vmul.f32 %v4458_v34, %v2679_v61  ;;  %2815 = vmatpush.msra.mxu0 %v2803_v51  ;;  %v2724_v59 = vsel %vm2723_vm0, %v4456_v25, %v2720_v28  ;;  %vm2692_vm6 = vweird.f32 %v4458_v34  ;;  %v2799_v25 = vmul.f32 %v2792_v26, %v5545_v55  ;;  %v4108_v61 = vld [vmem:[%s6742_s7 + $0x150] sm:$0xff]  ;;  %vm6834_vm0 = vmmov %vm6833_vm3 }
 0xaf7   : > { %v2729_v33 = vsel %vm2726_vm4, %v2728_v52, %v2724_v59  ;;  %vm2693_vm9 = vmor %vm2691_vm12, %vm2692_vm6 }
 0xaf8   : > { %v2688_v12 = vsub.f32 1.0, %v2687_v3  ;;  %2816 = vmatpush.msra.mxu0 %v2802_v47  ;;  %v2793_v36 = vmul.f32 %v2729_v33, %v5947_v50  ;;  %vm6835_vm4 = vmmov %vm6834_vm0 }
 0xaf9   : > { %vm6836_vm6 = vmmov %vm6834_vm0 }
 0xafa   : > { %2817 = vmatpush.msra.mxu0 %v2801_v39  ;;  %v2800_v5 = vmul.f32 %v2793_v36, %v5396_v37  ;;  %v2689_v18 = vmul.f32 %v4458_v34, %v2688_v12  ;;  %v4113_v12 = vld [vmem:[%s6742_s7 + $0x178] sm:$0xff]  ;;  %v4112_v39 = vld [vmem:[%s6742_s7 + $0x170] sm:$0xff]  ;;  %v4111_v36 = vld [vmem:[%s6742_s7 + $0x168] sm:$0xff] }
 0xafb   : > { %2931 = vmatpush.msrb.mxu3 %v4113_v12  ;;  %v2940_v12 = vperm.slane %v6117_v48, 3  ;;  %vm6837_vm12 = vmmov %vm6834_vm0 }
 0xafc   : > { %2818 = vmatpush.msra.mxu0 %v2800_v5  ;;  %v2690_v41 = vadd.f32 %v4458_v34, %v2689_v18  ;;  %v4110_v5 = vld [vmem:[%s6742_s7 + $0x160] sm:$0xff] }
 0xafd   : > { %2932 = vmatpush.msrb.mxu3 %v4112_v39 }
 0xafe   : > { %2819 = vmatpush.msra.mxu0 %v2799_v25  ;;  %v2694_v14 = vsel %vm2693_vm9, %v4458_v34, %v2690_v41  ;;  %vm6838_vm9 = vmmov %vm6834_vm0 }
 0xaff   : > { %v2699_v50 = vsel %vm2696_vm14, %v2698_v0, %v2694_v14  ;;  %2933 = vmatpush.msrb.mxu3 %v4111_v36  ;;  %v2892_v0 = vperm.slane %v6117_v48, 1  ;;  %vm6839_vm14 = vmmov %vm6834_vm0 }
 0xb00   : > { %v2791_v4 = vmul.f32 %v2699_v50, %v5956_v17  ;;  %v4106_v17 = vld [vmem:[%s6742_s7 + $0x140] sm:$0xff]  ;;  %v2894_v50 = vperm.slane %v6117_v48, 2 }
 0xb01   : > { %2934 = vmatpush.msrb.mxu3 %v4110_v5 }
 0xb02   : > { %v2798_v19 = vmul.f32 %v2791_v4, %v5549_v24 }
 0xb04   : > { %2820 = vmatpush.msra.mxu0 %v2798_v19 }
 0xb05   : > { %4160 = vmatmul.msk.f32.vlgmr.msra.gmra.mxu0 %vm1779_vm13, %v5580_v58 }
 0xb06   : > { %2840 = vmatpush.msrb.mxu0 %v4109_v42 }
 0xb08   : > { %2841 = vmatpush.msrb.mxu0 %v4108_v61 }
 0xb0a   : > { %2842 = vmatpush.msrb.mxu0 %v4107_v49 }
 0xb0c   : > { %2843 = vmatpush.msrb.mxu0 %v4106_v17 }
 0xb0e   : > { %2860 = vmatpush.msra.mxu0 %v4105_v23 }
 0xb10   : > { %2861 = vmatpush.msra.mxu0 %v4104_v29 }
 0xb12   : > { %2862 = vmatpush.msra.mxu0 %v4103_v2 }
 0xb14   : > { %2863 = vmatpush.msra.mxu0 %v4102_v22 }
 0xb82   : > { %v2822_v13 = vpop.f32.mrf.mxu0 }
 0xb83   : > { %4161 = vmatmul.msk.f32.vlgmr.msrb.gmra.mxu0 %vm818_vm1, %v2822_v13 }
 0xb8b   : > { %4162 = vmatmul.msk.f32.vlgmr.msra.gmra.mxu0 %vm818_vm1, %v5646_v32 }
 0xc00   : > { %v2845_v8 = vpop.f32.mrf.mxu0 }
 0xc08   : > { %v2865_v15 = vpop.f32.mrf.mxu0 }
 0xc09   : > { %v2866_v63 = vadd.f32 %v2865_v15, %v2845_v8 }
 0xc0b   : > { %v2869_v62 = vadd.f32 %v2868_v53, %v2866_v63 }
 0xc0d   : > { %v2870_v51 = vsel %vm818_vm1, %v2869_v62, 0.0 }
 0xc0e   : > { %2871 = vadd.xlane.f32.xlu2 %v2870_v51 }
 0xc81   : > { %v2872_v28 = vpop.xlane.xlu2 %2871 }
 0xc82   : > { %v2873_v34 = vmul.f32 %v2872_v28, %v5117_v54  ;;  %v2946_v28 = vld [vmem:[%s6744_s9 + $0x18] sm:$0xff] }
 0xc83   : > { %2972 = vmatpush.msrb.mxu0 %v2946_v28 }
 0xc84   : > { %v2874_v52 = vsub.f32 %v2869_v62, %v2873_v34  ;;  %v2950_v34 = vld [vmem:[%s6744_s9 + $0x38] sm:$0xff] }
 0xc85   : > { %2992 = vmatpush.msra.mxu1 %v2950_v34 }
 0xc86   : > { %v2875_v38 = vmul.f32 %v2874_v52, %v2874_v52 }
 0xc88   : > { %v2876_v3 = vsel %vm818_vm1, %v2875_v38, 0.0  ;;  %v2949_v38 = vld [vmem:[%s6744_s9 + $0x30] sm:$0xff] }
 0xc89   : > { %2877 = vadd.xlane.f32.xlu0 %v2876_v3  ;;  %v2944_v3 = vld [vmem:[%s6744_s9 + $0x8] sm:$0xff]  ;;  %2993 = vmatpush.msra.mxu1 %v2949_v38 }
 0xcfc   : > { %v2878_v47 = vpop.xlane.xlu0 %2877 }
 0xcfd   : > { %v2879_v59 = vmul.f32 %v2878_v47, %v5117_v54  ;;  %v2948_v47 = vld [vmem:[%s6744_s9 + $0x28] sm:$0xff] }
 0xcfe   : > { %2994 = vmatpush.msra.mxu1 %v2948_v47 }
 0xcff   : > { %v2880_v33 = vadd.f32 1e-05, %v2879_v59  ;;  %v2943_v59 = vld [vmem:[%s6744_s9] sm:$0xff] }
 0xd01   : > { %4459 = vrsqrt.f32 %v2880_v33  ;;  %vm2887_vm10 = vweird.f32 %v2880_v33 }
 0xd07   : > { %v4460_v26 = vpop.eup %4459 }
 0xd08   : > { %v2882_v40 = vmul.f32 %v4460_v26, %v2880_v33  ;;  %vm2888_vm15 = vweird.f32 %v4460_v26  ;;  %v2947_v33 = vld [vmem:[%s6744_s9 + $0x20] sm:$0xff] }
 0xd09   : > { %vm2889_vm7 = vmor %vm2887_vm10, %vm2888_vm15  ;;  %2995 = vmatpush.msra.mxu1 %v2947_v33 }
 0xd0a   : > { %v2883_v18 = vmul.f32 %v4460_v26, %v2882_v40  ;;  %vm6840_vm15 = vmmov %vm6834_vm0 }
 0xd0b   : > { %vm6841_vm10 = vmmov %vm6834_vm0 }
 0xd0c   : > { %v2884_v43 = vmul.f32 0.5, %v2883_v18  ;;  %v4592_v18 = vld [vmem:[%s6780_s1] sm:$0xff] }
 0xd0e   : > { %v2885_v25 = vsub.f32 1.5, %v2884_v43  ;;  %v4593_v43 = vld [vmem:[%s6779_s0] sm:$0xff] }
 0xd10   : > { %v2886_v41 = vmul.f32 %v4460_v26, %v2885_v25  ;;  %v4594_v25 = vld [vmem:[%s6780_s1 + $0x8] sm:$0xff] }
 0xd12   : > { %v2890_v14 = vsel %vm2889_vm7, %v4460_v26, %v2886_v41  ;;  %v4595_v41 = vld [vmem:[%s6779_s0 + $0x8] sm:$0xff]  ;;  %vm6842_vm7 = vmmov %vm6834_vm0 }
 0xd13   : > { %v2891_v4 = vmul.f32 %v2890_v14, %v2874_v52  ;;  %v2945_v52 = vld [vmem:[%s6744_s9 + $0x10] sm:$0xff] }
 0xd14   : > { %2973 = vmatpush.msrb.mxu0 %v2945_v52  ;;  %v4597_v14 = vld [vmem:[%s6779_s0 + $0x10] sm:$0xff] }
 0xd15   : > { %v2893_v19 = vmul.f32 %v2892_v0, %v2891_v4  ;;  %v4596_v0 = vld [vmem:[%s6780_s1 + $0x10] sm:$0xff]  ;;  %v4599_v4 = vld [vmem:[%s6779_s0 + $0x18] sm:$0xff] }
 0xd16   : > { %2974 = vmatpush.msrb.mxu0 %v2944_v3 }
 0xd17   : > { %v2895_v42 = vadd.f32 %v2894_v50, %v2893_v19  ;;  %v4598_v50 = vld [vmem:[%s6780_s1 + $0x18] sm:$0xff]  ;;  %v4600_v19 = vld [vmem:[%s6780_s1 + $0x20] sm:$0xff] }
 0xd18   : > { %2975 = vmatpush.msrb.mxu0 %v2943_v59 }
 0xd19   : > { %v4163_v61 = vmul.f32 -1.442695, %v2895_v42 }
 0xd1b   : > { %4461 = vpow2.f32 %v4163_v61  ;;  %v4602_v61 = vld [vmem:[%s6780_s1 + $0x28] sm:$0xff] }
 0xd21   : > { %v4462_v49 = vpop.eup %4461 }
 0xd22   : > { %v2899_v17 = vadd.f32 1.0, %v4462_v49  ;;  %v4603_v49 = vld [vmem:[%s6779_s0 + $0x28] sm:$0xff] }
 0xd24   : > { %4463 = vrcp.f32 %v2899_v17  ;;  %v2911_v22 = vand.u32 2147483648, %v2899_v17  ;;  %v2909_v8 = vand.u32 2147483647, %v2899_v17  ;;  %vm2905_vm8 = vweird.f32 %v2899_v17 }
 0xd26   : > { %v2912_v15 = vor.u32 1.1754944e-38, %v2911_v22  ;;  %vm2910_vm2 = vcmp.eq.f32.partialorder %v2909_v8, 8.507059e+37 }
 0xd2a   : > { %v4464_v23 = vpop.eup %4463 }
 0xd2b   : > { %v2901_v29 = vmul.f32 %v4464_v23, %v2899_v17  ;;  %vm2906_vm5 = vweird.f32 %v4464_v23  ;;  %v4604_v17 = vld [vmem:[%s6780_s1 + $0x30] sm:$0xff]  ;;  %s4627_s1 = scalar_lea.hbm %s6746_s11, 32 }
 0xd2c   : > { %vm2907_vm11 = vmor %vm2905_vm8, %vm2906_vm5  ;;  %p4629_p1 = scmp.lt.s32.totalorder %s4627_s1, %s4623_s14 }
 0xd2d   : > { %v2902_v2 = vsub.f32 1.0, %v2901_v29  ;;  %vm6843_vm5 = vmmov %vm6834_vm0  ;;  %v6237_v29 = vld [vmem:[%s6745_s10] sm:$0xff] }
 0xd2e   : > { %vm6844_vm8 = vmmov %vm6834_vm0  ;;  %v6243_v8 = vperm.slane %v6237_v29, 1  ;;  %p4630_p2 = por %p4629_p1, %p4628_p0 }
 0xd2f   : > { %v2903_v13 = vmul.f32 %v4464_v23, %v2902_v2  ;;  %v6240_v2 = vperm.slane %v6237_v29, 0 }
 0xd30   : > { %v3093_v33 = vmul.f32 %v6243_v8, %v5019_v10  ;;  %p4631_p3 = pnand %p4630_p2, %p4626_p13 }
 0xd31   : > { %v2904_v53 = vadd.f32 %v4464_v23, %v2903_v13  ;;  %v3078_v47 = vmul.f32 %v6240_v2, %v5035_v21 }
 0xd33   : > { %v2908_v63 = vsel %vm2907_vm11, %v4464_v23, %v2904_v53  ;;  %vm6845_vm11 = vmmov %vm6834_vm0  ;;  %v4605_v23 = vld [vmem:[%s6779_s0 + $0x30] sm:$0xff] }
 0xd34   : > { %v2913_v62 = vsel %vm2910_vm2, %v2912_v15, %v2908_v63  ;;  %vm6846_vm2 = vmmov %vm6834_vm0  ;;  %v3077_v15 = vmul.f32 %v6240_v2, %v5021_v11  ;;  %v3092_v63 = vmul.f32 %v6243_v8, %v5009_v6 }
 0xd35   : > { %v2915_v51 = vmul.f32 %v2913_v62, %v2895_v42  ;;  %v4601_v42 = vld [vmem:[%s6779_s0 + $0x20] sm:$0xff] }
 0xd37   : > { %4164 = vmatmul.msk.f32.vlgmr.msrb.gmra.mxu3 %vm818_vm1, %v2915_v51  ;;  %v3106_v51 = vperm.slane %v6237_v29, 2 }
 0xdba   : > { %v2936_v39 = vpop.f32.mrf.mxu3 }
 0xdbb   : > { %v2939_v36 = vadd.f32 %v2936_v39, %v5646_v32 }
 0xdbd   : > { %v2941_v26 = vadd.f32 %v2940_v12, %v2939_v36 }
 0xdbf   : > { %v2942_v40 = vmul.f32 %v2941_v26, %v5643_v60 }
 0xdc1   : > { %4165 = vmatmul.msk.f32.vlgmr.msrb.gmra.mxu0 %vm818_vm1, %v2942_v40  ;;  %4166 = vmatmul.msk.f32.vlgmr.msra.gmra.mxu1 %vm818_vm1, %v2942_v40  ;;  %v3860_v5 = vmul.f32 %v2942_v40, %v5643_v60 }
 0xdc3   : > { %3861 = vst.msk [vmem:[%s461_s30] sm:$0xff] %vm818_vm1, %v3860_v5  ;;  %v3079_v5 = vmul.f32 %v6240_v2, %v5046_v30 }
 0xe3e   : > { %v2977_v48 = vpop.f32.mrf.mxu0  ;;  %v2997_v32 = vpop.f32.mrf.mxu1 }
 0xe3f   : > { %3015 = vmatpush.msra.mxu2 %v2997_v32  ;;  %3053 = vmatpush.msra.mxu3 %v2977_v48  ;;  %v3094_v32 = vmul.f32 %v6243_v8, %v5028_v16 }
 0xe40   : > { %4167 = vmatmul.msk.f32.vlgmr.msra.gmra.mxu2 %vm6833_vm3, %v4592_v18  ;;  %4174 = vmatmul.msk.f32.vlgmr.msra.gmra.mxu3 %vm6834_vm0, %v4593_v43 }
 0xe48   : > { %4168 = vmatmul.msk.f32.gmra.mxu2 %vm6835_vm4, %v4594_v25  ;;  %4175 = vmatmul.msk.f32.gmra.mxu3 %vm6836_vm6, %v4595_v41 }
 0xe50   : > { %4169 = vmatmul.msk.f32.gmra.mxu2 %vm6837_vm12, %v4596_v0  ;;  %4176 = vmatmul.msk.f32.gmra.mxu3 %vm6838_vm9, %v4597_v14  ;;  %v3080_v14 = vmul.f32 %v6240_v2, %v5057_v44 }
 0xe58   : > { %4170 = vmatmul.msk.f32.gmra.mxu2 %vm6839_vm14, %v4598_v50  ;;  %4177 = vmatmul.msk.f32.gmra.mxu3 %vm6840_vm15, %v4599_v4  ;;  %v3095_v4 = vmul.f32 %v6243_v8, %v5059_v45 }
 0xe60   : > { %4171 = vmatmul.msk.f32.gmra.mxu2 %vm6841_vm10, %v4600_v19  ;;  %4178 = vmatmul.msk.f32.gmra.mxu3 %vm6842_vm7, %v4601_v42 }
 0xe68   : > { %4172 = vmatmul.msk.f32.gmra.mxu2 %vm6843_vm5, %v4602_v61  ;;  %4179 = vmatmul.msk.f32.gmra.mxu3 %vm6844_vm8, %v4603_v49 }
 0xe70   : > { %4173 = vmatmul.msk.f32.gmra.mxu2 %vm6845_vm11, %v4604_v17  ;;  %4180 = vmatmul.msk.f32.gmra.mxu3 %vm6846_vm2, %v4605_v23  ;;  %v3081_v23 = vmul.f32 %v6240_v2, %v5072_v57 }
 0xec3   : > { %v3017_v22 = vpop.f32.mrf.mxu2  ;;  %v3055_v13 = vpop.f32.mrf.mxu3 }
 0xec4   : > { %v3056_v53 = vadd.f32 %v3055_v13, %v3017_v22  ;;  %v3096_v13 = vmul.f32 %v6243_v8, %v5070_v56 }
 0xec6   : > { %v3084_v62 = vadd.f32 %v3077_v15, %v3056_v53 }
 0xec8   : > { %v3099_v28 = vadd.f32 %v3092_v63, %v3084_v62 }
 0xeca   : > { %v6250_v34 = vadd.f32 %v3106_v51, %v3099_v28 }
 0xecb   : > { %v3020_v52 = vpop.f32.mrf.mxu2  ;;  %v3058_v38 = vpop.f32.mrf.mxu3 }
 0xecc   : > { %v3059_v3 = vadd.f32 %v3058_v38, %v3020_v52  ;;  %v3114_v59 = vsel %vm818_vm1, %v6250_v34, 0.0  ;;  %v3082_v52 = vmul.f32 %v6240_v2, %v6817_v31 }
 0xecd   : > { %3115 = vadd.xlane.f32.xlu2 %v3114_v59 }
 0xece   : > { %v3085_v6 = vadd.f32 %v3078_v47, %v3059_v3  ;;  %v3097_v3 = vmul.f32 %v6243_v8, %v6818_v27 }
 0xed0   : > { %v3100_v12 = vadd.f32 %v3093_v33, %v3085_v6 }
 0xed2   : > { %v3108_v39 = vadd.f32 %v3106_v51, %v3100_v12 }
 0xed3   : > { %v3023_v36 = vpop.f32.mrf.mxu2  ;;  %v3061_v26 = vpop.f32.mrf.mxu3 }
 0xed4   : > { %v3062_v40 = vadd.f32 %v3061_v26, %v3023_v36  ;;  %v3117_v48 = vsel %vm818_vm1, %v3108_v39, 0.0  ;;  %v3083_v36 = vmul.f32 %v6240_v2, %v6819_v1 }
 0xed5   : > { %3118 = vadd.xlane.f32.xlu0 %v3117_v48 }
 0xed6   : > { %v3086_v18 = vadd.f32 %v3079_v5, %v3062_v40  ;;  %v3098_v40 = vmul.f32 %v6243_v8, %v6820_v20 }
 0xed8   : > { %v3101_v43 = vadd.f32 %v3094_v32, %v3086_v18 }
 0xeda   : > { %v3109_v25 = vadd.f32 %v3106_v51, %v3101_v43 }
 0xedb   : > { %v3026_v41 = vpop.f32.mrf.mxu2  ;;  %v3064_v10 = vpop.f32.mrf.mxu3 }
 0xedc   : > { %v3065_v0 = vadd.f32 %v3064_v10, %v3026_v41  ;;  %v3120_v50 = vsel %vm818_vm1, %v3109_v25, 0.0 }
 0xedd   : > { %3121 = vadd.xlane.f32.xlu2 %v3120_v50 }
 0xede   : > { %v3087_v19 = vadd.f32 %v3080_v14, %v3065_v0 }
 0xee0   : > { %v3102_v42 = vadd.f32 %v3095_v4, %v3087_v19 }
 0xee2   : > { %v3110_v61 = vadd.f32 %v3106_v51, %v3102_v42 }
 0xee3   : > { %v3029_v49 = vpop.f32.mrf.mxu2  ;;  %v3067_v16 = vpop.f32.mrf.mxu3 }
 0xee4   : > { %v3068_v17 = vadd.f32 %v3067_v16, %v3029_v49  ;;  %v3123_v22 = vsel %vm818_vm1, %v3110_v61, 0.0 }
 0xee5   : > { %3124 = vadd.xlane.f32.xlu0 %v3123_v22 }
 0xee6   : > { %v3088_v53 = vadd.f32 %v3081_v23, %v3068_v17 }
 0xee8   : > { %v3103_v15 = vadd.f32 %v3096_v13, %v3088_v53 }
 0xeea   : > { %v3111_v63 = vadd.f32 %v3106_v51, %v3103_v15 }
 0xeeb   : > { %v3032_v62 = vpop.f32.mrf.mxu2  ;;  %v3070_v45 = vpop.f32.mrf.mxu3 }
 0xeec   : > { %v3071_v28 = vadd.f32 %v3070_v45, %v3032_v62  ;;  %v3126_v38 = vsel %vm818_vm1, %v3111_v63, 0.0 }
 0xeed   : > { %3127 = vadd.xlane.f32.xlu2 %v3126_v38 }
 0xeee   : > { %v3089_v47 = vadd.f32 %v3082_v52, %v3071_v28 }
 0xef0   : > { %v3104_v59 = vadd.f32 %v3097_v3, %v3089_v47 }
 0xef2   : > { %v3112_v33 = vadd.f32 %v3106_v51, %v3104_v59 }
 0xef3   : > { %v3035_v6 = vpop.f32.mrf.mxu2  ;;  %v3073_v56 = vpop.f32.mrf.mxu3 }
 0xef4   : > { %v3074_v12 = vadd.f32 %v3073_v56, %v3035_v6  ;;  %v3129_v26 = vsel %vm818_vm1, %v3112_v33, 0.0 }
 0xef5   : > { %3130 = vadd.xlane.f32.xlu0 %v3129_v26 }
 0xef6   : > { %v3090_v5 = vadd.f32 %v3083_v36, %v3074_v12 }
 0xef8   : > { %v3105_v48 = vadd.f32 %v3098_v40, %v3090_v5 }
 0xefa   : > { %v3113_v32 = vadd.f32 %v3106_v51, %v3105_v48 }
 0xefc   : > { %v3132_v27 = vsel %vm818_vm1, %v3113_v32, 0.0 }
 0xefd   : > { %3133 = vadd.xlane.f32.xlu0 %v3132_v27 }
 0xf40   : > { %v3116_v18 = vpop.xlane.xlu2 %3115 }
 0xf41   : > { %v3135_v43 = vmul.f32 %v3116_v18, %v5117_v54 }
 0xf43   : > { %v6286_v41 = vsub.f32 %v6250_v34, %v3135_v43 }
 0xf45   : > { %v3149_v2 = vmul.f32 %v6286_v41, %v6286_v41 }
 0xf47   : > { %v3156_v10 = vsel %vm818_vm1, %v3149_v2, 0.0 }
 0xf48   : > { %v3119_v0 = vpop.xlane.xlu0 %3118  ;;  %3157 = vadd.xlane.f32.xlu2 %v3156_v10 }
 0xf49   : > { %v3136_v20 = vmul.f32 %v3119_v0, %v5117_v54 }
 0xf4b   : > { %v6292_v8 = vsub.f32 %v3108_v39, %v3136_v20 }
 0xf4d   : > { %v3150_v51 = vmul.f32 %v6292_v8, %v6292_v8 }
 0xf4f   : > { %v3159_v14 = vsel %vm818_vm1, %v3150_v51, 0.0  ;;  %v6331_v51 = vperm.slane %v6237_v29, 3 }
 0xf50   : > { %3160 = vadd.xlane.f32.xlu2 %v3159_v14  ;;  %v3122_v50 = vpop.xlane.xlu2 %3121 }
 0xf51   : > { %v3137_v34 = vmul.f32 %v3122_v50, %v5117_v54 }
 0xf53   : > { %v6298_v4 = vsub.f32 %v3109_v25, %v3137_v34  ;;  %v6334_v34 = vperm.slane %v6237_v29, 4 }
 0xf55   : > { %v3151_v19 = vmul.f32 %v6298_v4, %v6298_v4 }
 0xf57   : > { %v3162_v42 = vsel %vm818_vm1, %v3151_v19, 0.0 }
 0xf58   : > { %v3125_v49 = vpop.xlane.xlu0 %3124  ;;  %3163 = vadd.xlane.f32.xlu0 %v3162_v42 }
 0xf59   : > { %v3138_v39 = vmul.f32 %v3125_v49, %v5117_v54 }
 0xf5b   : > { %v6304_v16 = vsub.f32 %v3110_v61, %v3138_v39  ;;  %v2954_v39 = vld [vmem:[%s6744_s9 + $0x58] sm:$0xff] }
 0xf5c   : > { %3458 = vmatpush.msra.mxu0 %v2954_v39 }
 0xf5d   : > { %v3152_v17 = vmul.f32 %v6304_v16, %v6304_v16 }
 0xf5f   : > { %v3165_v23 = vsel %vm818_vm1, %v3152_v17, 0.0 }
 0xf60   : > { %3166 = vadd.xlane.f32.xlu1 %v3165_v23  ;;  %v3128_v22 = vpop.xlane.xlu2 %3127 }
 0xf61   : > { %v3139_v25 = vmul.f32 %v3128_v22, %v5117_v54 }
 0xf63   : > { %v6310_v13 = vsub.f32 %v3111_v63, %v3139_v25  ;;  %v2953_v25 = vld [vmem:[%s6744_s9 + $0x50] sm:$0xff] }
 0xf64   : > { %3459 = vmatpush.msra.mxu0 %v2953_v25 }
 0xf65   : > { %v3153_v53 = vmul.f32 %v6310_v13, %v6310_v13 }
 0xf67   : > { %v3168_v15 = vsel %vm818_vm1, %v3153_v53, 0.0 }
 0xf68   : > { %v3131_v62 = vpop.xlane.xlu0 %3130  ;;  %3169 = vadd.xlane.f32.xlu2 %v3168_v15 }
 0xf69   : > { %v3140_v61 = vmul.f32 %v3131_v62, %v5117_v54 }
 0xf6b   : > { %v6316_v45 = vsub.f32 %v3112_v33, %v3140_v61 }
 0xf6d   : > { %v3154_v28 = vmul.f32 %v6316_v45, %v6316_v45 }
 0xf6f   : > { %v3171_v52 = vsel %vm818_vm1, %v3154_v28, 0.0  ;;  %v2952_v28 = vld [vmem:[%s6744_s9 + $0x48] sm:$0xff] }
 0xf70   : > { %v3134_v38 = vpop.xlane.xlu0 %3133  ;;  %3172 = vadd.xlane.f32.xlu0 %v3171_v52  ;;  %3460 = vmatpush.msra.mxu0 %v2952_v28 }
 0xf71   : > { %v3141_v63 = vmul.f32 %v3134_v38, %v5117_v54 }
 0xf73   : > { %v6322_v3 = vsub.f32 %v3113_v32, %v3141_v63 }
 0xf75   : > { %v3155_v47 = vmul.f32 %v6322_v3, %v6322_v3 }
 0xf77   : > { %v3174_v59 = vsel %vm818_vm1, %v3155_v47, 0.0  ;;  %v2951_v47 = vld [vmem:[%s6744_s9 + $0x40] sm:$0xff] }
 0xf78   : > { %3175 = vadd.xlane.f32.xlu1 %v3174_v59  ;;  %3461 = vmatpush.msra.mxu0 %v2951_v47 }
 0xfbb   : > { %v3158_v6 = vpop.xlane.xlu2 %3157 }
 0xfbc   : > { %v3177_v33 = vmul.f32 %v3158_v6, %v5117_v54 }
 0xfbe   : > { %v3184_v56 = vadd.f32 1e-05, %v3177_v33 }
 0xfc0   : > { %4465 = vrsqrt.f32 %v3184_v56  ;;  %vm3197_vm0 = vweird.f32 %v3184_v56 }
 0xfc3   : > { %v3161_v12 = vpop.xlane.xlu2 %3160 }
 0xfc4   : > { %v3178_v36 = vmul.f32 %v3161_v12, %v5117_v54 }
 0xfc6   : > { %v4466_v26 = vpop.eup %4465  ;;  %v3185_v40 = vadd.f32 1e-05, %v3178_v36 }
 0xfc7   : > { %v3192_v5 = vmul.f32 %v4466_v26, %v3184_v56  ;;  %vm3198_vm3 = vweird.f32 %v4466_v26 }
 0xfc8   : > { %4467 = vrsqrt.f32 %v3185_v40  ;;  %vm3199_vm4 = vmor %vm3197_vm0, %vm3198_vm3  ;;  %vm3207_vm12 = vweird.f32 %v3185_v40 }
 0xfc9   : > { %v3193_v48 = vmul.f32 %v4466_v26, %v3192_v5 }
 0xfcb   : > { %v3194_v32 = vmul.f32 0.5, %v3193_v48  ;;  %v3164_v27 = vpop.xlane.xlu0 %3163 }
 0xfcc   : > { %v3179_v18 = vmul.f32 %v3164_v27, %v5117_v54 }
 0xfcd   : > { %v3195_v43 = vsub.f32 1.5, %v3194_v32 }
 0xfce   : > { %v4468_v2 = vpop.eup %4467  ;;  %v3186_v10 = vadd.f32 1e-05, %v3179_v18 }
 0xfcf   : > { %v3196_v0 = vmul.f32 %v4466_v26, %v3195_v43  ;;  %v3202_v20 = vmul.f32 %v4468_v2, %v3185_v40  ;;  %vm3208_vm6 = vweird.f32 %v4468_v2 }
 0xfd0   : > { %4469 = vrsqrt.f32 %v3186_v10  ;;  %vm3209_vm9 = vmor %vm3207_vm12, %vm3208_vm6  ;;  %vm3217_vm15 = vweird.f32 %v3186_v10 }
 0xfd1   : > { %v3200_v14 = vsel %vm3199_vm4, %v4466_v26, %v3196_v0  ;;  %v3203_v50 = vmul.f32 %v4468_v2, %v3202_v20 }
 0xfd2   : > { %v3261_v19 = vmul.f32 %v3200_v14, %v6286_v41 }
 0xfd3   : > { %v3204_v42 = vmul.f32 0.5, %v3203_v50  ;;  %v3167_v49 = vpop.xlane.xlu1 %3166 }
 0xfd4   : > { %v3269_v17 = vmul.f32 %v6331_v51, %v3261_v19  ;;  %v3180_v23 = vmul.f32 %v3167_v49, %v5117_v54 }
 0xfd5   : > { %v3205_v22 = vsub.f32 1.5, %v3204_v42 }
 0xfd6   : > { %v4470_v53 = vpop.eup %4469  ;;  %v6346_v41 = vadd.f32 %v6334_v34, %v3269_v17  ;;  %v3187_v15 = vadd.f32 1e-05, %v3180_v23 }
 0xfd7   : > { %v3206_v62 = vmul.f32 %v4468_v2, %v3205_v22  ;;  %v3212_v61 = vmul.f32 %v4470_v53, %v3186_v10  ;;  %vm3218_vm14 = vweird.f32 %v4470_v53 }
 0xfd8   : > { %v4181_v52 = vmul.f32 -1.442695, %v6346_v41  ;;  %4471 = vrsqrt.f32 %v3187_v15  ;;  %vm3219_vm10 = vmor %vm3217_vm15, %vm3218_vm14  ;;  %vm3227_vm5 = vweird.f32 %v3187_v15 }
 0xfd9   : > { %v3210_v38 = vsel %vm3209_vm9, %v4468_v2, %v3206_v62  ;;  %v3213_v63 = vmul.f32 %v4470_v53, %v3212_v61 }
 0xfda   : > { %4473 = vpow2.f32 %v4181_v52  ;;  %v3262_v59 = vmul.f32 %v3210_v38, %v6292_v8 }
 0xfdb   : > { %v3214_v6 = vmul.f32 0.5, %v3213_v63  ;;  %v3170_v33 = vpop.xlane.xlu2 %3169 }
 0xfdc   : > { %v3181_v56 = vmul.f32 %v3170_v33, %v5117_v54  ;;  %v3270_v12 = vmul.f32 %v6331_v51, %v3262_v59 }
 0xfdd   : > { %v3215_v36 = vsub.f32 1.5, %v3214_v6 }
 0xfde   : > { %v4472_v26 = vpop.eup %4471  ;;  %v3188_v40 = vadd.f32 1e-05, %v3181_v56  ;;  %v6359_v5 = vadd.f32 %v6334_v34, %v3270_v12 }
 0xfdf   : > { %v3216_v48 = vmul.f32 %v4470_v53, %v3215_v36  ;;  %v3222_v32 = vmul.f32 %v4472_v26, %v3187_v15  ;;  %vm3228_vm7 = vweird.f32 %v4472_v26 }
 0xfe0   : > { %v4474_v27 = vpop.eup %4473  ;;  %4475 = vrsqrt.f32 %v3188_v40  ;;  %v4182_v8 = vmul.f32 -1.442695, %v6359_v5  ;;  %vm3229_vm8 = vmor %vm3227_vm5, %vm3228_vm7  ;;  %vm3237_vm3 = vweird.f32 %v3188_v40 }
 0xfe1   : > { %v3305_v18 = vadd.f32 1.0, %v4474_v27  ;;  %v3220_v43 = vsel %vm3219_vm10, %v4470_v53, %v3216_v48  ;;  %v3223_v2 = vmul.f32 %v4472_v26, %v3222_v32 }
 0xfe2   : > { %v3263_v0 = vmul.f32 %v3220_v43, %v6298_v4  ;;  %4477 = vpow2.f32 %v4182_v8 }
 0xfe3   : > { %4479 = vrcp.f32 %v3305_v18  ;;  %v3224_v20 = vmul.f32 0.5, %v3223_v2  ;;  %v3173_v14 = vpop.xlane.xlu0 %3172  ;;  %v3323_v59 = vand.u32 2147483648, %v3305_v18  ;;  %v3321_v56 = vand.u32 2147483647, %v3305_v18 }
 0xfe4   : > { %v3182_v50 = vmul.f32 %v3173_v14, %v5117_v54  ;;  %v3271_v19 = vmul.f32 %v6331_v51, %v3263_v0  ;;  %vm3317_vm4 = vweird.f32 %v3305_v18 }
 0xfe5   : > { %v3225_v10 = vsub.f32 1.5, %v3224_v20  ;;  %v3324_v43 = vor.u32 1.1754944e-38, %v3323_v59  ;;  %vm3322_vm12 = vcmp.eq.f32.partialorder %v3321_v56, 8.507059e+37 }
 0xfe6   : > { %v4476_v42 = vpop.eup %4475  ;;  %v6365_v49 = vadd.f32 1e-05, %v3182_v50  ;;  %v6368_v39 = vadd.f32 %v6334_v34, %v3271_v19 }
 0xfe7   : > { %v3226_v17 = vmul.f32 %v4472_v26, %v3225_v10  ;;  %v3232_v23 = vmul.f32 %v4476_v42, %v3188_v40  ;;  %vm3238_vm11 = vweird.f32 %v4476_v42 }
 0xfe8   : > { %v4478_v4 = vpop.eup %4477  ;;  %4481 = vrsqrt.f32 %v6365_v49  ;;  %v4183_v22 = vmul.f32 -1.442695, %v6368_v39  ;;  %vm3239_vm0 = vmor %vm3237_vm3, %vm3238_vm11  ;;  %vm3247_vm15 = vweird.f32 %v6365_v49 }
 0xfe9   : > { %v4480_v25 = vpop.eup %4479  ;;  %v3230_v53 = vsel %vm3229_vm8, %v4472_v26, %v3226_v17  ;;  %v3233_v62 = vmul.f32 %v4476_v42, %v3232_v23  ;;  %v6372_v61 = vadd.f32 1.0, %v4478_v4 }
 0xfea   : > { %v3264_v28 = vmul.f32 %v3230_v53, %v6304_v16  ;;  %v3313_v52 = vmul.f32 %v4480_v25, %v3305_v18  ;;  %4483 = vpow2.f32 %v4183_v22  ;;  %vm3318_vm2 = vweird.f32 %v4480_v25 }
 0xfeb   : > { %v3234_v38 = vmul.f32 0.5, %v3233_v62  ;;  %v3176_v63 = vpop.xlane.xlu1 %3175  ;;  %4485 = vrcp.f32 %v6372_v61  ;;  %vm3319_vm6 = vmor %vm3317_vm4, %vm3318_vm2  ;;  %vm3332_vm7 = vweird.f32 %v6372_v61 }
 0xfec   : > { %v3183_v15 = vmul.f32 %v3176_v63, %v5117_v54  ;;  %v3314_v47 = vsub.f32 1.0, %v3313_v52  ;;  %v3272_v6 = vmul.f32 %v6331_v51, %v3264_v28 }
 0xfed   : > { %v3235_v33 = vsub.f32 1.5, %v3234_v38 }
 0xfee   : > { %v4482_v12 = vpop.eup %4481  ;;  %v6378_v36 = vadd.f32 1e-05, %v3183_v15  ;;  %v3315_v26 = vmul.f32 %v4480_v25, %v3314_v47  ;;  %v6381_v16 = vadd.f32 %v6334_v34, %v3272_v6 }
 0xfef   : > { %v3236_v48 = vmul.f32 %v4476_v42, %v3235_v33  ;;  %v3242_v32 = vmul.f32 %v4482_v12, %v6365_v49  ;;  %vm3248_vm9 = vweird.f32 %v4482_v12 }
 0xff0   : > { %v4484_v27 = vpop.eup %4483  ;;  %4487 = vrsqrt.f32 %v6378_v36  ;;  %v3316_v8 = vadd.f32 %v4480_v25, %v3315_v26  ;;  %v4184_v50 = vmul.f32 -1.442695, %v6381_v16  ;;  %vm3249_vm10 = vmor %vm3247_vm15, %vm3248_vm9  ;;  %vm3257_vm3 = vweird.f32 %v6378_v36 }
 0xff1   : > { %v4486_v2 = vpop.eup %4485  ;;  %v3240_v0 = vsel %vm3239_vm0, %v4476_v42, %v3236_v48  ;;  %v3243_v20 = vmul.f32 %v4482_v12, %v3242_v32  ;;  %v6385_v14 = vadd.f32 1.0, %v4484_v27  ;;  %v3338_v42 = vand.u32 2147483648, %v6372_v61 }
 0xff2   : > { %v3265_v19 = vmul.f32 %v3240_v0, %v6310_v13  ;;  %v3320_v40 = vsel %vm3319_vm6, %v4480_v25, %v3316_v8  ;;  %v3328_v10 = vmul.f32 %v4486_v2, %v6372_v61  ;;  %vm3333_vm14 = vweird.f32 %v4486_v2 }
 0xff3   : > { %v3244_v17 = vmul.f32 0.5, %v3243_v20  ;;  %v3325_v23 = vsel %vm3322_vm12, %v3324_v43, %v3320_v40  ;;  %4489 = vrcp.f32 %v6385_v14  ;;  %v3336_v25 = vand.u32 2147483647, %v6372_v61  ;;  %vm3334_vm5 = vmor %vm3332_vm7, %vm3333_vm14 }
 0xff4   : > { %v3417_v18 = vmul.f32 %v3325_v23, %v6346_v41  ;;  %v3329_v4 = vsub.f32 1.0, %v3328_v10  ;;  %4491 = vpow2.f32 %v4184_v50  ;;  %v3273_v53 = vmul.f32 %v6331_v51, %v3265_v19 }
 0xff5   : > { %v3245_v22 = vsub.f32 1.5, %v3244_v17  ;;  %v3339_v59 = vor.u32 1.1754944e-38, %v3338_v42  ;;  %vm3337_vm8 = vcmp.eq.f32.partialorder %v3336_v25, 8.507059e+37  ;;  %v3353_v0 = vand.u32 2147483648, %v6385_v14 }
 0xff6   : > { %v4488_v62 = vpop.eup %4487  ;;  %4188 = vmatmul.msk.f32.vlgmr.msra.gmra.mxu0 %vm818_vm1, %v3417_v18  ;;  %v3330_v13 = vmul.f32 %v4486_v2, %v3329_v4  ;;  %v6399_v52 = vadd.f32 %v6334_v34, %v3273_v53  ;;  %vm3347_vm4 = vweird.f32 %v6385_v14 }
 0xff7   : > { %v3246_v28 = vmul.f32 %v4482_v12, %v3245_v22  ;;  %v3252_v41 = vmul.f32 %v4488_v62, %v6378_v36  ;;  %vm3258_vm11 = vweird.f32 %v4488_v62  ;;  %v3354_v10 = vor.u32 1.1754944e-38, %v3353_v0 }
 0xff8   : > { %v3331_v38 = vadd.f32 %v4486_v2, %v3330_v13  ;;  %v4185_v6 = vmul.f32 -1.442695, %v6399_v52  ;;  %vm3259_vm0 = vmor %vm3257_vm3, %vm3258_vm11 }
 0xff9   : > { %v4490_v63 = vpop.eup %4489  ;;  %v3250_v15 = vsel %vm3249_vm10, %v4482_v12, %v3246_v28  ;;  %v3253_v47 = vmul.f32 %v4488_v62, %v3252_v41 }
 0xffa   : > { %v3266_v33 = vmul.f32 %v3250_v15, %v6316_v45  ;;  %v3335_v56 = vsel %vm3334_vm5, %v4486_v2, %v3331_v38  ;;  %v3343_v49 = vmul.f32 %v4490_v63, %v6385_v14  ;;  %v4492_v26 = vpop.eup %4491  ;;  %4493 = vpow2.f32 %v4185_v6 }
 0xffb   : > { %v3254_v48 = vmul.f32 0.5, %v3253_v47  ;;  %v3340_v32 = vsel %vm3337_vm8, %v3339_v59, %v3335_v56  ;;  %v3308_v8 = vadd.f32 1.0, %v4492_v26  ;;  %vm3348_vm2 = vweird.f32 %v4490_v63 }
 0xffc   : > { %v3418_v27 = vmul.f32 %v3340_v32, %v6359_v5  ;;  %v3344_v61 = vsub.f32 1.0, %v3343_v49  ;;  %v3274_v12 = vmul.f32 %v6331_v51, %v3266_v33  ;;  %v3351_v2 = vand.u32 2147483647, %v6385_v14  ;;  %vm3349_vm6 = vmor %vm3347_vm4, %vm3348_vm2 }
 0xffd   : > { %v3255_v43 = vsub.f32 1.5, %v3254_v48  ;;  %4495 = vrcp.f32 %v3308_v8  ;;  %v3368_v25 = vand.u32 2147483648, %v3308_v8  ;;  %v3366_v41 = vand.u32 2147483647, %v3308_v8 }
 0xffe   : > { %4189 = vmatmul.msk.f32.gmra.mxu0 %vm818_vm1, %v3418_v27  ;;  %v3345_v45 = vmul.f32 %v4490_v63, %v3344_v61  ;;  %v6412_v5 = vadd.f32 %v6334_v34, %v3274_v12  ;;  %vm3352_vm12 = vcmp.eq.f32.partialorder %v3351_v2, 8.507059e+37  ;;  %vm3362_vm14 = vweird.f32 %v3308_v8 }
 0xfff   : > { %v3256_v20 = vmul.f32 %v4488_v62, %v3255_v43  ;;  %vm3367_vm10 = vcmp.eq.f32.partialorder %v3366_v41, 8.507059e+37 }
0x1000   : > { %v3346_v50 = vadd.f32 %v4490_v63, %v3345_v45  ;;  %v4494_v19 = vpop.eup %4493  ;;  %v4186_v17 = vmul.f32 -1.442695, %v6412_v5 }
0x1001   : > { %v3260_v40 = vsel %vm3259_vm0, %v4488_v62, %v3256_v20  ;;  %v3309_v4 = vadd.f32 1.0, %v4494_v19 }
0x1002   : > { %v3267_v23 = vmul.f32 %v3260_v40, %v6322_v3  ;;  %v3350_v18 = vsel %vm3349_vm6, %v4490_v63, %v3346_v50  ;;  %4497 = vpow2.f32 %v4186_v17 }
0x1003   : > { %v3355_v42 = vsel %vm3352_vm12, %v3354_v10, %v3350_v18  ;;  %v4496_v36 = vpop.eup %4495  ;;  %4499 = vrcp.f32 %v3309_v4  ;;  %v3383_v33 = vand.u32 2147483648, %v3309_v4  ;;  %v3381_v26 = vand.u32 2147483647, %v3309_v4 }
0x1004   : > { %v3419_v22 = vmul.f32 %v3355_v42, %v6368_v39  ;;  %v3358_v53 = vmul.f32 %v4496_v36, %v3308_v8  ;;  %v3275_v14 = vmul.f32 %v6331_v51, %v3267_v23  ;;  %vm3363_vm9 = vweird.f32 %v4496_v36 }
0x1005   : > { %vm3364_vm15 = vmor %vm3362_vm14, %vm3363_vm9  ;;  %v3369_v51 = vor.u32 1.1754944e-38, %v3368_v25  ;;  %vm3377_vm5 = vweird.f32 %v3309_v4  ;;  %v3384_v61 = vor.u32 1.1754944e-38, %v3383_v33  ;;  %vm3382_vm11 = vcmp.eq.f32.partialorder %v3381_v26, 8.507059e+37 }
0x1006   : > { %4190 = vmatmul.msk.f32.gmra.mxu0 %vm818_vm1, %v3419_v22  ;;  %v3359_v62 = vsub.f32 1.0, %v3358_v53  ;;  %v6421_v13 = vadd.f32 %v6334_v34, %v3275_v14 }
0x1008   : > { %v4498_v3 = vpop.eup %4497  ;;  %v3360_v28 = vmul.f32 %v4496_v36, %v3359_v62  ;;  %v4187_v38 = vmul.f32 -1.442695, %v6421_v13 }
0x1009   : > { %v4500_v63 = vpop.eup %4499  ;;  %v3310_v15 = vadd.f32 1.0, %v4498_v3 }
0x100a   : > { %v3361_v39 = vadd.f32 %v4496_v36, %v3360_v28  ;;  %v3373_v47 = vmul.f32 %v4500_v63, %v3309_v4  ;;  %4501 = vpow2.f32 %v4187_v38  ;;  %vm3378_vm7 = vweird.f32 %v4500_v63 }
0x100b   : > { %4503 = vrcp.f32 %v3310_v15  ;;  %vm3379_vm8 = vmor %vm3377_vm5, %vm3378_vm7  ;;  %v3398_v2 = vand.u32 2147483648, %v3310_v15  ;;  %v3396_v50 = vand.u32 2147483647, %v3310_v15  ;;  %vm3392_vm3 = vweird.f32 %v3310_v15 }
0x100c   : > { %v3365_v59 = vsel %vm3364_vm15, %v4496_v36, %v3361_v39  ;;  %v3374_v34 = vsub.f32 1.0, %v3373_v47 }
0x100d   : > { %v3370_v6 = vsel %vm3367_vm10, %v3369_v51, %v3365_v59  ;;  %v3399_v10 = vor.u32 1.1754944e-38, %v3398_v2  ;;  %vm3397_vm4 = vcmp.eq.f32.partialorder %v3396_v50, 8.507059e+37 }
0x100e   : > { %v3420_v56 = vmul.f32 %v3370_v6, %v6381_v16  ;;  %v3375_v49 = vmul.f32 %v4500_v63, %v3374_v34 }
0x1010   : > { %v4502_v48 = vpop.eup %4501  ;;  %4191 = vmatmul.msk.f32.gmra.mxu0 %vm818_vm1, %v3420_v56  ;;  %v3376_v32 = vadd.f32 %v4500_v63, %v3375_v49 }
0x1011   : > { %v4504_v27 = vpop.eup %4503  ;;  %v3311_v8 = vadd.f32 1.0, %v4502_v48 }
0x1012   : > { %v3380_v12 = vsel %vm3379_vm8, %v4500_v63, %v3376_v32  ;;  %v3388_v43 = vmul.f32 %v4504_v27, %v3310_v15  ;;  %vm3393_vm2 = vweird.f32 %v4504_v27  ;;  %v3424_v63 = vperm.slane %v6237_v29, 5 }
0x1013   : > { %v3385_v0 = vsel %vm3382_vm11, %v3384_v61, %v3380_v12  ;;  %4505 = vrcp.f32 %v3311_v8  ;;  %vm3394_vm0 = vmor %vm3392_vm3, %vm3393_vm2  ;;  %v3411_v22 = vand.u32 2147483647, %v3311_v8  ;;  %vm3407_vm12 = vweird.f32 %v3311_v8 }
0x1014   : > { %v3421_v45 = vmul.f32 %v3385_v0, %v6399_v52  ;;  %v3389_v16 = vsub.f32 1.0, %v3388_v43  ;;  %v3413_v52 = vand.u32 2147483648, %v3311_v8 }
0x1015   : > { %vm3412_vm14 = vcmp.eq.f32.partialorder %v3411_v22, 8.507059e+37 }
0x1016   : > { %v3390_v20 = vmul.f32 %v4504_v27, %v3389_v16  ;;  %v3414_v14 = vor.u32 1.1754944e-38, %v3413_v52 }
0x1018   : > { %4192 = vmatmul.msk.f32.gmra.mxu0 %vm818_vm1, %v3421_v45  ;;  %v3391_v19 = vadd.f32 %v4504_v27, %v3390_v20 }
0x1019   : > { %v4506_v40 = vpop.eup %4505 }
0x101a   : > { %v3395_v17 = vsel %vm3394_vm0, %v4504_v27, %v3391_v19  ;;  %v3403_v23 = vmul.f32 %v4506_v40, %v3311_v8  ;;  %vm3408_vm6 = vweird.f32 %v4506_v40 }
0x101b   : > { %v3400_v18 = vsel %vm3397_vm4, %v3399_v10, %v3395_v17  ;;  %vm3409_vm9 = vmor %vm3407_vm12, %vm3408_vm6 }
0x101c   : > { %v3422_v4 = vmul.f32 %v3400_v18, %v6412_v5  ;;  %v3404_v42 = vsub.f32 1.0, %v3403_v23 }
0x101e   : > { %v3405_v36 = vmul.f32 %v4506_v40, %v3404_v42 }
0x1020   : > { %4193 = vmatmul.msk.f32.gmra.mxu0 %vm818_vm1, %v3422_v4  ;;  %v3406_v53 = vadd.f32 %v4506_v40, %v3405_v36 }
0x1022   : > { %v3410_v62 = vsel %vm3409_vm9, %v4506_v40, %v3406_v53 }
0x1023   : > { %v3415_v25 = vsel %vm3412_vm14, %v3414_v14, %v3410_v62 }
0x1024   : > { %v3423_v3 = vmul.f32 %v3415_v25, %v6421_v13 }
0x1028   : > { %4194 = vmatmul.msk.f32.gmra.mxu0 %vm818_vm1, %v3423_v3 }
0x1073   : > { %v3463_v28 = vpop.f32.mrf.mxu0 }
0x1074   : > { %v3464_v61 = vadd.f32 %v3463_v28, %v3424_v63 }
0x1076   : > { %v3484_v8 = vsel %vm818_vm1, %v3464_v61, 0.0 }
0x107b   : > { %v3466_v5 = vpop.f32.mrf.mxu0 }
0x107c   : > { %v3467_v51 = vadd.f32 %v3466_v5, %v3424_v63 }
0x107e   : > { %v3487_v13 = vsel %vm818_vm1, %v3467_v51, 0.0 }
0x1083   : > { %v3469_v41 = vpop.f32.mrf.mxu0 }
0x1084   : > { %v3470_v33 = vadd.f32 %v3469_v41, %v3424_v63 }
0x1086   : > { %v3490_v48 = vsel %vm818_vm1, %v3470_v33, 0.0 }
0x108d   : > { %v3472_v38 = vpop.f32.mrf.mxu0 }
0x108e   : > { %v3473_v32 = vadd.f32 %v3472_v38, %v3424_v63 }
0x1090   : > { %v3493_v27 = vsel %vm818_vm1, %v3473_v32, 0.0 }
0x1095   : > { %v3475_v15 = vpop.f32.mrf.mxu0 }
0x1096   : > { %v3476_v39 = vadd.f32 %v3475_v15, %v3424_v63 }
0x1098   : > { %v3496_v47 = vsel %vm818_vm1, %v3476_v39, 0.0 }
0x1099   : > { %3497 = vadd.xlane.f32.xlu1 %v3496_v47 }
0x109d   : > { %v3478_v59 = vpop.f32.mrf.mxu0 }
0x109e   : > { %v3479_v34 = vadd.f32 %v3478_v59, %v3424_v63 }
0x10a0   : > { %v3499_v6 = vsel %vm818_vm1, %v3479_v34, 0.0 }
0x10a1   : > { %3500 = vadd.xlane.f32.xlu0 %v3499_v6  ;;  %3488 = vadd.xlane.f32.xlu1 %v3487_v13 }
0x10a5   : > { %v3481_v56 = vpop.f32.mrf.mxu0 }
0x10a6   : > { %v3482_v49 = vadd.f32 %v3481_v56, %v3424_v63 }
0x10a8   : > { %v3502_v26 = vsel %vm818_vm1, %v3482_v49, 0.0 }
0x10a9   : > { %3503 = vadd.xlane.f32.xlu2 %v3502_v26  ;;  %3491 = vadd.xlane.f32.xlu0 %v3490_v48 }
0x10b1   : > { %3494 = vadd.xlane.f32.xlu2 %v3493_v27 }
0x10b9   : > { %3485 = vadd.xlane.f32.xlu2 %v3484_v8 }
0x110c   : > { %v3498_v12 = vpop.xlane.xlu1 %3497 }
0x110d   : > { %v3509_v43 = vmul.f32 %v3498_v12, %v5117_v54 }
0x110f   : > { %v6441_v0 = vsub.f32 %v3476_v39, %v3509_v43 }
0x1111   : > { %v3523_v45 = vmul.f32 %v6441_v0, %v6441_v0 }
0x1113   : > { %v3538_v16 = vsel %vm818_vm1, %v3523_v45, 0.0 }
0x1114   : > { %v3501_v2 = vpop.xlane.xlu0 %3500  ;;  %3539 = vadd.xlane.f32.xlu2 %v3538_v16  ;;  %v3489_v20 = vpop.xlane.xlu1 %3488 }
0x1115   : > { %v3510_v50 = vmul.f32 %v3501_v2, %v5117_v54  ;;  %v3506_v19 = vmul.f32 %v3489_v20, %v5117_v54 }
0x1117   : > { %v6448_v40 = vsub.f32 %v3479_v34, %v3510_v50  ;;  %v6450_v10 = vsub.f32 %v3467_v51, %v3506_v19 }
0x1119   : > { %v3524_v17 = vmul.f32 %v6448_v40, %v6448_v40  ;;  %v3520_v23 = vmul.f32 %v6450_v10, %v6450_v10 }
0x111b   : > { %v3541_v18 = vsel %vm818_vm1, %v3524_v17, 0.0  ;;  %v3529_v4 = vsel %vm818_vm1, %v3520_v23, 0.0 }
0x111c   : > { %v3504_v42 = vpop.xlane.xlu2 %3503  ;;  %v3492_v52 = vpop.xlane.xlu0 %3491  ;;  %3542 = vadd.xlane.f32.xlu1 %v3541_v18  ;;  %3530 = vadd.xlane.f32.xlu2 %v3529_v4 }
0x111d   : > { %v3511_v36 = vmul.f32 %v3504_v42, %v5117_v54  ;;  %v3507_v22 = vmul.f32 %v3492_v52, %v5117_v54 }
0x111f   : > { %v6460_v53 = vsub.f32 %v3482_v49, %v3511_v36  ;;  %v6462_v14 = vsub.f32 %v3470_v33, %v3507_v22  ;;  %v6493_v36 = vperm.slane %v6237_v29, 6 }
0x1121   : > { %v3525_v62 = vmul.f32 %v6460_v53, %v6460_v53  ;;  %v3521_v25 = vmul.f32 %v6462_v14, %v6462_v14 }
0x1123   : > { %v3544_v3 = vsel %vm818_vm1, %v3525_v62, 0.0  ;;  %v3532_v28 = vsel %vm818_vm1, %v3521_v25, 0.0 }
0x1124   : > { %v3495_v5 = vpop.xlane.xlu2 %3494  ;;  %3545 = vadd.xlane.f32.xlu0 %v3544_v3  ;;  %3533 = vadd.xlane.f32.xlu1 %v3532_v28  ;;  %v6498_v28 = vperm.slane %v6237_v29, 7 }
0x1125   : > { %v3508_v41 = vmul.f32 %v3495_v5, %v5117_v54 }
0x1127   : > { %v6471_v38 = vsub.f32 %v3473_v32, %v3508_v41 }
0x1129   : > { %v3522_v63 = vmul.f32 %v6471_v38, %v6471_v38 }
0x112b   : > { %v3535_v15 = vsel %vm818_vm1, %v3522_v63, 0.0 }
0x112c   : > { %v3486_v39 = vpop.xlane.xlu2 %3485  ;;  %3536 = vadd.xlane.f32.xlu0 %v3535_v15 }
0x112d   : > { %v3505_v47 = vmul.f32 %v3486_v39, %v5117_v54 }
0x112f   : > { %v6477_v51 = vsub.f32 %v3464_v61, %v3505_v47 }
0x1131   : > { %v3519_v59 = vmul.f32 %v6477_v51, %v6477_v51 }
0x1133   : > { %v3526_v34 = vsel %vm818_vm1, %v3519_v59, 0.0 }
0x1134   : > { %3527 = vadd.xlane.f32.xlu0 %v3526_v34 }
0x1187   : > { %v3540_v6 = vpop.xlane.xlu2 %3539 }
0x1188   : > { %v3551_v13 = vmul.f32 %v3540_v6, %v5117_v54 }
0x118a   : > { %v3558_v33 = vadd.f32 1e-05, %v3551_v13 }
0x118c   : > { %4507 = vrsqrt.f32 %v3558_v33  ;;  %vm3607_vm10 = vweird.f32 %v3558_v33 }
0x118f   : > { %v3531_v56 = vpop.xlane.xlu2 %3530  ;;  %v3543_v49 = vpop.xlane.xlu1 %3542 }
0x1190   : > { %v3548_v26 = vmul.f32 %v3531_v56, %v5117_v54  ;;  %v3552_v48 = vmul.f32 %v3543_v49, %v5117_v54 }
0x1192   : > { %v4508_v32 = vpop.eup %4507  ;;  %v3555_v27 = vadd.f32 1e-05, %v3548_v26  ;;  %v3559_v61 = vadd.f32 1e-05, %v3552_v48 }
0x1193   : > { %v3602_v8 = vmul.f32 %v4508_v32, %v3558_v33  ;;  %vm3608_vm15 = vweird.f32 %v4508_v32 }
0x1194   : > { %4509 = vrsqrt.f32 %v3555_v27  ;;  %vm3609_vm7 = vmor %vm3607_vm10, %vm3608_vm15  ;;  %vm3577_vm11 = vweird.f32 %v3555_v27  ;;  %vm3617_vm3 = vweird.f32 %v3559_v61 }
0x1195   : > { %v3603_v12 = vmul.f32 %v4508_v32, %v3602_v8  ;;  %4511 = vrsqrt.f32 %v3559_v61 }
0x1197   : > { %v3604_v43 = vmul.f32 0.5, %v3603_v12  ;;  %v3546_v45 = vpop.xlane.xlu0 %3545  ;;  %v3534_v16 = vpop.xlane.xlu1 %3533 }
0x1198   : > { %v3553_v2 = vmul.f32 %v3546_v45, %v5117_v54  ;;  %v3549_v20 = vmul.f32 %v3534_v16, %v5117_v54 }
0x1199   : > { %v3605_v50 = vsub.f32 1.5, %v3604_v43 }
0x119a   : > { %v4510_v19 = vpop.eup %4509  ;;  %v6487_v17 = vadd.f32 1e-05, %v3553_v2  ;;  %v6489_v23 = vadd.f32 1e-05, %v3549_v20 }
0x119b   : > { %v4512_v18 = vpop.eup %4511  ;;  %v3606_v4 = vmul.f32 %v4508_v32, %v3605_v50  ;;  %v3572_v42 = vmul.f32 %v4510_v19, %v3555_v27  ;;  %vm3578_vm5 = vweird.f32 %v4510_v19 }
0x119c   : > { %v3612_v52 = vmul.f32 %v4512_v18, %v3559_v61  ;;  %4513 = vrsqrt.f32 %v6487_v17  ;;  %vm3618_vm8 = vweird.f32 %v4512_v18  ;;  %vm3579_vm2 = vmor %vm3577_vm11, %vm3578_vm5  ;;  %vm3627_vm12 = vweird.f32 %v6487_v17 }
0x119d   : > { %v3610_v22 = vsel %vm3609_vm7, %v4508_v32, %v3606_v4  ;;  %v3573_v62 = vmul.f32 %v4510_v19, %v3572_v42  ;;  %4515 = vrsqrt.f32 %v6489_v23  ;;  %vm3619_vm0 = vmor %vm3617_vm3, %vm3618_vm8  ;;  %vm3587_vm14 = vweird.f32 %v6489_v23 }
0x119e   : > { %v3635_v25 = vmul.f32 %v3610_v22, %v6441_v0  ;;  %v3613_v3 = vmul.f32 %v4512_v18, %v3612_v52 }
0x119f   : > { %v3574_v5 = vmul.f32 0.5, %v3573_v62  ;;  %v3537_v41 = vpop.xlane.xlu0 %3536 }
0x11a0   : > { %v3614_v63 = vmul.f32 0.5, %v3613_v3  ;;  %v3550_v15 = vmul.f32 %v3537_v41, %v5117_v54  ;;  %v3643_v39 = vmul.f32 %v6493_v36, %v3635_v25 }
0x11a1   : > { %v3575_v47 = vsub.f32 1.5, %v3574_v5 }
0x11a2   : > { %v4514_v59 = vpop.eup %4513  ;;  %v3615_v34 = vsub.f32 1.5, %v3614_v63  ;;  %v6502_v6 = vadd.f32 1e-05, %v3550_v15  ;;  %v6505_v0 = vadd.f32 %v6498_v28, %v3643_v39 }
0x11a3   : > { %v4516_v13 = vpop.eup %4515  ;;  %v3576_v29 = vmul.f32 %v4510_v19, %v3575_v47  ;;  %v3622_v33 = vmul.f32 %v4514_v59, %v6487_v17  ;;  %vm3628_vm4 = vweird.f32 %v4514_v59 }
0x11a4   : > { %v3616_v56 = vmul.f32 %v4512_v18, %v3615_v34  ;;  %v3582_v49 = vmul.f32 %v4516_v13, %v6489_v23  ;;  %4517 = vrsqrt.f32 %v6502_v6  ;;  %v4199_v32 = vmul.f32 -1.442695, %v6505_v0  ;;  %vm3629_vm9 = vmor %vm3627_vm12, %vm3628_vm4 }
0x11a5   : > { %v3580_v26 = vsel %vm3579_vm2, %v4510_v19, %v3576_v29  ;;  %v3623_v48 = vmul.f32 %v4514_v59, %v3622_v33  ;;  %vm3588_vm6 = vweird.f32 %v4516_v13  ;;  %vm3597_vm7 = vweird.f32 %v6502_v6 }
0x11a6   : > { %v3632_v8 = vmul.f32 %v3580_v26, %v6450_v10  ;;  %v3620_v12 = vsel %vm3619_vm0, %v4512_v18, %v3616_v56  ;;  %v3583_v43 = vmul.f32 %v4516_v13, %v3582_v49  ;;  %4519 = vpow2.f32 %v4199_v32  ;;  %vm3589_vm15 = vmor %vm3587_vm14, %vm3588_vm6 }
0x11a7   : > { %v3636_v27 = vmul.f32 %v3620_v12, %v6448_v40  ;;  %v3624_v45 = vmul.f32 0.5, %v3623_v48  ;;  %v3528_v16 = vpop.xlane.xlu0 %3527 }
0x11a8   : > { %v3584_v2 = vmul.f32 0.5, %v3583_v43  ;;  %v3547_v61 = vmul.f32 %v3528_v16, %v5117_v54  ;;  %v3640_v20 = vmul.f32 %v6493_v36, %v3632_v8 }
0x11a9   : > { %v3625_v50 = vsub.f32 1.5, %v3624_v45  ;;  %v3644_v19 = vmul.f32 %v6493_v36, %v3636_v27 }
0x11aa   : > { %v4518_v4 = vpop.eup %4517  ;;  %v3585_v42 = vsub.f32 1.5, %v3584_v2  ;;  %v3554_v10 = vadd.f32 1e-05, %v3547_v61  ;;  %v6517_v18 = vadd.f32 %v6498_v28, %v3640_v20 }
0x11ab   : > { %v3626_v40 = vmul.f32 %v4514_v59, %v3625_v50  ;;  %v3592_v52 = vmul.f32 %v4518_v4, %v6502_v6  ;;  %v6522_v54 = vadd.f32 %v6498_v28, %v3644_v19  ;;  %vm3598_vm10 = vweird.f32 %v4518_v4 }
0x11ac   : > { %v3586_v22 = vmul.f32 %v4516_v13, %v3585_v42  ;;  %4521 = vrsqrt.f32 %v3554_v10  ;;  %v4196_v62 = vmul.f32 -1.442695, %v6517_v18  ;;  %v4520_v25 = vpop.eup %4519  ;;  %vm3599_vm5 = vmor %vm3597_vm7, %vm3598_vm10  ;;  %vm3567_vm11 = vweird.f32 %v3554_v10 }
0x11ad   : > { %v3630_v3 = vsel %vm3629_vm9, %v4514_v59, %v3626_v40  ;;  %v3593_v5 = vmul.f32 %v4518_v4, %v3592_v52  ;;  %v4200_v41 = vmul.f32 -1.442695, %v6522_v54  ;;  %v3679_v15 = vadd.f32 1.0, %v4520_v25 }
0x11ae   : > { %v3637_v17 = vmul.f32 %v3630_v3, %v6460_v53  ;;  %v3590_v63 = vsel %vm3589_vm15, %v4516_v13, %v3586_v22  ;;  %4523 = vpow2.f32 %v4196_v62 }
0x11af   : > { %v3633_v39 = vmul.f32 %v3590_v63, %v6462_v14  ;;  %v3594_v47 = vmul.f32 0.5, %v3593_v5  ;;  %4525 = vpow2.f32 %v4200_v41  ;;  %v3751_v2 = vand.u32 2147483647, %v3679_v15 }
0x11b0   : > { %4527 = vrcp.f32 %v3679_v15  ;;  %v3645_v34 = vmul.f32 %v6493_v36, %v3637_v17  ;;  %v3753_v50 = vand.u32 2147483648, %v3679_v15  ;;  %vm3747_vm0 = vweird.f32 %v3679_v15 }
0x11b1   : > { %v3595_v23 = vsub.f32 1.5, %v3594_v47  ;;  %v3641_v59 = vmul.f32 %v6493_v36, %v3633_v39  ;;  %vm6547_vm4 = vcmp.eq.f32.partialorder %v3751_v2, 8.507059e+37 }
0x11b2   : > { %v4522_v29 = vpop.eup %4521  ;;  %v6533_v53 = vadd.f32 %v6498_v28, %v3645_v34  ;;  %v3754_v62 = vor.u32 1.1754944e-38, %v3753_v50 }
0x11b3   : > { %v3596_v33 = vmul.f32 %v4518_v4, %v3595_v23  ;;  %v3562_v56 = vmul.f32 %v4522_v29, %v3554_v10  ;;  %v6536_v14 = vadd.f32 %v6498_v28, %v3641_v59  ;;  %vm3568_vm8 = vweird.f32 %v4522_v29 }
0x11b4   : > { %v4524_v13 = vpop.eup %4523  ;;  %v4201_v43 = vmul.f32 -1.442695, %v6533_v53  ;;  %vm3569_vm3 = vmor %vm3567_vm11, %vm3568_vm8 }
0x11b5   : > { %v4526_v49 = vpop.eup %4525  ;;  %v3600_v26 = vsel %vm3599_vm5, %v4518_v4, %v3596_v33  ;;  %v3563_v48 = vmul.f32 %v4522_v29, %v3562_v56  ;;  %v6538_v32 = vadd.f32 1.0, %v4524_v13  ;;  %v4197_v45 = vmul.f32 -1.442695, %v6536_v14 }
0x11b6   : > { %v4528_v8 = vpop.eup %4527  ;;  %v6540_v12 = vadd.f32 1.0, %v4526_v49  ;;  %v3634_v16 = vmul.f32 %v3600_v26, %v6471_v38 }
0x11b7   : > { %v3564_v6 = vmul.f32 0.5, %v3563_v48  ;;  %v3743_v27 = vmul.f32 %v4528_v8, %v3679_v15  ;;  %4529 = vrcp.f32 %v6538_v32  ;;  %vm3748_vm2 = vweird.f32 %v4528_v8  ;;  %v6562_v15 = vld [vmem:[%s6745_s10 + $0x8] ss:$0 sm:$0xff] }
0x11b8   : > { %4531 = vrcp.f32 %v6540_v12  ;;  %v3642_v38 = vmul.f32 %v6493_v36, %v3634_v16  ;;  %v3706_v25 = vand.u32 2147483647, %v6538_v32  ;;  %vm3749_vm6 = vmor %vm3747_vm0, %vm3748_vm2  ;;  %v3708_v41 = vand.u32 2147483648, %v6538_v32 }
0x11b9   : > { %v3565_v61 = vsub.f32 1.5, %v3564_v6  ;;  %v3744_v20 = vsub.f32 1.0, %v3743_v27  ;;  %4533 = vpow2.f32 %v4201_v43  ;;  %v3766_v47 = vand.u32 2147483647, %v6540_v12 }
0x11ba   : > { %4535 = vpow2.f32 %v4197_v45  ;;  %v6557_v17 = vadd.f32 %v6498_v28, %v3642_v38  ;;  %vm3702_vm14 = vweird.f32 %v6538_v32  ;;  %vm3762_vm10 = vweird.f32 %v6540_v12 }
0x11bb   : > { %v3566_v19 = vmul.f32 %v4522_v29, %v3565_v61  ;;  %v3745_v4 = vmul.f32 %v4528_v8, %v3744_v20  ;;  %vm3707_vm7 = vcmp.eq.f32.partialorder %v3706_v25, 8.507059e+37  ;;  %vm3767_vm8 = vcmp.eq.f32.partialorder %v3766_v47, 8.507059e+37 }
0x11bd   : > { %v4530_v40 = vpop.eup %4529  ;;  %v3570_v52 = vsel %vm3569_vm3, %v4522_v29, %v3566_v19  ;;  %v3746_v22 = vadd.f32 %v4528_v8, %v3745_v4  ;;  %v4198_v29 = vmul.f32 -1.442695, %v6557_v17 }
0x11be   : > { %v4532_v10 = vpop.eup %4531  ;;  %v3631_v3 = vmul.f32 %v3570_v52, %v6477_v51  ;;  %v3698_v5 = vmul.f32 %v4530_v40, %v6538_v32  ;;  %v3768_v51 = vand.u32 2147483648, %v6540_v12  ;;  %vm3703_vm12 = vweird.f32 %v4530_v40 }
0x11bf   : > { %v3750_v63 = vsel %vm3749_vm6, %v4528_v8, %v3746_v22  ;;  %v3758_v39 = vmul.f32 %v4532_v10, %v6540_v12  ;;  %v4534_v23 = vpop.eup %4533  ;;  %vm3763_vm9 = vweird.f32 %v4532_v10  ;;  %4537 = vpow2.f32 %v4198_v29  ;;  %vm3704_vm15 = vmor %vm3702_vm14, %vm3703_vm12 }
0x11c0   : > { %v3755_v34 = vsel %vm6547_vm4, %v3754_v62, %v3750_v63  ;;  %v3699_v59 = vsub.f32 1.0, %v3698_v5  ;;  %v3639_v33 = vmul.f32 %v6493_v36, %v3631_v3  ;;  %v4536_v56 = vpop.eup %4535  ;;  %v3681_v26 = vadd.f32 1.0, %v4534_v23  ;;  %vm3764_vm5 = vmor %vm3762_vm10, %vm3763_vm9 }
0x11c1   : > { %v3791_v13 = vmul.f32 %v3755_v34, %v6505_v0  ;;  %v3759_v49 = vsub.f32 1.0, %v3758_v39  ;;  %v6572_v8 = vadd.f32 1.0, %v4536_v56  ;;  %v3709_v0 = vor.u32 1.1754944e-38, %v3708_v41 }
0x11c2   : > { %v3700_v48 = vmul.f32 %v4530_v40, %v3699_v59  ;;  %4539 = vrcp.f32 %v3681_v26  ;;  %v6576_v27 = vadd.f32 %v6498_v28, %v3639_v33  ;;  %v3769_v28 = vor.u32 1.1754944e-38, %v3768_v51 }
0x11c3   : > { %v3799_v43 = vmul.f32 %v6562_v15, %v3791_v13  ;;  %v3760_v6 = vmul.f32 %v4532_v10, %v3759_v49  ;;  %4541 = vrcp.f32 %v6572_v8  ;;  %v3781_v5 = vand.u32 2147483647, %v3681_v26 }
0x11c4   : > { %v3701_v45 = vadd.f32 %v4530_v40, %v3700_v48  ;;  %v4195_v32 = vmul.f32 -1.442695, %v6576_v27  ;;  %v3783_v41 = vand.u32 2147483648, %v3681_v26  ;;  %v3723_v39 = vand.u32 2147483648, %v6572_v8 }
0x11c5   : > { %v3814_v36 = vsel %vm818_vm1, %v3799_v43, 0.0  ;;  %v3761_v16 = vadd.f32 %v4532_v10, %v3760_v6  ;;  %v4538_v50 = vpop.eup %4537  ;;  %v3721_v23 = vand.u32 2147483647, %v6572_v8  ;;  %vm3777_vm3 = vweird.f32 %v3681_v26 }
0x11c6   : > { %3815 = vadd.xlane.f32.xlu0 %v3814_v36  ;;  %v3705_v2 = vsel %vm3704_vm15, %v4530_v40, %v3701_v45  ;;  %v3678_v52 = vadd.f32 1.0, %v4538_v50  ;;  %4543 = vpow2.f32 %v4195_v32  ;;  %vm3782_vm4 = vcmp.eq.f32.partialorder %v3781_v5, 8.507059e+37 }
0x11c7   : > { %v3710_v61 = vsel %vm3707_vm7, %v3709_v0, %v3705_v2  ;;  %v3765_v20 = vsel %vm3764_vm5, %v4532_v10, %v3761_v16  ;;  %v3784_v33 = vor.u32 1.1754944e-38, %v3783_v41  ;;  %vm3717_vm6 = vweird.f32 %v6572_v8 }
0x11c8   : > { %v3788_v19 = vmul.f32 %v3710_v61, %v6517_v18  ;;  %v3770_v4 = vsel %vm3767_vm8, %v3769_v28, %v3765_v20  ;;  %v4540_v42 = vpop.eup %4539  ;;  %4545 = vrcp.f32 %v3678_v52  ;;  %v3724_v49 = vor.u32 1.1754944e-38, %v3723_v39 }
0x11c9   : > { %v3792_v38 = vmul.f32 %v3770_v4, %v6522_v54  ;;  %v4542_v12 = vpop.eup %4541  ;;  %v3773_v22 = vmul.f32 %v4540_v42, %v3681_v26  ;;  %vm3778_vm11 = vweird.f32 %v4540_v42  ;;  %vm3722_vm9 = vcmp.eq.f32.partialorder %v3721_v23, 8.507059e+37 }
0x11ca   : > { %v3796_v40 = vmul.f32 %v6562_v15, %v3788_v19  ;;  %v3713_v25 = vmul.f32 %v4542_v12, %v6572_v8  ;;  %vm3718_vm2 = vweird.f32 %v4542_v12  ;;  %vm3779_vm0 = vmor %vm3777_vm3, %vm3778_vm11  ;;  %v3738_v16 = vand.u32 2147483648, %v3678_v52 }
0x11cb   : > { %v3800_v62 = vmul.f32 %v6562_v15, %v3792_v38  ;;  %v3774_v3 = vsub.f32 1.0, %v3773_v22  ;;  %vm3719_vm12 = vmor %vm3717_vm6, %vm3718_vm2  ;;  %v3736_v8 = vand.u32 2147483647, %v3678_v52  ;;  %vm3732_vm15 = vweird.f32 %v3678_v52 }
0x11cc   : > { %v3805_v10 = vsel %vm818_vm1, %v3796_v40, 0.0  ;;  %v3714_v63 = vsub.f32 1.0, %v3713_v25  ;;  %v4544_v47 = vpop.eup %4543  ;;  %v3739_v19 = vor.u32 1.1754944e-38, %v3738_v16  ;;  %v6611_v39 = vadd.f32 1e-08, %v6819_v1 }
0x11cd   : > { %v3817_v18 = vsel %vm818_vm1, %v3800_v62, 0.0  ;;  %v3775_v54 = vmul.f32 %v4540_v42, %v3774_v3  ;;  %v3675_v59 = vadd.f32 1.0, %v4544_v47  ;;  %vm3737_vm7 = vcmp.eq.f32.partialorder %v3736_v8, 8.507059e+37 }
0x11ce   : > { %3806 = vadd.xlane.f32.xlu0 %v3805_v10  ;;  %3818 = vadd.xlane.f32.xlu2 %v3817_v18  ;;  %v3715_v51 = vmul.f32 %v4542_v12, %v3714_v63  ;;  %v4546_v29 = vpop.eup %4545  ;;  %v6614_v47 = vadd.f32 1e-08, %v5072_v57  ;;  %v6626_v1 = vadd.f32 1e-08, %v5035_v21  ;;  %vm766_vm3 = vcmp.eq.f32.partialorder %v6611_v39, inf }
0x11cf   : > { %v3776_v34 = vadd.f32 %v4540_v42, %v3775_v54  ;;  %v3728_v48 = vmul.f32 %v4546_v29, %v3678_v52  ;;  %4547 = vrcp.f32 %v3675_v59  ;;  %vm3733_vm14 = vweird.f32 %v4546_v29 }
0x11d0   : > { %v3716_v56 = vadd.f32 %v4542_v12, %v3715_v51  ;;  %vm3734_vm10 = vmor %vm3732_vm15, %vm3733_vm14  ;;  %v3693_v40 = vand.u32 2147483648, %v3675_v59  ;;  %v3691_v62 = vand.u32 2147483647, %v3675_v59  ;;  %vm3687_vm8 = vweird.f32 %v3675_v59 }
0x11d1   : > { %v3780_v13 = vsel %vm3779_vm0, %v4540_v42, %v3776_v34  ;;  %v3729_v26 = vsub.f32 1.0, %v3728_v48  ;;  %v6608_v54 = vadd.f32 1e-08, %v6817_v31  ;;  %vm742_vm0 = vcmp.eq.f32.partialorder %v6614_v47, inf }
0x11d2   : > { %v3785_v43 = vsel %vm3782_vm4, %v3784_v33, %v3780_v13  ;;  %v3720_v6 = vsel %vm3719_vm12, %v4542_v12, %v3716_v56  ;;  %v3694_v3 = vor.u32 1.1754944e-38, %v3693_v40  ;;  %vm3692_vm2 = vcmp.eq.f32.partialorder %v3691_v62, 8.507059e+37 }
0x11d3   : > { %v3793_v45 = vmul.f32 %v3785_v43, %v6533_v53  ;;  %v3725_v36 = vsel %vm3722_vm9, %v3724_v49, %v3720_v6  ;;  %v3730_v28 = vmul.f32 %v4546_v29, %v3729_v26  ;;  %4549 = vrsqrt.f32 %v6608_v54 }
0x11d4   : > { %v3789_v0 = vmul.f32 %v3725_v36, %v6536_v14  ;;  %4551 = vrsqrt.f32 %v6611_v39  ;;  %vm756_vm4 = vcmp.eq.f32.partialorder %v6608_v54, 0.0  ;;  %vm768_vm6 = vcmp.eq.f32.partialorder %v6611_v39, 0.0 }
0x11d5   : > { %v3801_v2 = vmul.f32 %v6562_v15, %v3793_v45  ;;  %v4548_v20 = vpop.eup %4547  ;;  %v3731_v50 = vadd.f32 %v4546_v29, %v3730_v28  ;;  %4553 = vrsqrt.f32 %v6614_v47  ;;  %vm744_vm12 = vcmp.eq.f32.partialorder %v6614_v47, 0.0 }
0x11d6   : > { %v3797_v61 = vmul.f32 %v6562_v15, %v3789_v0  ;;  %v3683_v4 = vmul.f32 %v4548_v20, %v3675_v59  ;;  %vm3688_vm5 = vweird.f32 %v4548_v20  ;;  %vm706_vm15 = vcmp.eq.f32.partialorder %v6626_v1, inf }
0x11d7   : > { %v3820_v32 = vsel %vm818_vm1, %v3801_v2, 0.0  ;;  %v3735_v14 = vsel %vm3734_vm10, %v4546_v29, %v3731_v50  ;;  %vm3689_vm11 = vmor %vm3687_vm8, %vm3688_vm5  ;;  %vm708_vm5 = vcmp.eq.f32.partialorder %v6626_v1, 0.0 }
0x11d8   : > { %3821 = vadd.xlane.f32.xlu1 %v3820_v32  ;;  %v3808_v53 = vsel %vm818_vm1, %v3797_v61, 0.0  ;;  %v3740_v42 = vsel %vm3737_vm7, %v3739_v19, %v3735_v14  ;;  %v3684_v38 = vsub.f32 1.0, %v3683_v4 }
0x11d9   : > { %3809 = vadd.xlane.f32.xlu2 %v3808_v53  ;;  %v3790_v12 = vmul.f32 %v3740_v42, %v6557_v17  ;;  %v4550_v31 = vpop.eup %4549 }
0x11da   : > { %v3685_v22 = vmul.f32 %v4548_v20, %v3684_v38  ;;  %v4552_v51 = vpop.eup %4551  ;;  %v748_v23 = vmul.f32 %v4550_v31, %v6608_v54 }
0x11db   : > { %v3798_v25 = vmul.f32 %v6562_v15, %v3790_v12  ;;  %v4554_v57 = vpop.eup %4553  ;;  %v760_v34 = vmul.f32 %v4552_v51, %v6611_v39 }
0x11dc   : > { %v3686_v52 = vadd.f32 %v4548_v20, %v3685_v22  ;;  %v749_v59 = vmul.f32 %v4550_v31, %v748_v23 }
0x11dd   : > { %v3811_v10 = vsel %vm818_vm1, %v3798_v25, 0.0  ;;  %v761_v21 = vmul.f32 %v4552_v51, %v760_v34 }
0x11de   : > { %v3690_v18 = vsel %vm3689_vm11, %v4548_v20, %v3686_v52  ;;  %v750_v49 = vmul.f32 0.5, %v749_v59 }
0x11df   : > { %v3695_v5 = vsel %vm3692_vm2, %v3694_v3, %v3690_v18  ;;  %v762_v43 = vmul.f32 0.5, %v761_v21 }
0x11e0   : > { %3812 = vadd.xlane.f32.xlu1 %v3811_v10  ;;  %v3787_v41 = vmul.f32 %v3695_v5, %v6576_v27  ;;  %v6623_v27 = vadd.f32 1e-08, %v5057_v44  ;;  %v6635_v44 = vadd.f32 1e-08, %v5021_v11  ;;  %v751_v26 = vsub.f32 1.5, %v750_v49 }
0x11e1   : > { %v763_v0 = vsub.f32 1.5, %v762_v43  ;;  %v757_v10 = vand.u32 2147483648, %v6608_v54 }
0x11e2   : > { %v3795_v17 = vmul.f32 %v6562_v15, %v3787_v41  ;;  %v6620_v15 = vadd.f32 1e-08, %v5046_v30  ;;  %v736_v30 = vmul.f32 %v4554_v57, %v6614_v47  ;;  %v752_v61 = vmul.f32 %v4550_v31, %v751_v26 }
0x11e3   : > { %v764_v32 = vmul.f32 %v4552_v51, %v763_v0  ;;  %v769_v41 = vand.u32 2147483648, %v6611_v39  ;;  %v745_v51 = vand.u32 2147483648, %v6614_v47  ;;  %vm730_vm14 = vcmp.eq.f32.partialorder %v6623_v27, inf }
0x11e4   : > { %v3802_v63 = vsel %vm818_vm1, %v3795_v17, 0.0  ;;  %4555 = vrsqrt.f32 %v6620_v15  ;;  %v737_v56 = vmul.f32 %v4554_v57, %v736_v30  ;;  %v753_v14 = vmul.f32 %v752_v61, %v6608_v54 }
0x11e5   : > { %4557 = vrsqrt.f32 %v6623_v27  ;;  %v765_v38 = vmul.f32 %v764_v32, %v6611_v39  ;;  %vm754_vm1 = vcmp.eq.f32.partialorder %v6608_v54, inf  ;;  %vm718_vm9 = vcmp.eq.f32.partialorder %v6620_v15, inf }
0x11e6   : > { %4559 = vrsqrt.f32 %v6626_v1  ;;  %v738_v45 = vmul.f32 0.5, %v737_v56  ;;  %v755_v25 = vsel %vm754_vm1, %v6608_v54, %v753_v14  ;;  %v721_v56 = vand.u32 2147483648, %v6620_v15  ;;  %v6851_v14 = vld [vmem:[#allocation14_spill] sm:$0xff] }
0x11e7   : > { %4561 = vrsqrt.f32 %v6635_v44  ;;  %v767_v3 = vsel %vm766_vm3, %v6611_v39, %v765_v38  ;;  %v758_v31 = vsel %vm756_vm4, %v757_v10, %v755_v25  ;;  %vm720_vm10 = vcmp.eq.f32.partialorder %v6620_v15, 0.0 }
0x11e8   : > { %3803 = vadd.xlane.f32.xlu1 %v3802_v63  ;;  %v739_v28 = vsub.f32 1.5, %v738_v45  ;;  %v770_v23 = vsel %vm768_vm6, %v769_v41, %v767_v3  ;;  %v776_v54 = vadd.f32 1.0, %v758_v31  ;;  %v733_v49 = vand.u32 2147483648, %v6623_v27 }
0x11e9   : > { %v777_v21 = vadd.f32 1.0, %v770_v23  ;;  %vm732_vm7 = vcmp.eq.f32.partialorder %v6623_v27, 0.0  ;;  %vm694_vm8 = vcmp.eq.f32.partialorder %v6635_v44, inf  ;;  %vm696_vm11 = vcmp.eq.f32.partialorder %v6635_v44, 0.0 }
0x11ea   : > { %v4556_v29 = vpop.eup %4555  ;;  %v740_v19 = vmul.f32 %v4554_v57, %v739_v28  ;;  %4563 = vrcp.f32 %v776_v54 }
0x11eb   : > { %v4558_v33 = vpop.eup %4557  ;;  %v712_v48 = vmul.f32 %v4556_v29, %v6620_v15  ;;  %4565 = vrcp.f32 %v777_v21 }
0x11ec   : > { %v4560_v13 = vpop.eup %4559  ;;  %v724_v6 = vmul.f32 %v4558_v33, %v6623_v27  ;;  %v741_v22 = vmul.f32 %v740_v19, %v6614_v47 }
0x11ed   : > { %v700_v36 = vmul.f32 %v4560_v13, %v6626_v1  ;;  %v713_v11 = vmul.f32 %v4556_v29, %v712_v48  ;;  %v4562_v2 = vpop.eup %4561 }
0x11ee   : > { %v725_v16 = vmul.f32 %v4558_v33, %v724_v6  ;;  %v688_v53 = vmul.f32 %v4562_v2, %v6635_v44  ;;  %v743_v17 = vsel %vm742_vm0, %v6614_v47, %v741_v22  ;;  %v709_v6 = vand.u32 2147483648, %v6626_v1 }
0x11ef   : > { %v701_v8 = vmul.f32 %v4560_v13, %v700_v36  ;;  %v714_v20 = vmul.f32 0.5, %v713_v11  ;;  %v746_v59 = vsel %vm744_vm12, %v745_v51, %v743_v17  ;;  %v6853_v17 = vld [vmem:[#allocation12_spill] sm:$0xff] }
0x11f0   : > { %v726_v50 = vmul.f32 0.5, %v725_v16  ;;  %v689_v40 = vmul.f32 %v4562_v2, %v688_v53  ;;  %v775_v39 = vadd.f32 1.0, %v746_v59 }
0x11f1   : > { %v702_v4 = vmul.f32 0.5, %v701_v8  ;;  %v715_v42 = vsub.f32 1.5, %v714_v20 }
0x11f2   : > { %v727_v12 = vsub.f32 1.5, %v726_v50  ;;  %v690_v5 = vmul.f32 0.5, %v689_v40  ;;  %4567 = vrcp.f32 %v775_v39  ;;  %v6850_v50 = vld [vmem:[#allocation15_spill] sm:$0xff] }
0x11f3   : > { %v703_v62 = vsub.f32 1.5, %v702_v4  ;;  %v716_v52 = vmul.f32 %v4556_v29, %v715_v42 }
0x11f4   : > { %v728_v18 = vmul.f32 %v4558_v33, %v727_v12  ;;  %v691_v30 = vsub.f32 1.5, %v690_v5  ;;  %v6852_v5 = vld [vmem:[#allocation11_spill] sm:$0xff] }
0x11f5   : > { %v704_v63 = vmul.f32 %v4560_v13, %v703_v62  ;;  %v717_v57 = vmul.f32 %v716_v52, %v6620_v15 }
0x11f6   : > { %v729_v34 = vmul.f32 %v728_v18, %v6623_v27  ;;  %v692_v47 = vmul.f32 %v4562_v2, %v691_v30 }
0x11f7   : > { %v705_v29 = vmul.f32 %v704_v63, %v6626_v1  ;;  %v719_v33 = vsel %vm718_vm9, %v6620_v15, %v717_v57  ;;  %v4564_v15 = vpop.eup %4563  ;;  %v6854_v57 = vld [vmem:[#allocation10_spill] sm:$0xff] }
0x11f8   : > { %v731_v13 = vsel %vm730_vm14, %v6623_v27, %v729_v34  ;;  %v722_v43 = vsel %vm720_vm10, %v721_v56, %v719_v33  ;;  %v693_v36 = vmul.f32 %v692_v47, %v6635_v44  ;;  %v4566_v16 = vpop.eup %4565  ;;  %v697_v27 = vand.u32 2147483648, %v6635_v44 }
0x11f9   : > { %v707_v48 = vsel %vm706_vm15, %v6626_v1, %v705_v29  ;;  %v734_v45 = vsel %vm732_vm7, %v733_v49, %v731_v13  ;;  %v773_v11 = vadd.f32 1.0, %v722_v43  ;;  %v4568_v61 = vpop.eup %4567  ;;  %v6849_v1 = vld [vmem:[#allocation13_spill] sm:$0xff]  ;;  %v791_v53 = vmul.f32 %v4566_v16, %v6850_v50 }
0x11fa   : > { %v710_v26 = vsel %vm708_vm5, %v709_v6, %v707_v48  ;;  %v774_v0 = vadd.f32 1.0, %v734_v45  ;;  %v695_v8 = vsel %vm694_vm8, %v6635_v44, %v693_v36  ;;  %v790_v32 = vmul.f32 %v4564_v15, %v6849_v1  ;;  %v6855_v29 = vld [vmem:[#allocation9_spill] sm:$0xff] }
0x11fb   : > { %v772_v2 = vadd.f32 1.0, %v710_v26  ;;  %4569 = vrcp.f32 %v773_v11  ;;  %v698_v19 = vsel %vm696_vm11, %v697_v27, %v695_v8  ;;  %v789_v42 = vmul.f32 %v4568_v61, %v6851_v14 }
0x11fc   : > { %4571 = vrcp.f32 %v774_v0  ;;  %v771_v40 = vadd.f32 1.0, %v698_v19 }
0x11fd   : > { %4573 = vrcp.f32 %v772_v2 }
0x11fe   : > { %4575 = vrcp.f32 %v771_v40 }
0x1201   : > { %v4570_v22 = vpop.eup %4569 }
0x1202   : > { %v4572_v52 = vpop.eup %4571  ;;  %v787_v41 = vmul.f32 %v4570_v22, %v6852_v5 }
0x1203   : > { %v4574_v44 = vpop.eup %4573  ;;  %v788_v63 = vmul.f32 %v4572_v52, %v6853_v17 }
0x1204   : > { %v786_v23 = vmul.f32 %v4574_v44, %v6854_v57  ;;  %v4576_v59 = vpop.eup %4575 }
0x1205   : > { %v785_v21 = vmul.f32 %v4576_v59, %v6855_v29 }
0x1239   : > { %v3816_v20 = vpop.xlane.xlu0 %3815 }
0x123a   : > { %v3827_v62 = vmul.f32 %v3816_v20, %v789_v42 }
0x123c   : > { %v3834_v18 = vmul.f32 %v3827_v62, %v5388_v35 }
0x1241   : > { %v3819_v28 = vpop.xlane.xlu2 %3818  ;;  %v3807_v31 = vpop.xlane.xlu0 %3806 }
0x1242   : > { %v3828_v38 = vmul.f32 %v3819_v28, %v790_v32 }
0x1244   : > { %v3835_v10 = vmul.f32 %v3828_v38, %v5378_v7  ;;  %v3824_v7 = vmul.f32 %v3807_v31, %v786_v23 }
0x1246   : > { %v3831_v54 = vmul.f32 %v3824_v7, %v5545_v55 }
0x124b   : > { %v3822_v4 = vpop.xlane.xlu1 %3821 }
0x124c   : > { %v3829_v12 = vmul.f32 %v3822_v4, %v791_v53  ;;  %v3810_v3 = vpop.xlane.xlu2 %3809 }
0x124d   : > { %v3825_v34 = vmul.f32 %v3810_v3, %v787_v41 }
0x124e   : > { %v3836_v25 = vmul.f32 %v3829_v12, %v5386_v46 }
0x124f   : > { %v3832_v35 = vmul.f32 %v3825_v34, %v5396_v37 }
0x1250   : > { %3846 = vmatpush.msrb.mxu1 %v3836_v25 }
0x1252   : > { %3847 = vmatpush.msrb.mxu1 %v3835_v10 }
0x1253   : > { %v3813_v51 = vpop.xlane.xlu1 %3812 }
0x1254   : > { %v3826_v46 = vmul.f32 %v3813_v51, %v788_v63  ;;  %3848 = vmatpush.msrb.mxu1 %v3834_v18 }
0x1256   : > { %v3833_v30 = vmul.f32 %v3826_v46, %v5398_v9 }
0x1258   : > { %3849 = vmatpush.msrb.mxu1 %v3833_v30 }
0x125a   : > { %3850 = vmatpush.msrb.mxu1 %v3832_v35 }
0x125b   : > { %v3804_v33 = vpop.xlane.xlu1 %3803 }
0x125c   : > { %v3823_v39 = vmul.f32 %v3804_v33, %v785_v21  ;;  %3851 = vmatpush.msrb.mxu1 %v3831_v54 }
0x125e   : > { %v3830_v56 = vmul.f32 %v3823_v39, %v5549_v24 }
0x1260   : > { %3852 = vmatpush.msrb.mxu1 %v3830_v56 }
0x1261   : > { %4202 = vmatmul.msk.f32.vlgmr.msrb.gmra.mxu1 %vm1779_vm13, %v5580_v58 }
0x1262   : > { %4634 = shalt.err (!%p4631_p3)
}
0x1263   : > { %4209 = dma.vmem_to_hbm [thread:$0]  (%p4776_p5), %s3880_s26, 128, %s3882_s23, %s3863_s27   ;;  %v4606_v9 = vld [vmem:[%s4797_s19] sm:$0xff]  ;;  %vm6856_vm13 = vcmask 23552  }
0x1264   : > { %s493_s0 = scalar_lea.vmem %s6747_s12, %s4791_s16 }
0x12de   : > { %v3854_v37 = vpop.f32.mrf.mxu1 }
0x12df   : > { %v3857_v55 = vadd.f32 %v4606_v9, %v3854_v37 }
0x12e1   : > { %v3858_v24 = vmul.f32 %v3857_v55, %v5643_v60 }
0x12e3   : > { %3859 = vst.msk [vmem:[%s493_s0] sm:$0xff] %vm6856_vm13, %v3858_v24 }
0x12e4 PF: > { %p4215_p4 = scmp.ge.s32.totalorder %s4669_s24, 2  ;;  %s3896_s13 = sand.u32 1, %s4657_s21  }
0x12e5   : > { %s3897_s30 = scalar_lea.sflag [#allocation3], %s3896_s13 }
0x12e6   : > { %p4212_p7 = pnand %p4215_p4, %p4780_p6 }
0x12e8   : > { %p4213_p5 = pneg %p4212_p7 }
0x12ea   : > { %4652 = dma.done.wait (%p4213_p5), %s3897_s30, 128  }
0x12eb   : > { %4654 = vsyncadd (%p4213_p5), %s3897_s30, 4294967168  ;;  %s6858_s24 = sld [smem:[#allocation6_spill]]  ;;  %s6861_s21 = smov %s4661_s22 }
0x12ec   : > { %s6859_s19 = sld [smem:[#allocation5_spill]] }
0x12ed   : > { %s6860_s23 = sld [smem:[#allocation7_spill]] }
0x12f1   : > { %p23_p8 = scmp.ge.s32.totalorder %s6858_s24, 6  }
0x12f2   : > { %s6862_s22 = smov %s6859_s19 }
0x12f3   :  { %25 = sbr.rel (!%p23_p8) target bundleno = 7 (0x7), region = 125 }
0x12f8   :  { %3910 = vsyncpa [#allocation3], 1 }
0x12f9   :  { %3912 = vsyncpa [#allocation3 + $0x1], 1 }

</bundles_post_ra>
